<compile_context>
chip_gen: v5e
topology: v5e:2x2
jax: 0.10.0
libtpu: 0.0.40
codegen_flags: <defaults>
</compile_context>

<pallas_src>
import math
import jax
import jax.numpy as jnp
from jax.experimental import pallas as pl
from jax.experimental.pallas import tpu as pltpu  # noqa: F401  (TPU backend import)

# ----------------------------- model dims (small) -----------------------------
B = 2          # batch
S = 8          # sequence length
D_MODEL = 32   # model width
N_HEADS = 4
D_K = D_MODEL // N_HEADS
D_FF = 64
N_LAYERS = 2
LN_EPS = 1e-6


# ------------------------------- fused kernel ---------------------------------
def encoder_kernel(x_ref, bias_ref, w_in_ref, w_out_ref, b_in_ref, vecs_ref, o_ref):
    def layer_norm(v, g, b):
        # Annotated-Transformer LayerNorm: a_2*(x-mean)/(std+eps)+b_2,
        # unbiased std (ddof=1) over the last axis. Exact math (no approx recip).
        mean = jnp.mean(v, axis=-1, keepdims=True)
        var = jnp.sum((v - mean) ** 2, axis=-1, keepdims=True) / (D_MODEL - 1)
        return g * (v - mean) / (jnp.sqrt(var) + LN_EPS) + b

    # TODO(synk): dropout in SublayerConnection / attention is identity (eval mode).
    for b in range(B):  # B=2: unrolled inside the single grid step; weights shared.
        x = x_ref[b]                                     # (S, D_MODEL) f32
        bias_b = jnp.broadcast_to(bias_ref[b], (S, S))   # hoisted: one broadcast per batch

        for l in range(N_LAYERS):
            base = 6 * l
            ln1_g = vecs_ref[base + 0]
            ln1_b = vecs_ref[base + 1]
            bo    = vecs_ref[base + 2]
            ln2_g = vecs_ref[base + 3]
            ln2_b = vecs_ref[base + 4]
            b2    = vecs_ref[base + 5]

            w_in = w_in_ref[l]      # (D_MODEL, 3*D_MODEL + D_FF) = [Wq|Wk|Wv|W1]
            w_out = w_out_ref[l]    # (D_MODEL + D_FF, D_MODEL)   = [Wo ; W2]
            b_in = b_in_ref[l]      # (1, 3*D_MODEL + D_FF)       = [bq|bk|bv|b1]

            # ---------- sublayer 1: x + self_attn(norm(x)) ----------
            xn = layer_norm(x, ln1_g, ln1_b)
            qkv = jnp.dot(xn, w_in[:, :3 * D_MODEL],
                          preferred_element_type=jnp.float32) + b_in[:, :3 * D_MODEL]
            q = qkv[:, 0:D_MODEL]                 # 1/sqrt(d_k) pre-folded into Wq, bq
            k = qkv[:, D_MODEL:2 * D_MODEL]
            v = qkv[:, 2 * D_MODEL:3 * D_MODEL]
            wo = w_out[:D_MODEL, :]

            attn = jnp.zeros((S, D_MODEL), jnp.float32)
            for h in range(N_HEADS):
                sl = slice(h * D_K, (h + 1) * D_K)
                qh, kh, vh = q[:, sl], k[:, sl], v[:, sl]       # (S, D_K) each
                # scores = qh @ kh^T  (contract on last dims -> no transpose)
                s = jax.lax.dot_general(qh, kh, (((1,), (1,)), ((), ())),
                                        preferred_element_type=jnp.float32)
                s = s + bias_b                                   # (S,S) additive mask
                s = s - jnp.max(s, axis=-1, keepdims=True)
                e = jnp.exp(s)
                p = e * pl.reciprocal(jnp.sum(e, axis=-1, keepdims=True), approx=True)
                head = jnp.dot(p, vh, preferred_element_type=jnp.float32)
                # fold out-projection into the head loop: no lane-axis concat.
                attn = attn + jnp.dot(head, wo[sl, :],
                                      preferred_element_type=jnp.float32)
            x = x + attn + bo

            # ---------- sublayer 2: x + ffn(norm(x)) ----------
            xn = layer_norm(x, ln2_g, ln2_b)
            hmid = jnp.maximum(
                jnp.dot(xn, w_in[:, 3 * D_MODEL:],
                        preferred_element_type=jnp.float32) + b_in[:, 3 * D_MODEL:],
                0.0)
            x = x + jnp.dot(hmid, w_out[D_MODEL:, :],
                            preferred_element_type=jnp.float32) + b2

        # final LayerNorm
        fg = vecs_ref[6 * N_LAYERS]
        fb = vecs_ref[6 * N_LAYERS + 1]
        o_ref[b] = layer_norm(x, fg, fb)


# ------------------------------ kernel wrapper ---------------------------------
def encoder_forward(params, x, mask):
    # mask (B, 1, S) of {0,1} -> additive bias once, outside the kernel.
    bias = (1.0 - mask.astype(jnp.float32)) * jnp.float32(-1e9)
    # No grid: single kernel invocation, all 6 inputs fully VMEM-resident
    # (~0.2 MiB total), no megacore split at this tiny size.
    return pl.pallas_call(
        encoder_kernel,
        out_shape=jax.ShapeDtypeStruct((B, S, D_MODEL), jnp.float32),
    )(x, bias,
      params["w_in"], params["w_out"], params["b_in"], params["vecs"])


# ------------------------------- parameter init --------------------------------
def init_params(key):
    def lin(k, d_in, d_out):
        kw, kb = jax.random.split(k)
        w = jax.random.normal(kw, (d_in, d_out), jnp.float32) * 0.02  # stored (in,out)
        b = jax.random.normal(kb, (1, d_out), jnp.float32) * 0.02
        return w, b

    scale = jnp.float32(1.0 / math.sqrt(D_K))
    ones = jnp.ones((1, D_MODEL), jnp.float32)
    zeros = jnp.zeros((1, D_MODEL), jnp.float32)

    w_in, w_out, b_in, vecs = [], [], [], []
    for _ in range(N_LAYERS):
        key, *ks = jax.random.split(key, 7)
        wq, bq = lin(ks[0], D_MODEL, D_MODEL)
        wk, bk = lin(ks[1], D_MODEL, D_MODEL)
        wv, bv = lin(ks[2], D_MODEL, D_MODEL)
        wo, bo = lin(ks[3], D_MODEL, D_MODEL)
        w1, b1 = lin(ks[4], D_MODEL, D_FF)
        w2, b2 = lin(ks[5], D_FF, D_MODEL)
        # fold 1/sqrt(d_k) into the Q projection (mathematically equivalent).
        wq, bq = wq * scale, bq * scale

        w_in.append(jnp.concatenate([wq, wk, wv, w1], axis=1))    # (D, 3D + D_FF)
        w_out.append(jnp.concatenate([wo, w2], axis=0))           # (D + D_FF, D)
        b_in.append(jnp.concatenate([bq, bk, bv, b1], axis=1))    # (1, 3D + D_FF)
        # per-layer D_MODEL-wide vectors: ln1_g, ln1_b, bo, ln2_g, ln2_b, b2
        vecs.extend([ones, zeros, bo, ones, zeros, b2])
    # final LayerNorm gamma / beta
    vecs.extend([ones, zeros])

    return dict(
        w_in=jnp.stack(w_in, axis=0),      # (L, D, 3D+D_FF)
        w_out=jnp.stack(w_out, axis=0),    # (L, D+D_FF, D)
        b_in=jnp.stack(b_in, axis=0),      # (L, 1, 3D+D_FF)
        vecs=jnp.stack(vecs, axis=0),      # (6L+2, 1, D)
    )


# ------------------------------------ main --------------------------------------
if __name__ == "__main__":
    key = jax.random.PRNGKey(0)
    kx, kp = jax.random.split(key)
    x = jax.random.normal(kx, (B, S, D_MODEL), jnp.float32)
    # source mask (batch, 1, seq): last two positions of batch 1 are padding
    mask = jnp.ones((B, 1, S), jnp.float32).at[1, 0, -2:].set(0.0)
    params = init_params(kp)

    out = jax.jit(encoder_forward)(params, x, mask)
    out = jax.block_until_ready(out)
    assert out.shape == (B, S, D_MODEL) and out.dtype == jnp.float32
    assert bool(jnp.all(jnp.isfinite(out)))
    print("KERNEL_OK")
</pallas_src>

<mosaic_0001>
module attributes {stable_mosaic.version = 11 : i64} {
  func.func @encoder_kernel(%arg0: memref<2x8x32xf32, #tpu.memory_space<vmem>>, %arg1: memref<2x1x8xf32, #tpu.memory_space<vmem>>, %arg2: memref<2x32x160xf32, #tpu.memory_space<vmem>>, %arg3: memref<2x96x32xf32, #tpu.memory_space<vmem>>, %arg4: memref<2x1x160xf32, #tpu.memory_space<vmem>>, %arg5: memref<14x1x32xf32, #tpu.memory_space<vmem>>, %arg6: memref<2x8x32xf32, #tpu.memory_space<vmem>>) attributes {dimension_semantics = [], scalar_prefetch = 0 : i64, scratch_operands = 0 : i64, tpu.core_type = #tpu.core_type<tc>} {
    %c0 = arith.constant 0 : index
    %c0_0 = arith.constant 0 : index
    %c0_1 = arith.constant 0 : index
    %0 = vector.load %arg0[%c0, %c0_0, %c0_1] : memref<2x8x32xf32, #tpu.memory_space<vmem>>, vector<1x8x32xf32>
    %1 = vector.shape_cast %0 : vector<1x8x32xf32> to vector<8x32xf32>
    %c0_2 = arith.constant 0 : index
    %c0_3 = arith.constant 0 : index
    %c0_4 = arith.constant 0 : index
    %2 = vector.load %arg1[%c0_2, %c0_3, %c0_4] : memref<2x1x8xf32, #tpu.memory_space<vmem>>, vector<1x1x8xf32>
    %3 = vector.shape_cast %2 : vector<1x1x8xf32> to vector<1x8xf32>
    %4 = vector.shape_cast %3 : vector<1x8xf32> to vector<1x8xf32>
    %5 = vector.broadcast %4 : vector<1x8xf32> to vector<8x8xf32>
    %c0_5 = arith.constant 0 : index
    %c0_6 = arith.constant 0 : index
    %c0_7 = arith.constant 0 : index
    %6 = vector.load %arg5[%c0_5, %c0_6, %c0_7] : memref<14x1x32xf32, #tpu.memory_space<vmem>>, vector<1x1x32xf32>
    %7 = vector.shape_cast %6 : vector<1x1x32xf32> to vector<1x32xf32>
    %c1 = arith.constant 1 : index
    %c0_8 = arith.constant 0 : index
    %c0_9 = arith.constant 0 : index
    %8 = vector.load %arg5[%c1, %c0_8, %c0_9] : memref<14x1x32xf32, #tpu.memory_space<vmem>>, vector<1x1x32xf32>
    %9 = vector.shape_cast %8 : vector<1x1x32xf32> to vector<1x32xf32>
    %c2 = arith.constant 2 : index
    %c0_10 = arith.constant 0 : index
    %c0_11 = arith.constant 0 : index
    %10 = vector.load %arg5[%c2, %c0_10, %c0_11] : memref<14x1x32xf32, #tpu.memory_space<vmem>>, vector<1x1x32xf32>
    %11 = vector.shape_cast %10 : vector<1x1x32xf32> to vector<1x32xf32>
    %c3 = arith.constant 3 : index
    %c0_12 = arith.constant 0 : index
    %c0_13 = arith.constant 0 : index
    %12 = vector.load %arg5[%c3, %c0_12, %c0_13] : memref<14x1x32xf32, #tpu.memory_space<vmem>>, vector<1x1x32xf32>
    %13 = vector.shape_cast %12 : vector<1x1x32xf32> to vector<1x32xf32>
    %c4 = arith.constant 4 : index
    %c0_14 = arith.constant 0 : index
    %c0_15 = arith.constant 0 : index
    %14 = vector.load %arg5[%c4, %c0_14, %c0_15] : memref<14x1x32xf32, #tpu.memory_space<vmem>>, vector<1x1x32xf32>
    %15 = vector.shape_cast %14 : vector<1x1x32xf32> to vector<1x32xf32>
    %c5 = arith.constant 5 : index
    %c0_16 = arith.constant 0 : index
    %c0_17 = arith.constant 0 : index
    %16 = vector.load %arg5[%c5, %c0_16, %c0_17] : memref<14x1x32xf32, #tpu.memory_space<vmem>>, vector<1x1x32xf32>
    %17 = vector.shape_cast %16 : vector<1x1x32xf32> to vector<1x32xf32>
    %c0_18 = arith.constant 0 : index
    %c0_19 = arith.constant 0 : index
    %c0_20 = arith.constant 0 : index
    %18 = vector.load %arg2[%c0_18, %c0_19, %c0_20] : memref<2x32x160xf32, #tpu.memory_space<vmem>>, vector<1x32x160xf32>
    %19 = vector.shape_cast %18 : vector<1x32x160xf32> to vector<32x160xf32>
    %c0_21 = arith.constant 0 : index
    %c0_22 = arith.constant 0 : index
    %c0_23 = arith.constant 0 : index
    %20 = vector.load %arg3[%c0_21, %c0_22, %c0_23] : memref<2x96x32xf32, #tpu.memory_space<vmem>>, vector<1x96x32xf32>
    %21 = vector.shape_cast %20 : vector<1x96x32xf32> to vector<96x32xf32>
    %c0_24 = arith.constant 0 : index
    %c0_25 = arith.constant 0 : index
    %c0_26 = arith.constant 0 : index
    %22 = vector.load %arg4[%c0_24, %c0_25, %c0_26] : memref<2x1x160xf32, #tpu.memory_space<vmem>>, vector<1x1x160xf32>
    %23 = vector.shape_cast %22 : vector<1x1x160xf32> to vector<1x160xf32>
    %cst = arith.constant dense<0.000000e+00> : vector<8xf32>
    %24 = vector.multi_reduction <add>, %1, %cst [1] : vector<8x32xf32> to vector<8xf32>
    %25 = vector.shape_cast %24 : vector<8xf32> to vector<8x1xf32>
    %cst_27 = arith.constant 3.200000e+01 : f32
    %26 = vector.broadcast %cst_27 : f32 to vector<8x1xf32>
    %27 = arith.divf %25, %26 : vector<8x1xf32>
    %28 = vector.broadcast %27 : vector<8x1xf32> to vector<8x32xf32>
    %29 = arith.subf %1, %28 : vector<8x32xf32>
    %30 = arith.mulf %29, %29 : vector<8x32xf32>
    %cst_28 = arith.constant dense<0.000000e+00> : vector<8xf32>
    %31 = vector.multi_reduction <add>, %30, %cst_28 [1] : vector<8x32xf32> to vector<8xf32>
    %32 = vector.shape_cast %31 : vector<8xf32> to vector<8x1xf32>
    %cst_29 = arith.constant 3.100000e+01 : f32
    %33 = vector.broadcast %cst_29 : f32 to vector<8x1xf32>
    %34 = arith.divf %32, %33 : vector<8x1xf32>
    %35 = vector.broadcast %27 : vector<8x1xf32> to vector<8x32xf32>
    %36 = arith.subf %1, %35 : vector<8x32xf32>
    %37 = vector.broadcast %7 : vector<1x32xf32> to vector<8x32xf32>
    %38 = arith.mulf %37, %36 : vector<8x32xf32>
    %39 = math.sqrt %34 : vector<8x1xf32>
    %cst_30 = arith.constant 9.99999997E-7 : f32
    %40 = vector.broadcast %cst_30 : f32 to vector<8x1xf32>
    %41 = arith.addf %39, %40 : vector<8x1xf32>
    %42 = vector.broadcast %41 : vector<8x1xf32> to vector<8x32xf32>
    %43 = arith.divf %38, %42 : vector<8x32xf32>
    %44 = vector.broadcast %9 : vector<1x32xf32> to vector<8x32xf32>
    %45 = arith.addf %43, %44 : vector<8x32xf32>
    %46 = vector.extract_strided_slice %19 {offsets = [0, 0], sizes = [32, 96], strides = [1, 1]} : vector<32x160xf32> to vector<32x96xf32>
    %cst_31 = arith.constant dense<0.000000e+00> : vector<8x96xf32>
    %47 = tpu.matmul %45, %46, %cst_31 {dimension_numbers = #tpu.dot_dimension_numbers<[1], [0], [0], [1], [0, 0, 1, 1], [], []>} : vector<8x32xf32>, vector<32x96xf32>, vector<8x96xf32> -> vector<8x96xf32>
    %48 = vector.extract_strided_slice %23 {offsets = [0, 0], sizes = [1, 96], strides = [1, 1]} : vector<1x160xf32> to vector<1x96xf32>
    %49 = vector.broadcast %48 : vector<1x96xf32> to vector<8x96xf32>
    %50 = arith.addf %47, %49 : vector<8x96xf32>
    %51 = vector.extract_strided_slice %50 {offsets = [0, 0], sizes = [8, 32], strides = [1, 1]} : vector<8x96xf32> to vector<8x32xf32>
    %52 = vector.extract_strided_slice %50 {offsets = [0, 32], sizes = [8, 32], strides = [1, 1]} : vector<8x96xf32> to vector<8x32xf32>
    %53 = vector.extract_strided_slice %50 {offsets = [0, 64], sizes = [8, 32], strides = [1, 1]} : vector<8x96xf32> to vector<8x32xf32>
    %54 = vector.extract_strided_slice %21 {offsets = [0, 0], sizes = [32, 32], strides = [1, 1]} : vector<96x32xf32> to vector<32x32xf32>
    %cst_32 = arith.constant 0.000000e+00 : f32
    %55 = vector.broadcast %cst_32 : f32 to vector<8x32xf32>
    %56 = vector.extract_strided_slice %51 {offsets = [0, 0], sizes = [8, 8], strides = [1, 1]} : vector<8x32xf32> to vector<8x8xf32>
    %57 = vector.extract_strided_slice %52 {offsets = [0, 0], sizes = [8, 8], strides = [1, 1]} : vector<8x32xf32> to vector<8x8xf32>
    %58 = vector.extract_strided_slice %53 {offsets = [0, 0], sizes = [8, 8], strides = [1, 1]} : vector<8x32xf32> to vector<8x8xf32>
    %cst_33 = arith.constant dense<0.000000e+00> : vector<8x8xf32>
    %59 = tpu.matmul %56, %57, %cst_33 {dimension_numbers = #tpu.dot_dimension_numbers<[1], [1], [0], [0], [0, 0, 1, 0], [], []>} : vector<8x8xf32>, vector<8x8xf32>, vector<8x8xf32> -> vector<8x8xf32>
    %60 = arith.addf %59, %5 : vector<8x8xf32>
    %cst_34 = arith.constant dense<0xFF800000> : vector<8xf32>
    %61 = vector.multi_reduction <maximumf>, %60, %cst_34 [1] : vector<8x8xf32> to vector<8xf32>
    %62 = vector.shape_cast %61 : vector<8xf32> to vector<8x1xf32>
    %63 = vector.broadcast %62 : vector<8x1xf32> to vector<8x8xf32>
    %64 = arith.subf %60, %63 : vector<8x8xf32>
    %65 = math.exp %64 : vector<8x8xf32>
    %cst_35 = arith.constant dense<0.000000e+00> : vector<8xf32>
    %66 = vector.multi_reduction <add>, %65, %cst_35 [1] : vector<8x8xf32> to vector<8xf32>
    %67 = vector.shape_cast %66 : vector<8xf32> to vector<8x1xf32>
    %68 = tpu.reciprocal %67 {approx = true} : vector<8x1xf32> -> vector<8x1xf32>
    %69 = vector.broadcast %68 : vector<8x1xf32> to vector<8x8xf32>
    %70 = arith.mulf %65, %69 : vector<8x8xf32>
    %cst_36 = arith.constant dense<0.000000e+00> : vector<8x8xf32>
    %71 = tpu.matmul %70, %58, %cst_36 {dimension_numbers = #tpu.dot_dimension_numbers<[1], [0], [0], [1], [0, 0, 1, 1], [], []>} : vector<8x8xf32>, vector<8x8xf32>, vector<8x8xf32> -> vector<8x8xf32>
    %72 = vector.extract_strided_slice %54 {offsets = [0, 0], sizes = [8, 32], strides = [1, 1]} : vector<32x32xf32> to vector<8x32xf32>
    %cst_37 = arith.constant dense<0.000000e+00> : vector<8x32xf32>
    %73 = tpu.matmul %71, %72, %cst_37 {dimension_numbers = #tpu.dot_dimension_numbers<[1], [0], [0], [1], [0, 0, 1, 1], [], []>} : vector<8x8xf32>, vector<8x32xf32>, vector<8x32xf32> -> vector<8x32xf32>
    %74 = arith.addf %55, %73 : vector<8x32xf32>
    %75 = vector.extract_strided_slice %51 {offsets = [0, 8], sizes = [8, 8], strides = [1, 1]} : vector<8x32xf32> to vector<8x8xf32>
    %76 = vector.extract_strided_slice %52 {offsets = [0, 8], sizes = [8, 8], strides = [1, 1]} : vector<8x32xf32> to vector<8x8xf32>
    %77 = vector.extract_strided_slice %53 {offsets = [0, 8], sizes = [8, 8], strides = [1, 1]} : vector<8x32xf32> to vector<8x8xf32>
    %cst_38 = arith.constant dense<0.000000e+00> : vector<8x8xf32>
    %78 = tpu.matmul %75, %76, %cst_38 {dimension_numbers = #tpu.dot_dimension_numbers<[1], [1], [0], [0], [0, 0, 1, 0], [], []>} : vector<8x8xf32>, vector<8x8xf32>, vector<8x8xf32> -> vector<8x8xf32>
    %79 = arith.addf %78, %5 : vector<8x8xf32>
    %cst_39 = arith.constant dense<0xFF800000> : vector<8xf32>
    %80 = vector.multi_reduction <maximumf>, %79, %cst_39 [1] : vector<8x8xf32> to vector<8xf32>
    %81 = vector.shape_cast %80 : vector<8xf32> to vector<8x1xf32>
    %82 = vector.broadcast %81 : vector<8x1xf32> to vector<8x8xf32>
    %83 = arith.subf %79, %82 : vector<8x8xf32>
    %84 = math.exp %83 : vector<8x8xf32>
    %cst_40 = arith.constant dense<0.000000e+00> : vector<8xf32>
    %85 = vector.multi_reduction <add>, %84, %cst_40 [1] : vector<8x8xf32> to vector<8xf32>
    %86 = vector.shape_cast %85 : vector<8xf32> to vector<8x1xf32>
    %87 = tpu.reciprocal %86 {approx = true} : vector<8x1xf32> -> vector<8x1xf32>
    %88 = vector.broadcast %87 : vector<8x1xf32> to vector<8x8xf32>
    %89 = arith.mulf %84, %88 : vector<8x8xf32>
    %cst_41 = arith.constant dense<0.000000e+00> : vector<8x8xf32>
    %90 = tpu.matmul %89, %77, %cst_41 {dimension_numbers = #tpu.dot_dimension_numbers<[1], [0], [0], [1], [0, 0, 1, 1], [], []>} : vector<8x8xf32>, vector<8x8xf32>, vector<8x8xf32> -> vector<8x8xf32>
    %91 = vector.extract_strided_slice %54 {offsets = [8, 0], sizes = [8, 32], strides = [1, 1]} : vector<32x32xf32> to vector<8x32xf32>
    %cst_42 = arith.constant dense<0.000000e+00> : vector<8x32xf32>
    %92 = tpu.matmul %90, %91, %cst_42 {dimension_numbers = #tpu.dot_dimension_numbers<[1], [0], [0], [1], [0, 0, 1, 1], [], []>} : vector<8x8xf32>, vector<8x32xf32>, vector<8x32xf32> -> vector<8x32xf32>
    %93 = arith.addf %74, %92 : vector<8x32xf32>
    %94 = vector.extract_strided_slice %51 {offsets = [0, 16], sizes = [8, 8], strides = [1, 1]} : vector<8x32xf32> to vector<8x8xf32>
    %95 = vector.extract_strided_slice %52 {offsets = [0, 16], sizes = [8, 8], strides = [1, 1]} : vector<8x32xf32> to vector<8x8xf32>
    %96 = vector.extract_strided_slice %53 {offsets = [0, 16], sizes = [8, 8], strides = [1, 1]} : vector<8x32xf32> to vector<8x8xf32>
    %cst_43 = arith.constant dense<0.000000e+00> : vector<8x8xf32>
    %97 = tpu.matmul %94, %95, %cst_43 {dimension_numbers = #tpu.dot_dimension_numbers<[1], [1], [0], [0], [0, 0, 1, 0], [], []>} : vector<8x8xf32>, vector<8x8xf32>, vector<8x8xf32> -> vector<8x8xf32>
    %98 = arith.addf %97, %5 : vector<8x8xf32>
    %cst_44 = arith.constant dense<0xFF800000> : vector<8xf32>
    %99 = vector.multi_reduction <maximumf>, %98, %cst_44 [1] : vector<8x8xf32> to vector<8xf32>
    %100 = vector.shape_cast %99 : vector<8xf32> to vector<8x1xf32>
    %101 = vector.broadcast %100 : vector<8x1xf32> to vector<8x8xf32>
    %102 = arith.subf %98, %101 : vector<8x8xf32>
    %103 = math.exp %102 : vector<8x8xf32>
    %cst_45 = arith.constant dense<0.000000e+00> : vector<8xf32>
    %104 = vector.multi_reduction <add>, %103, %cst_45 [1] : vector<8x8xf32> to vector<8xf32>
    %105 = vector.shape_cast %104 : vector<8xf32> to vector<8x1xf32>
    %106 = tpu.reciprocal %105 {approx = true} : vector<8x1xf32> -> vector<8x1xf32>
    %107 = vector.broadcast %106 : vector<8x1xf32> to vector<8x8xf32>
    %108 = arith.mulf %103, %107 : vector<8x8xf32>
    %cst_46 = arith.constant dense<0.000000e+00> : vector<8x8xf32>
    %109 = tpu.matmul %108, %96, %cst_46 {dimension_numbers = #tpu.dot_dimension_numbers<[1], [0], [0], [1], [0, 0, 1, 1], [], []>} : vector<8x8xf32>, vector<8x8xf32>, vector<8x8xf32> -> vector<8x8xf32>
    %110 = vector.extract_strided_slice %54 {offsets = [16, 0], sizes = [8, 32], strides = [1, 1]} : vector<32x32xf32> to vector<8x32xf32>
    %cst_47 = arith.constant dense<0.000000e+00> : vector<8x32xf32>
    %111 = tpu.matmul %109, %110, %cst_47 {dimension_numbers = #tpu.dot_dimension_numbers<[1], [0], [0], [1], [0, 0, 1, 1], [], []>} : vector<8x8xf32>, vector<8x32xf32>, vector<8x32xf32> -> vector<8x32xf32>
    %112 = arith.addf %93, %111 : vector<8x32xf32>
    %113 = vector.extract_strided_slice %51 {offsets = [0, 24], sizes = [8, 8], strides = [1, 1]} : vector<8x32xf32> to vector<8x8xf32>
    %114 = vector.extract_strided_slice %52 {offsets = [0, 24], sizes = [8, 8], strides = [1, 1]} : vector<8x32xf32> to vector<8x8xf32>
    %115 = vector.extract_strided_slice %53 {offsets = [0, 24], sizes = [8, 8], strides = [1, 1]} : vector<8x32xf32> to vector<8x8xf32>
    %cst_48 = arith.constant dense<0.000000e+00> : vector<8x8xf32>
    %116 = tpu.matmul %113, %114, %cst_48 {dimension_numbers = #tpu.dot_dimension_numbers<[1], [1], [0], [0], [0, 0, 1, 0], [], []>} : vector<8x8xf32>, vector<8x8xf32>, vector<8x8xf32> -> vector<8x8xf32>
    %117 = arith.addf %116, %5 : vector<8x8xf32>
    %cst_49 = arith.constant dense<0xFF800000> : vector<8xf32>
    %118 = vector.multi_reduction <maximumf>, %117, %cst_49 [1] : vector<8x8xf32> to vector<8xf32>
    %119 = vector.shape_cast %118 : vector<8xf32> to vector<8x1xf32>
    %120 = vector.broadcast %119 : vector<8x1xf32> to vector<8x8xf32>
    %121 = arith.subf %117, %120 : vector<8x8xf32>
    %122 = math.exp %121 : vector<8x8xf32>
    %cst_50 = arith.constant dense<0.000000e+00> : vector<8xf32>
    %123 = vector.multi_reduction <add>, %122, %cst_50 [1] : vector<8x8xf32> to vector<8xf32>
    %124 = vector.shape_cast %123 : vector<8xf32> to vector<8x1xf32>
    %125 = tpu.reciprocal %124 {approx = true} : vector<8x1xf32> -> vector<8x1xf32>
    %126 = vector.broadcast %125 : vector<8x1xf32> to vector<8x8xf32>
    %127 = arith.mulf %122, %126 : vector<8x8xf32>
    %cst_51 = arith.constant dense<0.000000e+00> : vector<8x8xf32>
    %128 = tpu.matmul %127, %115, %cst_51 {dimension_numbers = #tpu.dot_dimension_numbers<[1], [0], [0], [1], [0, 0, 1, 1], [], []>} : vector<8x8xf32>, vector<8x8xf32>, vector<8x8xf32> -> vector<8x8xf32>
    %129 = vector.extract_strided_slice %54 {offsets = [24, 0], sizes = [8, 32], strides = [1, 1]} : vector<32x32xf32> to vector<8x32xf32>
    %cst_52 = arith.constant dense<0.000000e+00> : vector<8x32xf32>
    %130 = tpu.matmul %128, %129, %cst_52 {dimension_numbers = #tpu.dot_dimension_numbers<[1], [0], [0], [1], [0, 0, 1, 1], [], []>} : vector<8x8xf32>, vector<8x32xf32>, vector<8x32xf32> -> vector<8x32xf32>
    %131 = arith.addf %112, %130 : vector<8x32xf32>
    %132 = arith.addf %1, %131 : vector<8x32xf32>
    %133 = vector.broadcast %11 : vector<1x32xf32> to vector<8x32xf32>
    %134 = arith.addf %132, %133 : vector<8x32xf32>
    %cst_53 = arith.constant dense<0.000000e+00> : vector<8xf32>
    %135 = vector.multi_reduction <add>, %134, %cst_53 [1] : vector<8x32xf32> to vector<8xf32>
    %136 = vector.shape_cast %135 : vector<8xf32> to vector<8x1xf32>
    %cst_54 = arith.constant 3.200000e+01 : f32
    %137 = vector.broadcast %cst_54 : f32 to vector<8x1xf32>
    %138 = arith.divf %136, %137 : vector<8x1xf32>
    %139 = vector.broadcast %138 : vector<8x1xf32> to vector<8x32xf32>
    %140 = arith.subf %134, %139 : vector<8x32xf32>
    %141 = arith.mulf %140, %140 : vector<8x32xf32>
    %cst_55 = arith.constant dense<0.000000e+00> : vector<8xf32>
    %142 = vector.multi_reduction <add>, %141, %cst_55 [1] : vector<8x32xf32> to vector<8xf32>
    %143 = vector.shape_cast %142 : vector<8xf32> to vector<8x1xf32>
    %cst_56 = arith.constant 3.100000e+01 : f32
    %144 = vector.broadcast %cst_56 : f32 to vector<8x1xf32>
    %145 = arith.divf %143, %144 : vector<8x1xf32>
    %146 = vector.broadcast %138 : vector<8x1xf32> to vector<8x32xf32>
    %147 = arith.subf %134, %146 : vector<8x32xf32>
    %148 = vector.broadcast %13 : vector<1x32xf32> to vector<8x32xf32>
    %149 = arith.mulf %148, %147 : vector<8x32xf32>
    %150 = math.sqrt %145 : vector<8x1xf32>
    %cst_57 = arith.constant 9.99999997E-7 : f32
    %151 = vector.broadcast %cst_57 : f32 to vector<8x1xf32>
    %152 = arith.addf %150, %151 : vector<8x1xf32>
    %153 = vector.broadcast %152 : vector<8x1xf32> to vector<8x32xf32>
    %154 = arith.divf %149, %153 : vector<8x32xf32>
    %155 = vector.broadcast %15 : vector<1x32xf32> to vector<8x32xf32>
    %156 = arith.addf %154, %155 : vector<8x32xf32>
    %157 = vector.extract_strided_slice %19 {offsets = [0, 96], sizes = [32, 64], strides = [1, 1]} : vector<32x160xf32> to vector<32x64xf32>
    %cst_58 = arith.constant dense<0.000000e+00> : vector<8x64xf32>
    %158 = tpu.matmul %156, %157, %cst_58 {dimension_numbers = #tpu.dot_dimension_numbers<[1], [0], [0], [1], [0, 0, 1, 1], [], []>} : vector<8x32xf32>, vector<32x64xf32>, vector<8x64xf32> -> vector<8x64xf32>
    %159 = vector.extract_strided_slice %23 {offsets = [0, 96], sizes = [1, 64], strides = [1, 1]} : vector<1x160xf32> to vector<1x64xf32>
    %160 = vector.broadcast %159 : vector<1x64xf32> to vector<8x64xf32>
    %161 = arith.addf %158, %160 : vector<8x64xf32>
    %cst_59 = arith.constant 0.000000e+00 : f32
    %162 = vector.broadcast %cst_59 : f32 to vector<8x64xf32>
    %163 = arith.maximumf %161, %162 : vector<8x64xf32>
    %164 = vector.extract_strided_slice %21 {offsets = [32, 0], sizes = [64, 32], strides = [1, 1]} : vector<96x32xf32> to vector<64x32xf32>
    %cst_60 = arith.constant dense<0.000000e+00> : vector<8x32xf32>
    %165 = tpu.matmul %163, %164, %cst_60 {dimension_numbers = #tpu.dot_dimension_numbers<[1], [0], [0], [1], [0, 0, 1, 1], [], []>} : vector<8x64xf32>, vector<64x32xf32>, vector<8x32xf32> -> vector<8x32xf32>
    %166 = arith.addf %134, %165 : vector<8x32xf32>
    %167 = vector.broadcast %17 : vector<1x32xf32> to vector<8x32xf32>
    %168 = arith.addf %166, %167 : vector<8x32xf32>
    %c6 = arith.constant 6 : index
    %c0_61 = arith.constant 0 : index
    %c0_62 = arith.constant 0 : index
    %169 = vector.load %arg5[%c6, %c0_61, %c0_62] : memref<14x1x32xf32, #tpu.memory_space<vmem>>, vector<1x1x32xf32>
    %170 = vector.shape_cast %169 : vector<1x1x32xf32> to vector<1x32xf32>
    %c7 = arith.constant 7 : index
    %c0_63 = arith.constant 0 : index
    %c0_64 = arith.constant 0 : index
    %171 = vector.load %arg5[%c7, %c0_63, %c0_64] : memref<14x1x32xf32, #tpu.memory_space<vmem>>, vector<1x1x32xf32>
    %172 = vector.shape_cast %171 : vector<1x1x32xf32> to vector<1x32xf32>
    %c8 = arith.constant 8 : index
    %c0_65 = arith.constant 0 : index
    %c0_66 = arith.constant 0 : index
    %173 = vector.load %arg5[%c8, %c0_65, %c0_66] : memref<14x1x32xf32, #tpu.memory_space<vmem>>, vector<1x1x32xf32>
    %174 = vector.shape_cast %173 : vector<1x1x32xf32> to vector<1x32xf32>
    %c9 = arith.constant 9 : index
    %c0_67 = arith.constant 0 : index
    %c0_68 = arith.constant 0 : index
    %175 = vector.load %arg5[%c9, %c0_67, %c0_68] : memref<14x1x32xf32, #tpu.memory_space<vmem>>, vector<1x1x32xf32>
    %176 = vector.shape_cast %175 : vector<1x1x32xf32> to vector<1x32xf32>
    %c10 = arith.constant 10 : index
    %c0_69 = arith.constant 0 : index
    %c0_70 = arith.constant 0 : index
    %177 = vector.load %arg5[%c10, %c0_69, %c0_70] : memref<14x1x32xf32, #tpu.memory_space<vmem>>, vector<1x1x32xf32>
    %178 = vector.shape_cast %177 : vector<1x1x32xf32> to vector<1x32xf32>
    %c11 = arith.constant 11 : index
    %c0_71 = arith.constant 0 : index
    %c0_72 = arith.constant 0 : index
    %179 = vector.load %arg5[%c11, %c0_71, %c0_72] : memref<14x1x32xf32, #tpu.memory_space<vmem>>, vector<1x1x32xf32>
    %180 = vector.shape_cast %179 : vector<1x1x32xf32> to vector<1x32xf32>
    %c1_73 = arith.constant 1 : index
    %c0_74 = arith.constant 0 : index
    %c0_75 = arith.constant 0 : index
    %181 = vector.load %arg2[%c1_73, %c0_74, %c0_75] : memref<2x32x160xf32, #tpu.memory_space<vmem>>, vector<1x32x160xf32>
    %182 = vector.shape_cast %181 : vector<1x32x160xf32> to vector<32x160xf32>
    %c1_76 = arith.constant 1 : index
    %c0_77 = arith.constant 0 : index
    %c0_78 = arith.constant 0 : index
    %183 = vector.load %arg3[%c1_76, %c0_77, %c0_78] : memref<2x96x32xf32, #tpu.memory_space<vmem>>, vector<1x96x32xf32>
    %184 = vector.shape_cast %183 : vector<1x96x32xf32> to vector<96x32xf32>
    %c1_79 = arith.constant 1 : index
    %c0_80 = arith.constant 0 : index
    %c0_81 = arith.constant 0 : index
    %185 = vector.load %arg4[%c1_79, %c0_80, %c0_81] : memref<2x1x160xf32, #tpu.memory_space<vmem>>, vector<1x1x160xf32>
    %186 = vector.shape_cast %185 : vector<1x1x160xf32> to vector<1x160xf32>
    %cst_82 = arith.constant dense<0.000000e+00> : vector<8xf32>
    %187 = vector.multi_reduction <add>, %168, %cst_82 [1] : vector<8x32xf32> to vector<8xf32>
    %188 = vector.shape_cast %187 : vector<8xf32> to vector<8x1xf32>
    %cst_83 = arith.constant 3.200000e+01 : f32
    %189 = vector.broadcast %cst_83 : f32 to vector<8x1xf32>
    %190 = arith.divf %188, %189 : vector<8x1xf32>
    %191 = vector.broadcast %190 : vector<8x1xf32> to vector<8x32xf32>
    %192 = arith.subf %168, %191 : vector<8x32xf32>
    %193 = arith.mulf %192, %192 : vector<8x32xf32>
    %cst_84 = arith.constant dense<0.000000e+00> : vector<8xf32>
    %194 = vector.multi_reduction <add>, %193, %cst_84 [1] : vector<8x32xf32> to vector<8xf32>
    %195 = vector.shape_cast %194 : vector<8xf32> to vector<8x1xf32>
    %cst_85 = arith.constant 3.100000e+01 : f32
    %196 = vector.broadcast %cst_85 : f32 to vector<8x1xf32>
    %197 = arith.divf %195, %196 : vector<8x1xf32>
    %198 = vector.broadcast %190 : vector<8x1xf32> to vector<8x32xf32>
    %199 = arith.subf %168, %198 : vector<8x32xf32>
    %200 = vector.broadcast %170 : vector<1x32xf32> to vector<8x32xf32>
    %201 = arith.mulf %200, %199 : vector<8x32xf32>
    %202 = math.sqrt %197 : vector<8x1xf32>
    %cst_86 = arith.constant 9.99999997E-7 : f32
    %203 = vector.broadcast %cst_86 : f32 to vector<8x1xf32>
    %204 = arith.addf %202, %203 : vector<8x1xf32>
    %205 = vector.broadcast %204 : vector<8x1xf32> to vector<8x32xf32>
    %206 = arith.divf %201, %205 : vector<8x32xf32>
    %207 = vector.broadcast %172 : vector<1x32xf32> to vector<8x32xf32>
    %208 = arith.addf %206, %207 : vector<8x32xf32>
    %209 = vector.extract_strided_slice %182 {offsets = [0, 0], sizes = [32, 96], strides = [1, 1]} : vector<32x160xf32> to vector<32x96xf32>
    %cst_87 = arith.constant dense<0.000000e+00> : vector<8x96xf32>
    %210 = tpu.matmul %208, %209, %cst_87 {dimension_numbers = #tpu.dot_dimension_numbers<[1], [0], [0], [1], [0, 0, 1, 1], [], []>} : vector<8x32xf32>, vector<32x96xf32>, vector<8x96xf32> -> vector<8x96xf32>
    %211 = vector.extract_strided_slice %186 {offsets = [0, 0], sizes = [1, 96], strides = [1, 1]} : vector<1x160xf32> to vector<1x96xf32>
    %212 = vector.broadcast %211 : vector<1x96xf32> to vector<8x96xf32>
    %213 = arith.addf %210, %212 : vector<8x96xf32>
    %214 = vector.extract_strided_slice %213 {offsets = [0, 0], sizes = [8, 32], strides = [1, 1]} : vector<8x96xf32> to vector<8x32xf32>
    %215 = vector.extract_strided_slice %213 {offsets = [0, 32], sizes = [8, 32], strides = [1, 1]} : vector<8x96xf32> to vector<8x32xf32>
    %216 = vector.extract_strided_slice %213 {offsets = [0, 64], sizes = [8, 32], strides = [1, 1]} : vector<8x96xf32> to vector<8x32xf32>
    %217 = vector.extract_strided_slice %184 {offsets = [0, 0], sizes = [32, 32], strides = [1, 1]} : vector<96x32xf32> to vector<32x32xf32>
    %cst_88 = arith.constant 0.000000e+00 : f32
    %218 = vector.broadcast %cst_88 : f32 to vector<8x32xf32>
    %219 = vector.extract_strided_slice %214 {offsets = [0, 0], sizes = [8, 8], strides = [1, 1]} : vector<8x32xf32> to vector<8x8xf32>
    %220 = vector.extract_strided_slice %215 {offsets = [0, 0], sizes = [8, 8], strides = [1, 1]} : vector<8x32xf32> to vector<8x8xf32>
    %221 = vector.extract_strided_slice %216 {offsets = [0, 0], sizes = [8, 8], strides = [1, 1]} : vector<8x32xf32> to vector<8x8xf32>
    %cst_89 = arith.constant dense<0.000000e+00> : vector<8x8xf32>
    %222 = tpu.matmul %219, %220, %cst_89 {dimension_numbers = #tpu.dot_dimension_numbers<[1], [1], [0], [0], [0, 0, 1, 0], [], []>} : vector<8x8xf32>, vector<8x8xf32>, vector<8x8xf32> -> vector<8x8xf32>
    %223 = arith.addf %222, %5 : vector<8x8xf32>
    %cst_90 = arith.constant dense<0xFF800000> : vector<8xf32>
    %224 = vector.multi_reduction <maximumf>, %223, %cst_90 [1] : vector<8x8xf32> to vector<8xf32>
    %225 = vector.shape_cast %224 : vector<8xf32> to vector<8x1xf32>
    %226 = vector.broadcast %225 : vector<8x1xf32> to vector<8x8xf32>
    %227 = arith.subf %223, %226 : vector<8x8xf32>
    %228 = math.exp %227 : vector<8x8xf32>
    %cst_91 = arith.constant dense<0.000000e+00> : vector<8xf32>
    %229 = vector.multi_reduction <add>, %228, %cst_91 [1] : vector<8x8xf32> to vector<8xf32>
    %230 = vector.shape_cast %229 : vector<8xf32> to vector<8x1xf32>
    %231 = tpu.reciprocal %230 {approx = true} : vector<8x1xf32> -> vector<8x1xf32>
    %232 = vector.broadcast %231 : vector<8x1xf32> to vector<8x8xf32>
    %233 = arith.mulf %228, %232 : vector<8x8xf32>
    %cst_92 = arith.constant dense<0.000000e+00> : vector<8x8xf32>
    %234 = tpu.matmul %233, %221, %cst_92 {dimension_numbers = #tpu.dot_dimension_numbers<[1], [0], [0], [1], [0, 0, 1, 1], [], []>} : vector<8x8xf32>, vector<8x8xf32>, vector<8x8xf32> -> vector<8x8xf32>
    %235 = vector.extract_strided_slice %217 {offsets = [0, 0], sizes = [8, 32], strides = [1, 1]} : vector<32x32xf32> to vector<8x32xf32>
    %cst_93 = arith.constant dense<0.000000e+00> : vector<8x32xf32>
    %236 = tpu.matmul %234, %235, %cst_93 {dimension_numbers = #tpu.dot_dimension_numbers<[1], [0], [0], [1], [0, 0, 1, 1], [], []>} : vector<8x8xf32>, vector<8x32xf32>, vector<8x32xf32> -> vector<8x32xf32>
    %237 = arith.addf %218, %236 : vector<8x32xf32>
    %238 = vector.extract_strided_slice %214 {offsets = [0, 8], sizes = [8, 8], strides = [1, 1]} : vector<8x32xf32> to vector<8x8xf32>
    %239 = vector.extract_strided_slice %215 {offsets = [0, 8], sizes = [8, 8], strides = [1, 1]} : vector<8x32xf32> to vector<8x8xf32>
    %240 = vector.extract_strided_slice %216 {offsets = [0, 8], sizes = [8, 8], strides = [1, 1]} : vector<8x32xf32> to vector<8x8xf32>
    %cst_94 = arith.constant dense<0.000000e+00> : vector<8x8xf32>
    %241 = tpu.matmul %238, %239, %cst_94 {dimension_numbers = #tpu.dot_dimension_numbers<[1], [1], [0], [0], [0, 0, 1, 0], [], []>} : vector<8x8xf32>, vector<8x8xf32>, vector<8x8xf32> -> vector<8x8xf32>
    %242 = arith.addf %241, %5 : vector<8x8xf32>
    %cst_95 = arith.constant dense<0xFF800000> : vector<8xf32>
    %243 = vector.multi_reduction <maximumf>, %242, %cst_95 [1] : vector<8x8xf32> to vector<8xf32>
    %244 = vector.shape_cast %243 : vector<8xf32> to vector<8x1xf32>
    %245 = vector.broadcast %244 : vector<8x1xf32> to vector<8x8xf32>
    %246 = arith.subf %242, %245 : vector<8x8xf32>
    %247 = math.exp %246 : vector<8x8xf32>
    %cst_96 = arith.constant dense<0.000000e+00> : vector<8xf32>
    %248 = vector.multi_reduction <add>, %247, %cst_96 [1] : vector<8x8xf32> to vector<8xf32>
    %249 = vector.shape_cast %248 : vector<8xf32> to vector<8x1xf32>
    %250 = tpu.reciprocal %249 {approx = true} : vector<8x1xf32> -> vector<8x1xf32>
    %251 = vector.broadcast %250 : vector<8x1xf32> to vector<8x8xf32>
    %252 = arith.mulf %247, %251 : vector<8x8xf32>
    %cst_97 = arith.constant dense<0.000000e+00> : vector<8x8xf32>
    %253 = tpu.matmul %252, %240, %cst_97 {dimension_numbers = #tpu.dot_dimension_numbers<[1], [0], [0], [1], [0, 0, 1, 1], [], []>} : vector<8x8xf32>, vector<8x8xf32>, vector<8x8xf32> -> vector<8x8xf32>
    %254 = vector.extract_strided_slice %217 {offsets = [8, 0], sizes = [8, 32], strides = [1, 1]} : vector<32x32xf32> to vector<8x32xf32>
    %cst_98 = arith.constant dense<0.000000e+00> : vector<8x32xf32>
    %255 = tpu.matmul %253, %254, %cst_98 {dimension_numbers = #tpu.dot_dimension_numbers<[1], [0], [0], [1], [0, 0, 1, 1], [], []>} : vector<8x8xf32>, vector<8x32xf32>, vector<8x32xf32> -> vector<8x32xf32>
    %256 = arith.addf %237, %255 : vector<8x32xf32>
    %257 = vector.extract_strided_slice %214 {offsets = [0, 16], sizes = [8, 8], strides = [1, 1]} : vector<8x32xf32> to vector<8x8xf32>
    %258 = vector.extract_strided_slice %215 {offsets = [0, 16], sizes = [8, 8], strides = [1, 1]} : vector<8x32xf32> to vector<8x8xf32>
    %259 = vector.extract_strided_slice %216 {offsets = [0, 16], sizes = [8, 8], strides = [1, 1]} : vector<8x32xf32> to vector<8x8xf32>
    %cst_99 = arith.constant dense<0.000000e+00> : vector<8x8xf32>
    %260 = tpu.matmul %257, %258, %cst_99 {dimension_numbers = #tpu.dot_dimension_numbers<[1], [1], [0], [0], [0, 0, 1, 0], [], []>} : vector<8x8xf32>, vector<8x8xf32>, vector<8x8xf32> -> vector<8x8xf32>
    %261 = arith.addf %260, %5 : vector<8x8xf32>
    %cst_100 = arith.constant dense<0xFF800000> : vector<8xf32>
    %262 = vector.multi_reduction <maximumf>, %261, %cst_100 [1] : vector<8x8xf32> to vector<8xf32>
    %263 = vector.shape_cast %262 : vector<8xf32> to vector<8x1xf32>
    %264 = vector.broadcast %263 : vector<8x1xf32> to vector<8x8xf32>
    %265 = arith.subf %261, %264 : vector<8x8xf32>
    %266 = math.exp %265 : vector<8x8xf32>
    %cst_101 = arith.constant dense<0.000000e+00> : vector<8xf32>
    %267 = vector.multi_reduction <add>, %266, %cst_101 [1] : vector<8x8xf32> to vector<8xf32>
    %268 = vector.shape_cast %267 : vector<8xf32> to vector<8x1xf32>
    %269 = tpu.reciprocal %268 {approx = true} : vector<8x1xf32> -> vector<8x1xf32>
    %270 = vector.broadcast %269 : vector<8x1xf32> to vector<8x8xf32>
    %271 = arith.mulf %266, %270 : vector<8x8xf32>
    %cst_102 = arith.constant dense<0.000000e+00> : vector<8x8xf32>
    %272 = tpu.matmul %271, %259, %cst_102 {dimension_numbers = #tpu.dot_dimension_numbers<[1], [0], [0], [1], [0, 0, 1, 1], [], []>} : vector<8x8xf32>, vector<8x8xf32>, vector<8x8xf32> -> vector<8x8xf32>
    %273 = vector.extract_strided_slice %217 {offsets = [16, 0], sizes = [8, 32], strides = [1, 1]} : vector<32x32xf32> to vector<8x32xf32>
    %cst_103 = arith.constant dense<0.000000e+00> : vector<8x32xf32>
    %274 = tpu.matmul %272, %273, %cst_103 {dimension_numbers = #tpu.dot_dimension_numbers<[1], [0], [0], [1], [0, 0, 1, 1], [], []>} : vector<8x8xf32>, vector<8x32xf32>, vector<8x32xf32> -> vector<8x32xf32>
    %275 = arith.addf %256, %274 : vector<8x32xf32>
    %276 = vector.extract_strided_slice %214 {offsets = [0, 24], sizes = [8, 8], strides = [1, 1]} : vector<8x32xf32> to vector<8x8xf32>
    %277 = vector.extract_strided_slice %215 {offsets = [0, 24], sizes = [8, 8], strides = [1, 1]} : vector<8x32xf32> to vector<8x8xf32>
    %278 = vector.extract_strided_slice %216 {offsets = [0, 24], sizes = [8, 8], strides = [1, 1]} : vector<8x32xf32> to vector<8x8xf32>
    %cst_104 = arith.constant dense<0.000000e+00> : vector<8x8xf32>
    %279 = tpu.matmul %276, %277, %cst_104 {dimension_numbers = #tpu.dot_dimension_numbers<[1], [1], [0], [0], [0, 0, 1, 0], [], []>} : vector<8x8xf32>, vector<8x8xf32>, vector<8x8xf32> -> vector<8x8xf32>
    %280 = arith.addf %279, %5 : vector<8x8xf32>
    %cst_105 = arith.constant dense<0xFF800000> : vector<8xf32>
    %281 = vector.multi_reduction <maximumf>, %280, %cst_105 [1] : vector<8x8xf32> to vector<8xf32>
    %282 = vector.shape_cast %281 : vector<8xf32> to vector<8x1xf32>
    %283 = vector.broadcast %282 : vector<8x1xf32> to vector<8x8xf32>
    %284 = arith.subf %280, %283 : vector<8x8xf32>
    %285 = math.exp %284 : vector<8x8xf32>
    %cst_106 = arith.constant dense<0.000000e+00> : vector<8xf32>
    %286 = vector.multi_reduction <add>, %285, %cst_106 [1] : vector<8x8xf32> to vector<8xf32>
    %287 = vector.shape_cast %286 : vector<8xf32> to vector<8x1xf32>
    %288 = tpu.reciprocal %287 {approx = true} : vector<8x1xf32> -> vector<8x1xf32>
    %289 = vector.broadcast %288 : vector<8x1xf32> to vector<8x8xf32>
    %290 = arith.mulf %285, %289 : vector<8x8xf32>
    %cst_107 = arith.constant dense<0.000000e+00> : vector<8x8xf32>
    %291 = tpu.matmul %290, %278, %cst_107 {dimension_numbers = #tpu.dot_dimension_numbers<[1], [0], [0], [1], [0, 0, 1, 1], [], []>} : vector<8x8xf32>, vector<8x8xf32>, vector<8x8xf32> -> vector<8x8xf32>
    %292 = vector.extract_strided_slice %217 {offsets = [24, 0], sizes = [8, 32], strides = [1, 1]} : vector<32x32xf32> to vector<8x32xf32>
    %cst_108 = arith.constant dense<0.000000e+00> : vector<8x32xf32>
    %293 = tpu.matmul %291, %292, %cst_108 {dimension_numbers = #tpu.dot_dimension_numbers<[1], [0], [0], [1], [0, 0, 1, 1], [], []>} : vector<8x8xf32>, vector<8x32xf32>, vector<8x32xf32> -> vector<8x32xf32>
    %294 = arith.addf %275, %293 : vector<8x32xf32>
    %295 = arith.addf %168, %294 : vector<8x32xf32>
    %296 = vector.broadcast %174 : vector<1x32xf32> to vector<8x32xf32>
    %297 = arith.addf %295, %296 : vector<8x32xf32>
    %cst_109 = arith.constant dense<0.000000e+00> : vector<8xf32>
    %298 = vector.multi_reduction <add>, %297, %cst_109 [1] : vector<8x32xf32> to vector<8xf32>
    %299 = vector.shape_cast %298 : vector<8xf32> to vector<8x1xf32>
    %cst_110 = arith.constant 3.200000e+01 : f32
    %300 = vector.broadcast %cst_110 : f32 to vector<8x1xf32>
    %301 = arith.divf %299, %300 : vector<8x1xf32>
    %302 = vector.broadcast %301 : vector<8x1xf32> to vector<8x32xf32>
    %303 = arith.subf %297, %302 : vector<8x32xf32>
    %304 = arith.mulf %303, %303 : vector<8x32xf32>
    %cst_111 = arith.constant dense<0.000000e+00> : vector<8xf32>
    %305 = vector.multi_reduction <add>, %304, %cst_111 [1] : vector<8x32xf32> to vector<8xf32>
    %306 = vector.shape_cast %305 : vector<8xf32> to vector<8x1xf32>
    %cst_112 = arith.constant 3.100000e+01 : f32
    %307 = vector.broadcast %cst_112 : f32 to vector<8x1xf32>
    %308 = arith.divf %306, %307 : vector<8x1xf32>
    %309 = vector.broadcast %301 : vector<8x1xf32> to vector<8x32xf32>
    %310 = arith.subf %297, %309 : vector<8x32xf32>
    %311 = vector.broadcast %176 : vector<1x32xf32> to vector<8x32xf32>
    %312 = arith.mulf %311, %310 : vector<8x32xf32>
    %313 = math.sqrt %308 : vector<8x1xf32>
    %cst_113 = arith.constant 9.99999997E-7 : f32
    %314 = vector.broadcast %cst_113 : f32 to vector<8x1xf32>
    %315 = arith.addf %313, %314 : vector<8x1xf32>
    %316 = vector.broadcast %315 : vector<8x1xf32> to vector<8x32xf32>
    %317 = arith.divf %312, %316 : vector<8x32xf32>
    %318 = vector.broadcast %178 : vector<1x32xf32> to vector<8x32xf32>
    %319 = arith.addf %317, %318 : vector<8x32xf32>
    %320 = vector.extract_strided_slice %182 {offsets = [0, 96], sizes = [32, 64], strides = [1, 1]} : vector<32x160xf32> to vector<32x64xf32>
    %cst_114 = arith.constant dense<0.000000e+00> : vector<8x64xf32>
    %321 = tpu.matmul %319, %320, %cst_114 {dimension_numbers = #tpu.dot_dimension_numbers<[1], [0], [0], [1], [0, 0, 1, 1], [], []>} : vector<8x32xf32>, vector<32x64xf32>, vector<8x64xf32> -> vector<8x64xf32>
    %322 = vector.extract_strided_slice %186 {offsets = [0, 96], sizes = [1, 64], strides = [1, 1]} : vector<1x160xf32> to vector<1x64xf32>
    %323 = vector.broadcast %322 : vector<1x64xf32> to vector<8x64xf32>
    %324 = arith.addf %321, %323 : vector<8x64xf32>
    %cst_115 = arith.constant 0.000000e+00 : f32
    %325 = vector.broadcast %cst_115 : f32 to vector<8x64xf32>
    %326 = arith.maximumf %324, %325 : vector<8x64xf32>
    %327 = vector.extract_strided_slice %184 {offsets = [32, 0], sizes = [64, 32], strides = [1, 1]} : vector<96x32xf32> to vector<64x32xf32>
    %cst_116 = arith.constant dense<0.000000e+00> : vector<8x32xf32>
    %328 = tpu.matmul %326, %327, %cst_116 {dimension_numbers = #tpu.dot_dimension_numbers<[1], [0], [0], [1], [0, 0, 1, 1], [], []>} : vector<8x64xf32>, vector<64x32xf32>, vector<8x32xf32> -> vector<8x32xf32>
    %329 = arith.addf %297, %328 : vector<8x32xf32>
    %330 = vector.broadcast %180 : vector<1x32xf32> to vector<8x32xf32>
    %331 = arith.addf %329, %330 : vector<8x32xf32>
    %c12 = arith.constant 12 : index
    %c0_117 = arith.constant 0 : index
    %c0_118 = arith.constant 0 : index
    %332 = vector.load %arg5[%c12, %c0_117, %c0_118] : memref<14x1x32xf32, #tpu.memory_space<vmem>>, vector<1x1x32xf32>
    %333 = vector.shape_cast %332 : vector<1x1x32xf32> to vector<1x32xf32>
    %c13 = arith.constant 13 : index
    %c0_119 = arith.constant 0 : index
    %c0_120 = arith.constant 0 : index
    %334 = vector.load %arg5[%c13, %c0_119, %c0_120] : memref<14x1x32xf32, #tpu.memory_space<vmem>>, vector<1x1x32xf32>
    %335 = vector.shape_cast %334 : vector<1x1x32xf32> to vector<1x32xf32>
    %cst_121 = arith.constant dense<0.000000e+00> : vector<8xf32>
    %336 = vector.multi_reduction <add>, %331, %cst_121 [1] : vector<8x32xf32> to vector<8xf32>
    %337 = vector.shape_cast %336 : vector<8xf32> to vector<8x1xf32>
    %cst_122 = arith.constant 3.200000e+01 : f32
    %338 = vector.broadcast %cst_122 : f32 to vector<8x1xf32>
    %339 = arith.divf %337, %338 : vector<8x1xf32>
    %340 = vector.broadcast %339 : vector<8x1xf32> to vector<8x32xf32>
    %341 = arith.subf %331, %340 : vector<8x32xf32>
    %342 = arith.mulf %341, %341 : vector<8x32xf32>
    %cst_123 = arith.constant dense<0.000000e+00> : vector<8xf32>
    %343 = vector.multi_reduction <add>, %342, %cst_123 [1] : vector<8x32xf32> to vector<8xf32>
    %344 = vector.shape_cast %343 : vector<8xf32> to vector<8x1xf32>
    %cst_124 = arith.constant 3.100000e+01 : f32
    %345 = vector.broadcast %cst_124 : f32 to vector<8x1xf32>
    %346 = arith.divf %344, %345 : vector<8x1xf32>
    %347 = vector.broadcast %339 : vector<8x1xf32> to vector<8x32xf32>
    %348 = arith.subf %331, %347 : vector<8x32xf32>
    %349 = vector.broadcast %333 : vector<1x32xf32> to vector<8x32xf32>
    %350 = arith.mulf %349, %348 : vector<8x32xf32>
    %351 = math.sqrt %346 : vector<8x1xf32>
    %cst_125 = arith.constant 9.99999997E-7 : f32
    %352 = vector.broadcast %cst_125 : f32 to vector<8x1xf32>
    %353 = arith.addf %351, %352 : vector<8x1xf32>
    %354 = vector.broadcast %353 : vector<8x1xf32> to vector<8x32xf32>
    %355 = arith.divf %350, %354 : vector<8x32xf32>
    %356 = vector.broadcast %335 : vector<1x32xf32> to vector<8x32xf32>
    %357 = arith.addf %355, %356 : vector<8x32xf32>
    %c0_126 = arith.constant 0 : index
    %c0_127 = arith.constant 0 : index
    %c0_128 = arith.constant 0 : index
    %358 = vector.load %arg6[%c0_126, %c0_127, %c0_128] : memref<2x8x32xf32, #tpu.memory_space<vmem>>, vector<1x8x32xf32>
    %359 = vector.shape_cast %358 : vector<1x8x32xf32> to vector<8x32xf32>
    %360 = vector.shape_cast %357 : vector<8x32xf32> to vector<1x8x32xf32>
    tpu.vector_store %arg6[%c0_126, %c0_127, %c0_128], %360 {strides = array<i32>} : memref<2x8x32xf32, #tpu.memory_space<vmem>>, vector<1x8x32xf32>,
    %c1_129 = arith.constant 1 : index
    %c0_130 = arith.constant 0 : index
    %c0_131 = arith.constant 0 : index
    %361 = vector.load %arg0[%c1_129, %c0_130, %c0_131] : memref<2x8x32xf32, #tpu.memory_space<vmem>>, vector<1x8x32xf32>
    %362 = vector.shape_cast %361 : vector<1x8x32xf32> to vector<8x32xf32>
    %c1_132 = arith.constant 1 : index
    %c0_133 = arith.constant 0 : index
    %c0_134 = arith.constant 0 : index
    %363 = vector.load %arg1[%c1_132, %c0_133, %c0_134] : memref<2x1x8xf32, #tpu.memory_space<vmem>>, vector<1x1x8xf32>
    %364 = vector.shape_cast %363 : vector<1x1x8xf32> to vector<1x8xf32>
    %365 = vector.shape_cast %364 : vector<1x8xf32> to vector<1x8xf32>
    %366 = vector.broadcast %365 : vector<1x8xf32> to vector<8x8xf32>
    %c0_135 = arith.constant 0 : index
    %c0_136 = arith.constant 0 : index
    %c0_137 = arith.constant 0 : index
    %367 = vector.load %arg5[%c0_135, %c0_136, %c0_137] : memref<14x1x32xf32, #tpu.memory_space<vmem>>, vector<1x1x32xf32>
    %368 = vector.shape_cast %367 : vector<1x1x32xf32> to vector<1x32xf32>
    %c1_138 = arith.constant 1 : index
    %c0_139 = arith.constant 0 : index
    %c0_140 = arith.constant 0 : index
    %369 = vector.load %arg5[%c1_138, %c0_139, %c0_140] : memref<14x1x32xf32, #tpu.memory_space<vmem>>, vector<1x1x32xf32>
    %370 = vector.shape_cast %369 : vector<1x1x32xf32> to vector<1x32xf32>
    %c2_141 = arith.constant 2 : index
    %c0_142 = arith.constant 0 : index
    %c0_143 = arith.constant 0 : index
    %371 = vector.load %arg5[%c2_141, %c0_142, %c0_143] : memref<14x1x32xf32, #tpu.memory_space<vmem>>, vector<1x1x32xf32>
    %372 = vector.shape_cast %371 : vector<1x1x32xf32> to vector<1x32xf32>
    %c3_144 = arith.constant 3 : index
    %c0_145 = arith.constant 0 : index
    %c0_146 = arith.constant 0 : index
    %373 = vector.load %arg5[%c3_144, %c0_145, %c0_146] : memref<14x1x32xf32, #tpu.memory_space<vmem>>, vector<1x1x32xf32>
    %374 = vector.shape_cast %373 : vector<1x1x32xf32> to vector<1x32xf32>
    %c4_147 = arith.constant 4 : index
    %c0_148 = arith.constant 0 : index
    %c0_149 = arith.constant 0 : index
    %375 = vector.load %arg5[%c4_147, %c0_148, %c0_149] : memref<14x1x32xf32, #tpu.memory_space<vmem>>, vector<1x1x32xf32>
    %376 = vector.shape_cast %375 : vector<1x1x32xf32> to vector<1x32xf32>
    %c5_150 = arith.constant 5 : index
    %c0_151 = arith.constant 0 : index
    %c0_152 = arith.constant 0 : index
    %377 = vector.load %arg5[%c5_150, %c0_151, %c0_152] : memref<14x1x32xf32, #tpu.memory_space<vmem>>, vector<1x1x32xf32>
    %378 = vector.shape_cast %377 : vector<1x1x32xf32> to vector<1x32xf32>
    %c0_153 = arith.constant 0 : index
    %c0_154 = arith.constant 0 : index
    %c0_155 = arith.constant 0 : index
    %379 = vector.load %arg2[%c0_153, %c0_154, %c0_155] : memref<2x32x160xf32, #tpu.memory_space<vmem>>, vector<1x32x160xf32>
    %380 = vector.shape_cast %379 : vector<1x32x160xf32> to vector<32x160xf32>
    %c0_156 = arith.constant 0 : index
    %c0_157 = arith.constant 0 : index
    %c0_158 = arith.constant 0 : index
    %381 = vector.load %arg3[%c0_156, %c0_157, %c0_158] : memref<2x96x32xf32, #tpu.memory_space<vmem>>, vector<1x96x32xf32>
    %382 = vector.shape_cast %381 : vector<1x96x32xf32> to vector<96x32xf32>
    %c0_159 = arith.constant 0 : index
    %c0_160 = arith.constant 0 : index
    %c0_161 = arith.constant 0 : index
    %383 = vector.load %arg4[%c0_159, %c0_160, %c0_161] : memref<2x1x160xf32, #tpu.memory_space<vmem>>, vector<1x1x160xf32>
    %384 = vector.shape_cast %383 : vector<1x1x160xf32> to vector<1x160xf32>
    %cst_162 = arith.constant dense<0.000000e+00> : vector<8xf32>
    %385 = vector.multi_reduction <add>, %362, %cst_162 [1] : vector<8x32xf32> to vector<8xf32>
    %386 = vector.shape_cast %385 : vector<8xf32> to vector<8x1xf32>
    %cst_163 = arith.constant 3.200000e+01 : f32
    %387 = vector.broadcast %cst_163 : f32 to vector<8x1xf32>
    %388 = arith.divf %386, %387 : vector<8x1xf32>
    %389 = vector.broadcast %388 : vector<8x1xf32> to vector<8x32xf32>
    %390 = arith.subf %362, %389 : vector<8x32xf32>
    %391 = arith.mulf %390, %390 : vector<8x32xf32>
    %cst_164 = arith.constant dense<0.000000e+00> : vector<8xf32>
    %392 = vector.multi_reduction <add>, %391, %cst_164 [1] : vector<8x32xf32> to vector<8xf32>
    %393 = vector.shape_cast %392 : vector<8xf32> to vector<8x1xf32>
    %cst_165 = arith.constant 3.100000e+01 : f32
    %394 = vector.broadcast %cst_165 : f32 to vector<8x1xf32>
    %395 = arith.divf %393, %394 : vector<8x1xf32>
    %396 = vector.broadcast %388 : vector<8x1xf32> to vector<8x32xf32>
    %397 = arith.subf %362, %396 : vector<8x32xf32>
    %398 = vector.broadcast %368 : vector<1x32xf32> to vector<8x32xf32>
    %399 = arith.mulf %398, %397 : vector<8x32xf32>
    %400 = math.sqrt %395 : vector<8x1xf32>
    %cst_166 = arith.constant 9.99999997E-7 : f32
    %401 = vector.broadcast %cst_166 : f32 to vector<8x1xf32>
    %402 = arith.addf %400, %401 : vector<8x1xf32>
    %403 = vector.broadcast %402 : vector<8x1xf32> to vector<8x32xf32>
    %404 = arith.divf %399, %403 : vector<8x32xf32>
    %405 = vector.broadcast %370 : vector<1x32xf32> to vector<8x32xf32>
    %406 = arith.addf %404, %405 : vector<8x32xf32>
    %407 = vector.extract_strided_slice %380 {offsets = [0, 0], sizes = [32, 96], strides = [1, 1]} : vector<32x160xf32> to vector<32x96xf32>
    %cst_167 = arith.constant dense<0.000000e+00> : vector<8x96xf32>
    %408 = tpu.matmul %406, %407, %cst_167 {dimension_numbers = #tpu.dot_dimension_numbers<[1], [0], [0], [1], [0, 0, 1, 1], [], []>} : vector<8x32xf32>, vector<32x96xf32>, vector<8x96xf32> -> vector<8x96xf32>
    %409 = vector.extract_strided_slice %384 {offsets = [0, 0], sizes = [1, 96], strides = [1, 1]} : vector<1x160xf32> to vector<1x96xf32>
    %410 = vector.broadcast %409 : vector<1x96xf32> to vector<8x96xf32>
    %411 = arith.addf %408, %410 : vector<8x96xf32>
    %412 = vector.extract_strided_slice %411 {offsets = [0, 0], sizes = [8, 32], strides = [1, 1]} : vector<8x96xf32> to vector<8x32xf32>
    %413 = vector.extract_strided_slice %411 {offsets = [0, 32], sizes = [8, 32], strides = [1, 1]} : vector<8x96xf32> to vector<8x32xf32>
    %414 = vector.extract_strided_slice %411 {offsets = [0, 64], sizes = [8, 32], strides = [1, 1]} : vector<8x96xf32> to vector<8x32xf32>
    %415 = vector.extract_strided_slice %382 {offsets = [0, 0], sizes = [32, 32], strides = [1, 1]} : vector<96x32xf32> to vector<32x32xf32>
    %cst_168 = arith.constant 0.000000e+00 : f32
    %416 = vector.broadcast %cst_168 : f32 to vector<8x32xf32>
    %417 = vector.extract_strided_slice %412 {offsets = [0, 0], sizes = [8, 8], strides = [1, 1]} : vector<8x32xf32> to vector<8x8xf32>
    %418 = vector.extract_strided_slice %413 {offsets = [0, 0], sizes = [8, 8], strides = [1, 1]} : vector<8x32xf32> to vector<8x8xf32>
    %419 = vector.extract_strided_slice %414 {offsets = [0, 0], sizes = [8, 8], strides = [1, 1]} : vector<8x32xf32> to vector<8x8xf32>
    %cst_169 = arith.constant dense<0.000000e+00> : vector<8x8xf32>
    %420 = tpu.matmul %417, %418, %cst_169 {dimension_numbers = #tpu.dot_dimension_numbers<[1], [1], [0], [0], [0, 0, 1, 0], [], []>} : vector<8x8xf32>, vector<8x8xf32>, vector<8x8xf32> -> vector<8x8xf32>
    %421 = arith.addf %420, %366 : vector<8x8xf32>
    %cst_170 = arith.constant dense<0xFF800000> : vector<8xf32>
    %422 = vector.multi_reduction <maximumf>, %421, %cst_170 [1] : vector<8x8xf32> to vector<8xf32>
    %423 = vector.shape_cast %422 : vector<8xf32> to vector<8x1xf32>
    %424 = vector.broadcast %423 : vector<8x1xf32> to vector<8x8xf32>
    %425 = arith.subf %421, %424 : vector<8x8xf32>
    %426 = math.exp %425 : vector<8x8xf32>
    %cst_171 = arith.constant dense<0.000000e+00> : vector<8xf32>
    %427 = vector.multi_reduction <add>, %426, %cst_171 [1] : vector<8x8xf32> to vector<8xf32>
    %428 = vector.shape_cast %427 : vector<8xf32> to vector<8x1xf32>
    %429 = tpu.reciprocal %428 {approx = true} : vector<8x1xf32> -> vector<8x1xf32>
    %430 = vector.broadcast %429 : vector<8x1xf32> to vector<8x8xf32>
    %431 = arith.mulf %426, %430 : vector<8x8xf32>
    %cst_172 = arith.constant dense<0.000000e+00> : vector<8x8xf32>
    %432 = tpu.matmul %431, %419, %cst_172 {dimension_numbers = #tpu.dot_dimension_numbers<[1], [0], [0], [1], [0, 0, 1, 1], [], []>} : vector<8x8xf32>, vector<8x8xf32>, vector<8x8xf32> -> vector<8x8xf32>
    %433 = vector.extract_strided_slice %415 {offsets = [0, 0], sizes = [8, 32], strides = [1, 1]} : vector<32x32xf32> to vector<8x32xf32>
    %cst_173 = arith.constant dense<0.000000e+00> : vector<8x32xf32>
    %434 = tpu.matmul %432, %433, %cst_173 {dimension_numbers = #tpu.dot_dimension_numbers<[1], [0], [0], [1], [0, 0, 1, 1], [], []>} : vector<8x8xf32>, vector<8x32xf32>, vector<8x32xf32> -> vector<8x32xf32>
    %435 = arith.addf %416, %434 : vector<8x32xf32>
    %436 = vector.extract_strided_slice %412 {offsets = [0, 8], sizes = [8, 8], strides = [1, 1]} : vector<8x32xf32> to vector<8x8xf32>
    %437 = vector.extract_strided_slice %413 {offsets = [0, 8], sizes = [8, 8], strides = [1, 1]} : vector<8x32xf32> to vector<8x8xf32>
    %438 = vector.extract_strided_slice %414 {offsets = [0, 8], sizes = [8, 8], strides = [1, 1]} : vector<8x32xf32> to vector<8x8xf32>
    %cst_174 = arith.constant dense<0.000000e+00> : vector<8x8xf32>
    %439 = tpu.matmul %436, %437, %cst_174 {dimension_numbers = #tpu.dot_dimension_numbers<[1], [1], [0], [0], [0, 0, 1, 0], [], []>} : vector<8x8xf32>, vector<8x8xf32>, vector<8x8xf32> -> vector<8x8xf32>
    %440 = arith.addf %439, %366 : vector<8x8xf32>
    %cst_175 = arith.constant dense<0xFF800000> : vector<8xf32>
    %441 = vector.multi_reduction <maximumf>, %440, %cst_175 [1] : vector<8x8xf32> to vector<8xf32>
    %442 = vector.shape_cast %441 : vector<8xf32> to vector<8x1xf32>
    %443 = vector.broadcast %442 : vector<8x1xf32> to vector<8x8xf32>
    %444 = arith.subf %440, %443 : vector<8x8xf32>
    %445 = math.exp %444 : vector<8x8xf32>
    %cst_176 = arith.constant dense<0.000000e+00> : vector<8xf32>
    %446 = vector.multi_reduction <add>, %445, %cst_176 [1] : vector<8x8xf32> to vector<8xf32>
    %447 = vector.shape_cast %446 : vector<8xf32> to vector<8x1xf32>
    %448 = tpu.reciprocal %447 {approx = true} : vector<8x1xf32> -> vector<8x1xf32>
    %449 = vector.broadcast %448 : vector<8x1xf32> to vector<8x8xf32>
    %450 = arith.mulf %445, %449 : vector<8x8xf32>
    %cst_177 = arith.constant dense<0.000000e+00> : vector<8x8xf32>
    %451 = tpu.matmul %450, %438, %cst_177 {dimension_numbers = #tpu.dot_dimension_numbers<[1], [0], [0], [1], [0, 0, 1, 1], [], []>} : vector<8x8xf32>, vector<8x8xf32>, vector<8x8xf32> -> vector<8x8xf32>
    %452 = vector.extract_strided_slice %415 {offsets = [8, 0], sizes = [8, 32], strides = [1, 1]} : vector<32x32xf32> to vector<8x32xf32>
    %cst_178 = arith.constant dense<0.000000e+00> : vector<8x32xf32>
    %453 = tpu.matmul %451, %452, %cst_178 {dimension_numbers = #tpu.dot_dimension_numbers<[1], [0], [0], [1], [0, 0, 1, 1], [], []>} : vector<8x8xf32>, vector<8x32xf32>, vector<8x32xf32> -> vector<8x32xf32>
    %454 = arith.addf %435, %453 : vector<8x32xf32>
    %455 = vector.extract_strided_slice %412 {offsets = [0, 16], sizes = [8, 8], strides = [1, 1]} : vector<8x32xf32> to vector<8x8xf32>
    %456 = vector.extract_strided_slice %413 {offsets = [0, 16], sizes = [8, 8], strides = [1, 1]} : vector<8x32xf32> to vector<8x8xf32>
    %457 = vector.extract_strided_slice %414 {offsets = [0, 16], sizes = [8, 8], strides = [1, 1]} : vector<8x32xf32> to vector<8x8xf32>
    %cst_179 = arith.constant dense<0.000000e+00> : vector<8x8xf32>
    %458 = tpu.matmul %455, %456, %cst_179 {dimension_numbers = #tpu.dot_dimension_numbers<[1], [1], [0], [0], [0, 0, 1, 0], [], []>} : vector<8x8xf32>, vector<8x8xf32>, vector<8x8xf32> -> vector<8x8xf32>
    %459 = arith.addf %458, %366 : vector<8x8xf32>
    %cst_180 = arith.constant dense<0xFF800000> : vector<8xf32>
    %460 = vector.multi_reduction <maximumf>, %459, %cst_180 [1] : vector<8x8xf32> to vector<8xf32>
    %461 = vector.shape_cast %460 : vector<8xf32> to vector<8x1xf32>
    %462 = vector.broadcast %461 : vector<8x1xf32> to vector<8x8xf32>
    %463 = arith.subf %459, %462 : vector<8x8xf32>
    %464 = math.exp %463 : vector<8x8xf32>
    %cst_181 = arith.constant dense<0.000000e+00> : vector<8xf32>
    %465 = vector.multi_reduction <add>, %464, %cst_181 [1] : vector<8x8xf32> to vector<8xf32>
    %466 = vector.shape_cast %465 : vector<8xf32> to vector<8x1xf32>
    %467 = tpu.reciprocal %466 {approx = true} : vector<8x1xf32> -> vector<8x1xf32>
    %468 = vector.broadcast %467 : vector<8x1xf32> to vector<8x8xf32>
    %469 = arith.mulf %464, %468 : vector<8x8xf32>
    %cst_182 = arith.constant dense<0.000000e+00> : vector<8x8xf32>
    %470 = tpu.matmul %469, %457, %cst_182 {dimension_numbers = #tpu.dot_dimension_numbers<[1], [0], [0], [1], [0, 0, 1, 1], [], []>} : vector<8x8xf32>, vector<8x8xf32>, vector<8x8xf32> -> vector<8x8xf32>
    %471 = vector.extract_strided_slice %415 {offsets = [16, 0], sizes = [8, 32], strides = [1, 1]} : vector<32x32xf32> to vector<8x32xf32>
    %cst_183 = arith.constant dense<0.000000e+00> : vector<8x32xf32>
    %472 = tpu.matmul %470, %471, %cst_183 {dimension_numbers = #tpu.dot_dimension_numbers<[1], [0], [0], [1], [0, 0, 1, 1], [], []>} : vector<8x8xf32>, vector<8x32xf32>, vector<8x32xf32> -> vector<8x32xf32>
    %473 = arith.addf %454, %472 : vector<8x32xf32>
    %474 = vector.extract_strided_slice %412 {offsets = [0, 24], sizes = [8, 8], strides = [1, 1]} : vector<8x32xf32> to vector<8x8xf32>
    %475 = vector.extract_strided_slice %413 {offsets = [0, 24], sizes = [8, 8], strides = [1, 1]} : vector<8x32xf32> to vector<8x8xf32>
    %476 = vector.extract_strided_slice %414 {offsets = [0, 24], sizes = [8, 8], strides = [1, 1]} : vector<8x32xf32> to vector<8x8xf32>
    %cst_184 = arith.constant dense<0.000000e+00> : vector<8x8xf32>
    %477 = tpu.matmul %474, %475, %cst_184 {dimension_numbers = #tpu.dot_dimension_numbers<[1], [1], [0], [0], [0, 0, 1, 0], [], []>} : vector<8x8xf32>, vector<8x8xf32>, vector<8x8xf32> -> vector<8x8xf32>
    %478 = arith.addf %477, %366 : vector<8x8xf32>
    %cst_185 = arith.constant dense<0xFF800000> : vector<8xf32>
    %479 = vector.multi_reduction <maximumf>, %478, %cst_185 [1] : vector<8x8xf32> to vector<8xf32>
    %480 = vector.shape_cast %479 : vector<8xf32> to vector<8x1xf32>
    %481 = vector.broadcast %480 : vector<8x1xf32> to vector<8x8xf32>
    %482 = arith.subf %478, %481 : vector<8x8xf32>
    %483 = math.exp %482 : vector<8x8xf32>
    %cst_186 = arith.constant dense<0.000000e+00> : vector<8xf32>
    %484 = vector.multi_reduction <add>, %483, %cst_186 [1] : vector<8x8xf32> to vector<8xf32>
    %485 = vector.shape_cast %484 : vector<8xf32> to vector<8x1xf32>
    %486 = tpu.reciprocal %485 {approx = true} : vector<8x1xf32> -> vector<8x1xf32>
    %487 = vector.broadcast %486 : vector<8x1xf32> to vector<8x8xf32>
    %488 = arith.mulf %483, %487 : vector<8x8xf32>
    %cst_187 = arith.constant dense<0.000000e+00> : vector<8x8xf32>
    %489 = tpu.matmul %488, %476, %cst_187 {dimension_numbers = #tpu.dot_dimension_numbers<[1], [0], [0], [1], [0, 0, 1, 1], [], []>} : vector<8x8xf32>, vector<8x8xf32>, vector<8x8xf32> -> vector<8x8xf32>
    %490 = vector.extract_strided_slice %415 {offsets = [24, 0], sizes = [8, 32], strides = [1, 1]} : vector<32x32xf32> to vector<8x32xf32>
    %cst_188 = arith.constant dense<0.000000e+00> : vector<8x32xf32>
    %491 = tpu.matmul %489, %490, %cst_188 {dimension_numbers = #tpu.dot_dimension_numbers<[1], [0], [0], [1], [0, 0, 1, 1], [], []>} : vector<8x8xf32>, vector<8x32xf32>, vector<8x32xf32> -> vector<8x32xf32>
    %492 = arith.addf %473, %491 : vector<8x32xf32>
    %493 = arith.addf %362, %492 : vector<8x32xf32>
    %494 = vector.broadcast %372 : vector<1x32xf32> to vector<8x32xf32>
    %495 = arith.addf %493, %494 : vector<8x32xf32>
    %cst_189 = arith.constant dense<0.000000e+00> : vector<8xf32>
    %496 = vector.multi_reduction <add>, %495, %cst_189 [1] : vector<8x32xf32> to vector<8xf32>
    %497 = vector.shape_cast %496 : vector<8xf32> to vector<8x1xf32>
    %cst_190 = arith.constant 3.200000e+01 : f32
    %498 = vector.broadcast %cst_190 : f32 to vector<8x1xf32>
    %499 = arith.divf %497, %498 : vector<8x1xf32>
    %500 = vector.broadcast %499 : vector<8x1xf32> to vector<8x32xf32>
    %501 = arith.subf %495, %500 : vector<8x32xf32>
    %502 = arith.mulf %501, %501 : vector<8x32xf32>
    %cst_191 = arith.constant dense<0.000000e+00> : vector<8xf32>
    %503 = vector.multi_reduction <add>, %502, %cst_191 [1] : vector<8x32xf32> to vector<8xf32>
    %504 = vector.shape_cast %503 : vector<8xf32> to vector<8x1xf32>
    %cst_192 = arith.constant 3.100000e+01 : f32
    %505 = vector.broadcast %cst_192 : f32 to vector<8x1xf32>
    %506 = arith.divf %504, %505 : vector<8x1xf32>
    %507 = vector.broadcast %499 : vector<8x1xf32> to vector<8x32xf32>
    %508 = arith.subf %495, %507 : vector<8x32xf32>
    %509 = vector.broadcast %374 : vector<1x32xf32> to vector<8x32xf32>
    %510 = arith.mulf %509, %508 : vector<8x32xf32>
    %511 = math.sqrt %506 : vector<8x1xf32>
    %cst_193 = arith.constant 9.99999997E-7 : f32
    %512 = vector.broadcast %cst_193 : f32 to vector<8x1xf32>
    %513 = arith.addf %511, %512 : vector<8x1xf32>
    %514 = vector.broadcast %513 : vector<8x1xf32> to vector<8x32xf32>
    %515 = arith.divf %510, %514 : vector<8x32xf32>
    %516 = vector.broadcast %376 : vector<1x32xf32> to vector<8x32xf32>
    %517 = arith.addf %515, %516 : vector<8x32xf32>
    %518 = vector.extract_strided_slice %380 {offsets = [0, 96], sizes = [32, 64], strides = [1, 1]} : vector<32x160xf32> to vector<32x64xf32>
    %cst_194 = arith.constant dense<0.000000e+00> : vector<8x64xf32>
    %519 = tpu.matmul %517, %518, %cst_194 {dimension_numbers = #tpu.dot_dimension_numbers<[1], [0], [0], [1], [0, 0, 1, 1], [], []>} : vector<8x32xf32>, vector<32x64xf32>, vector<8x64xf32> -> vector<8x64xf32>
    %520 = vector.extract_strided_slice %384 {offsets = [0, 96], sizes = [1, 64], strides = [1, 1]} : vector<1x160xf32> to vector<1x64xf32>
    %521 = vector.broadcast %520 : vector<1x64xf32> to vector<8x64xf32>
    %522 = arith.addf %519, %521 : vector<8x64xf32>
    %cst_195 = arith.constant 0.000000e+00 : f32
    %523 = vector.broadcast %cst_195 : f32 to vector<8x64xf32>
    %524 = arith.maximumf %522, %523 : vector<8x64xf32>
    %525 = vector.extract_strided_slice %382 {offsets = [32, 0], sizes = [64, 32], strides = [1, 1]} : vector<96x32xf32> to vector<64x32xf32>
    %cst_196 = arith.constant dense<0.000000e+00> : vector<8x32xf32>
    %526 = tpu.matmul %524, %525, %cst_196 {dimension_numbers = #tpu.dot_dimension_numbers<[1], [0], [0], [1], [0, 0, 1, 1], [], []>} : vector<8x64xf32>, vector<64x32xf32>, vector<8x32xf32> -> vector<8x32xf32>
    %527 = arith.addf %495, %526 : vector<8x32xf32>
    %528 = vector.broadcast %378 : vector<1x32xf32> to vector<8x32xf32>
    %529 = arith.addf %527, %528 : vector<8x32xf32>
    %c6_197 = arith.constant 6 : index
    %c0_198 = arith.constant 0 : index
    %c0_199 = arith.constant 0 : index
    %530 = vector.load %arg5[%c6_197, %c0_198, %c0_199] : memref<14x1x32xf32, #tpu.memory_space<vmem>>, vector<1x1x32xf32>
    %531 = vector.shape_cast %530 : vector<1x1x32xf32> to vector<1x32xf32>
    %c7_200 = arith.constant 7 : index
    %c0_201 = arith.constant 0 : index
    %c0_202 = arith.constant 0 : index
    %532 = vector.load %arg5[%c7_200, %c0_201, %c0_202] : memref<14x1x32xf32, #tpu.memory_space<vmem>>, vector<1x1x32xf32>
    %533 = vector.shape_cast %532 : vector<1x1x32xf32> to vector<1x32xf32>
    %c8_203 = arith.constant 8 : index
    %c0_204 = arith.constant 0 : index
    %c0_205 = arith.constant 0 : index
    %534 = vector.load %arg5[%c8_203, %c0_204, %c0_205] : memref<14x1x32xf32, #tpu.memory_space<vmem>>, vector<1x1x32xf32>
    %535 = vector.shape_cast %534 : vector<1x1x32xf32> to vector<1x32xf32>
    %c9_206 = arith.constant 9 : index
    %c0_207 = arith.constant 0 : index
    %c0_208 = arith.constant 0 : index
    %536 = vector.load %arg5[%c9_206, %c0_207, %c0_208] : memref<14x1x32xf32, #tpu.memory_space<vmem>>, vector<1x1x32xf32>
    %537 = vector.shape_cast %536 : vector<1x1x32xf32> to vector<1x32xf32>
    %c10_209 = arith.constant 10 : index
    %c0_210 = arith.constant 0 : index
    %c0_211 = arith.constant 0 : index
    %538 = vector.load %arg5[%c10_209, %c0_210, %c0_211] : memref<14x1x32xf32, #tpu.memory_space<vmem>>, vector<1x1x32xf32>
    %539 = vector.shape_cast %538 : vector<1x1x32xf32> to vector<1x32xf32>
    %c11_212 = arith.constant 11 : index
    %c0_213 = arith.constant 0 : index
    %c0_214 = arith.constant 0 : index
    %540 = vector.load %arg5[%c11_212, %c0_213, %c0_214] : memref<14x1x32xf32, #tpu.memory_space<vmem>>, vector<1x1x32xf32>
    %541 = vector.shape_cast %540 : vector<1x1x32xf32> to vector<1x32xf32>
    %c1_215 = arith.constant 1 : index
    %c0_216 = arith.constant 0 : index
    %c0_217 = arith.constant 0 : index
    %542 = vector.load %arg2[%c1_215, %c0_216, %c0_217] : memref<2x32x160xf32, #tpu.memory_space<vmem>>, vector<1x32x160xf32>
    %543 = vector.shape_cast %542 : vector<1x32x160xf32> to vector<32x160xf32>
    %c1_218 = arith.constant 1 : index
    %c0_219 = arith.constant 0 : index
    %c0_220 = arith.constant 0 : index
    %544 = vector.load %arg3[%c1_218, %c0_219, %c0_220] : memref<2x96x32xf32, #tpu.memory_space<vmem>>, vector<1x96x32xf32>
    %545 = vector.shape_cast %544 : vector<1x96x32xf32> to vector<96x32xf32>
    %c1_221 = arith.constant 1 : index
    %c0_222 = arith.constant 0 : index
    %c0_223 = arith.constant 0 : index
    %546 = vector.load %arg4[%c1_221, %c0_222, %c0_223] : memref<2x1x160xf32, #tpu.memory_space<vmem>>, vector<1x1x160xf32>
    %547 = vector.shape_cast %546 : vector<1x1x160xf32> to vector<1x160xf32>
    %cst_224 = arith.constant dense<0.000000e+00> : vector<8xf32>
    %548 = vector.multi_reduction <add>, %529, %cst_224 [1] : vector<8x32xf32> to vector<8xf32>
    %549 = vector.shape_cast %548 : vector<8xf32> to vector<8x1xf32>
    %cst_225 = arith.constant 3.200000e+01 : f32
    %550 = vector.broadcast %cst_225 : f32 to vector<8x1xf32>
    %551 = arith.divf %549, %550 : vector<8x1xf32>
    %552 = vector.broadcast %551 : vector<8x1xf32> to vector<8x32xf32>
    %553 = arith.subf %529, %552 : vector<8x32xf32>
    %554 = arith.mulf %553, %553 : vector<8x32xf32>
    %cst_226 = arith.constant dense<0.000000e+00> : vector<8xf32>
    %555 = vector.multi_reduction <add>, %554, %cst_226 [1] : vector<8x32xf32> to vector<8xf32>
    %556 = vector.shape_cast %555 : vector<8xf32> to vector<8x1xf32>
    %cst_227 = arith.constant 3.100000e+01 : f32
    %557 = vector.broadcast %cst_227 : f32 to vector<8x1xf32>
    %558 = arith.divf %556, %557 : vector<8x1xf32>
    %559 = vector.broadcast %551 : vector<8x1xf32> to vector<8x32xf32>
    %560 = arith.subf %529, %559 : vector<8x32xf32>
    %561 = vector.broadcast %531 : vector<1x32xf32> to vector<8x32xf32>
    %562 = arith.mulf %561, %560 : vector<8x32xf32>
    %563 = math.sqrt %558 : vector<8x1xf32>
    %cst_228 = arith.constant 9.99999997E-7 : f32
    %564 = vector.broadcast %cst_228 : f32 to vector<8x1xf32>
    %565 = arith.addf %563, %564 : vector<8x1xf32>
    %566 = vector.broadcast %565 : vector<8x1xf32> to vector<8x32xf32>
    %567 = arith.divf %562, %566 : vector<8x32xf32>
    %568 = vector.broadcast %533 : vector<1x32xf32> to vector<8x32xf32>
    %569 = arith.addf %567, %568 : vector<8x32xf32>
    %570 = vector.extract_strided_slice %543 {offsets = [0, 0], sizes = [32, 96], strides = [1, 1]} : vector<32x160xf32> to vector<32x96xf32>
    %cst_229 = arith.constant dense<0.000000e+00> : vector<8x96xf32>
    %571 = tpu.matmul %569, %570, %cst_229 {dimension_numbers = #tpu.dot_dimension_numbers<[1], [0], [0], [1], [0, 0, 1, 1], [], []>} : vector<8x32xf32>, vector<32x96xf32>, vector<8x96xf32> -> vector<8x96xf32>
    %572 = vector.extract_strided_slice %547 {offsets = [0, 0], sizes = [1, 96], strides = [1, 1]} : vector<1x160xf32> to vector<1x96xf32>
    %573 = vector.broadcast %572 : vector<1x96xf32> to vector<8x96xf32>
    %574 = arith.addf %571, %573 : vector<8x96xf32>
    %575 = vector.extract_strided_slice %574 {offsets = [0, 0], sizes = [8, 32], strides = [1, 1]} : vector<8x96xf32> to vector<8x32xf32>
    %576 = vector.extract_strided_slice %574 {offsets = [0, 32], sizes = [8, 32], strides = [1, 1]} : vector<8x96xf32> to vector<8x32xf32>
    %577 = vector.extract_strided_slice %574 {offsets = [0, 64], sizes = [8, 32], strides = [1, 1]} : vector<8x96xf32> to vector<8x32xf32>
    %578 = vector.extract_strided_slice %545 {offsets = [0, 0], sizes = [32, 32], strides = [1, 1]} : vector<96x32xf32> to vector<32x32xf32>
    %cst_230 = arith.constant 0.000000e+00 : f32
    %579 = vector.broadcast %cst_230 : f32 to vector<8x32xf32>
    %580 = vector.extract_strided_slice %575 {offsets = [0, 0], sizes = [8, 8], strides = [1, 1]} : vector<8x32xf32> to vector<8x8xf32>
    %581 = vector.extract_strided_slice %576 {offsets = [0, 0], sizes = [8, 8], strides = [1, 1]} : vector<8x32xf32> to vector<8x8xf32>
    %582 = vector.extract_strided_slice %577 {offsets = [0, 0], sizes = [8, 8], strides = [1, 1]} : vector<8x32xf32> to vector<8x8xf32>
    %cst_231 = arith.constant dense<0.000000e+00> : vector<8x8xf32>
    %583 = tpu.matmul %580, %581, %cst_231 {dimension_numbers = #tpu.dot_dimension_numbers<[1], [1], [0], [0], [0, 0, 1, 0], [], []>} : vector<8x8xf32>, vector<8x8xf32>, vector<8x8xf32> -> vector<8x8xf32>
    %584 = arith.addf %583, %366 : vector<8x8xf32>
    %cst_232 = arith.constant dense<0xFF800000> : vector<8xf32>
    %585 = vector.multi_reduction <maximumf>, %584, %cst_232 [1] : vector<8x8xf32> to vector<8xf32>
    %586 = vector.shape_cast %585 : vector<8xf32> to vector<8x1xf32>
    %587 = vector.broadcast %586 : vector<8x1xf32> to vector<8x8xf32>
    %588 = arith.subf %584, %587 : vector<8x8xf32>
    %589 = math.exp %588 : vector<8x8xf32>
    %cst_233 = arith.constant dense<0.000000e+00> : vector<8xf32>
    %590 = vector.multi_reduction <add>, %589, %cst_233 [1] : vector<8x8xf32> to vector<8xf32>
    %591 = vector.shape_cast %590 : vector<8xf32> to vector<8x1xf32>
    %592 = tpu.reciprocal %591 {approx = true} : vector<8x1xf32> -> vector<8x1xf32>
    %593 = vector.broadcast %592 : vector<8x1xf32> to vector<8x8xf32>
    %594 = arith.mulf %589, %593 : vector<8x8xf32>
    %cst_234 = arith.constant dense<0.000000e+00> : vector<8x8xf32>
    %595 = tpu.matmul %594, %582, %cst_234 {dimension_numbers = #tpu.dot_dimension_numbers<[1], [0], [0], [1], [0, 0, 1, 1], [], []>} : vector<8x8xf32>, vector<8x8xf32>, vector<8x8xf32> -> vector<8x8xf32>
    %596 = vector.extract_strided_slice %578 {offsets = [0, 0], sizes = [8, 32], strides = [1, 1]} : vector<32x32xf32> to vector<8x32xf32>
    %cst_235 = arith.constant dense<0.000000e+00> : vector<8x32xf32>
    %597 = tpu.matmul %595, %596, %cst_235 {dimension_numbers = #tpu.dot_dimension_numbers<[1], [0], [0], [1], [0, 0, 1, 1], [], []>} : vector<8x8xf32>, vector<8x32xf32>, vector<8x32xf32> -> vector<8x32xf32>
    %598 = arith.addf %579, %597 : vector<8x32xf32>
    %599 = vector.extract_strided_slice %575 {offsets = [0, 8], sizes = [8, 8], strides = [1, 1]} : vector<8x32xf32> to vector<8x8xf32>
    %600 = vector.extract_strided_slice %576 {offsets = [0, 8], sizes = [8, 8], strides = [1, 1]} : vector<8x32xf32> to vector<8x8xf32>
    %601 = vector.extract_strided_slice %577 {offsets = [0, 8], sizes = [8, 8], strides = [1, 1]} : vector<8x32xf32> to vector<8x8xf32>
    %cst_236 = arith.constant dense<0.000000e+00> : vector<8x8xf32>
    %602 = tpu.matmul %599, %600, %cst_236 {dimension_numbers = #tpu.dot_dimension_numbers<[1], [1], [0], [0], [0, 0, 1, 0], [], []>} : vector<8x8xf32>, vector<8x8xf32>, vector<8x8xf32> -> vector<8x8xf32>
    %603 = arith.addf %602, %366 : vector<8x8xf32>
    %cst_237 = arith.constant dense<0xFF800000> : vector<8xf32>
    %604 = vector.multi_reduction <maximumf>, %603, %cst_237 [1] : vector<8x8xf32> to vector<8xf32>
    %605 = vector.shape_cast %604 : vector<8xf32> to vector<8x1xf32>
    %606 = vector.broadcast %605 : vector<8x1xf32> to vector<8x8xf32>
    %607 = arith.subf %603, %606 : vector<8x8xf32>
    %608 = math.exp %607 : vector<8x8xf32>
    %cst_238 = arith.constant dense<0.000000e+00> : vector<8xf32>
    %609 = vector.multi_reduction <add>, %608, %cst_238 [1] : vector<8x8xf32> to vector<8xf32>
    %610 = vector.shape_cast %609 : vector<8xf32> to vector<8x1xf32>
    %611 = tpu.reciprocal %610 {approx = true} : vector<8x1xf32> -> vector<8x1xf32>
    %612 = vector.broadcast %611 : vector<8x1xf32> to vector<8x8xf32>
    %613 = arith.mulf %608, %612 : vector<8x8xf32>
    %cst_239 = arith.constant dense<0.000000e+00> : vector<8x8xf32>
    %614 = tpu.matmul %613, %601, %cst_239 {dimension_numbers = #tpu.dot_dimension_numbers<[1], [0], [0], [1], [0, 0, 1, 1], [], []>} : vector<8x8xf32>, vector<8x8xf32>, vector<8x8xf32> -> vector<8x8xf32>
    %615 = vector.extract_strided_slice %578 {offsets = [8, 0], sizes = [8, 32], strides = [1, 1]} : vector<32x32xf32> to vector<8x32xf32>
    %cst_240 = arith.constant dense<0.000000e+00> : vector<8x32xf32>
    %616 = tpu.matmul %614, %615, %cst_240 {dimension_numbers = #tpu.dot_dimension_numbers<[1], [0], [0], [1], [0, 0, 1, 1], [], []>} : vector<8x8xf32>, vector<8x32xf32>, vector<8x32xf32> -> vector<8x32xf32>
    %617 = arith.addf %598, %616 : vector<8x32xf32>
    %618 = vector.extract_strided_slice %575 {offsets = [0, 16], sizes = [8, 8], strides = [1, 1]} : vector<8x32xf32> to vector<8x8xf32>
    %619 = vector.extract_strided_slice %576 {offsets = [0, 16], sizes = [8, 8], strides = [1, 1]} : vector<8x32xf32> to vector<8x8xf32>
    %620 = vector.extract_strided_slice %577 {offsets = [0, 16], sizes = [8, 8], strides = [1, 1]} : vector<8x32xf32> to vector<8x8xf32>
    %cst_241 = arith.constant dense<0.000000e+00> : vector<8x8xf32>
    %621 = tpu.matmul %618, %619, %cst_241 {dimension_numbers = #tpu.dot_dimension_numbers<[1], [1], [0], [0], [0, 0, 1, 0], [], []>} : vector<8x8xf32>, vector<8x8xf32>, vector<8x8xf32> -> vector<8x8xf32>
    %622 = arith.addf %621, %366 : vector<8x8xf32>
    %cst_242 = arith.constant dense<0xFF800000> : vector<8xf32>
    %623 = vector.multi_reduction <maximumf>, %622, %cst_242 [1] : vector<8x8xf32> to vector<8xf32>
    %624 = vector.shape_cast %623 : vector<8xf32> to vector<8x1xf32>
    %625 = vector.broadcast %624 : vector<8x1xf32> to vector<8x8xf32>
    %626 = arith.subf %622, %625 : vector<8x8xf32>
    %627 = math.exp %626 : vector<8x8xf32>
    %cst_243 = arith.constant dense<0.000000e+00> : vector<8xf32>
    %628 = vector.multi_reduction <add>, %627, %cst_243 [1] : vector<8x8xf32> to vector<8xf32>
    %629 = vector.shape_cast %628 : vector<8xf32> to vector<8x1xf32>
    %630 = tpu.reciprocal %629 {approx = true} : vector<8x1xf32> -> vector<8x1xf32>
    %631 = vector.broadcast %630 : vector<8x1xf32> to vector<8x8xf32>
    %632 = arith.mulf %627, %631 : vector<8x8xf32>
    %cst_244 = arith.constant dense<0.000000e+00> : vector<8x8xf32>
    %633 = tpu.matmul %632, %620, %cst_244 {dimension_numbers = #tpu.dot_dimension_numbers<[1], [0], [0], [1], [0, 0, 1, 1], [], []>} : vector<8x8xf32>, vector<8x8xf32>, vector<8x8xf32> -> vector<8x8xf32>
    %634 = vector.extract_strided_slice %578 {offsets = [16, 0], sizes = [8, 32], strides = [1, 1]} : vector<32x32xf32> to vector<8x32xf32>
    %cst_245 = arith.constant dense<0.000000e+00> : vector<8x32xf32>
    %635 = tpu.matmul %633, %634, %cst_245 {dimension_numbers = #tpu.dot_dimension_numbers<[1], [0], [0], [1], [0, 0, 1, 1], [], []>} : vector<8x8xf32>, vector<8x32xf32>, vector<8x32xf32> -> vector<8x32xf32>
    %636 = arith.addf %617, %635 : vector<8x32xf32>
    %637 = vector.extract_strided_slice %575 {offsets = [0, 24], sizes = [8, 8], strides = [1, 1]} : vector<8x32xf32> to vector<8x8xf32>
    %638 = vector.extract_strided_slice %576 {offsets = [0, 24], sizes = [8, 8], strides = [1, 1]} : vector<8x32xf32> to vector<8x8xf32>
    %639 = vector.extract_strided_slice %577 {offsets = [0, 24], sizes = [8, 8], strides = [1, 1]} : vector<8x32xf32> to vector<8x8xf32>
    %cst_246 = arith.constant dense<0.000000e+00> : vector<8x8xf32>
    %640 = tpu.matmul %637, %638, %cst_246 {dimension_numbers = #tpu.dot_dimension_numbers<[1], [1], [0], [0], [0, 0, 1, 0], [], []>} : vector<8x8xf32>, vector<8x8xf32>, vector<8x8xf32> -> vector<8x8xf32>
    %641 = arith.addf %640, %366 : vector<8x8xf32>
    %cst_247 = arith.constant dense<0xFF800000> : vector<8xf32>
    %642 = vector.multi_reduction <maximumf>, %641, %cst_247 [1] : vector<8x8xf32> to vector<8xf32>
    %643 = vector.shape_cast %642 : vector<8xf32> to vector<8x1xf32>
    %644 = vector.broadcast %643 : vector<8x1xf32> to vector<8x8xf32>
    %645 = arith.subf %641, %644 : vector<8x8xf32>
    %646 = math.exp %645 : vector<8x8xf32>
    %cst_248 = arith.constant dense<0.000000e+00> : vector<8xf32>
    %647 = vector.multi_reduction <add>, %646, %cst_248 [1] : vector<8x8xf32> to vector<8xf32>
    %648 = vector.shape_cast %647 : vector<8xf32> to vector<8x1xf32>
    %649 = tpu.reciprocal %648 {approx = true} : vector<8x1xf32> -> vector<8x1xf32>
    %650 = vector.broadcast %649 : vector<8x1xf32> to vector<8x8xf32>
    %651 = arith.mulf %646, %650 : vector<8x8xf32>
    %cst_249 = arith.constant dense<0.000000e+00> : vector<8x8xf32>
    %652 = tpu.matmul %651, %639, %cst_249 {dimension_numbers = #tpu.dot_dimension_numbers<[1], [0], [0], [1], [0, 0, 1, 1], [], []>} : vector<8x8xf32>, vector<8x8xf32>, vector<8x8xf32> -> vector<8x8xf32>
    %653 = vector.extract_strided_slice %578 {offsets = [24, 0], sizes = [8, 32], strides = [1, 1]} : vector<32x32xf32> to vector<8x32xf32>
    %cst_250 = arith.constant dense<0.000000e+00> : vector<8x32xf32>
    %654 = tpu.matmul %652, %653, %cst_250 {dimension_numbers = #tpu.dot_dimension_numbers<[1], [0], [0], [1], [0, 0, 1, 1], [], []>} : vector<8x8xf32>, vector<8x32xf32>, vector<8x32xf32> -> vector<8x32xf32>
    %655 = arith.addf %636, %654 : vector<8x32xf32>
    %656 = arith.addf %529, %655 : vector<8x32xf32>
    %657 = vector.broadcast %535 : vector<1x32xf32> to vector<8x32xf32>
    %658 = arith.addf %656, %657 : vector<8x32xf32>
    %cst_251 = arith.constant dense<0.000000e+00> : vector<8xf32>
    %659 = vector.multi_reduction <add>, %658, %cst_251 [1] : vector<8x32xf32> to vector<8xf32>
    %660 = vector.shape_cast %659 : vector<8xf32> to vector<8x1xf32>
    %cst_252 = arith.constant 3.200000e+01 : f32
    %661 = vector.broadcast %cst_252 : f32 to vector<8x1xf32>
    %662 = arith.divf %660, %661 : vector<8x1xf32>
    %663 = vector.broadcast %662 : vector<8x1xf32> to vector<8x32xf32>
    %664 = arith.subf %658, %663 : vector<8x32xf32>
    %665 = arith.mulf %664, %664 : vector<8x32xf32>
    %cst_253 = arith.constant dense<0.000000e+00> : vector<8xf32>
    %666 = vector.multi_reduction <add>, %665, %cst_253 [1] : vector<8x32xf32> to vector<8xf32>
    %667 = vector.shape_cast %666 : vector<8xf32> to vector<8x1xf32>
    %cst_254 = arith.constant 3.100000e+01 : f32
    %668 = vector.broadcast %cst_254 : f32 to vector<8x1xf32>
    %669 = arith.divf %667, %668 : vector<8x1xf32>
    %670 = vector.broadcast %662 : vector<8x1xf32> to vector<8x32xf32>
    %671 = arith.subf %658, %670 : vector<8x32xf32>
    %672 = vector.broadcast %537 : vector<1x32xf32> to vector<8x32xf32>
    %673 = arith.mulf %672, %671 : vector<8x32xf32>
    %674 = math.sqrt %669 : vector<8x1xf32>
    %cst_255 = arith.constant 9.99999997E-7 : f32
    %675 = vector.broadcast %cst_255 : f32 to vector<8x1xf32>
    %676 = arith.addf %674, %675 : vector<8x1xf32>
    %677 = vector.broadcast %676 : vector<8x1xf32> to vector<8x32xf32>
    %678 = arith.divf %673, %677 : vector<8x32xf32>
    %679 = vector.broadcast %539 : vector<1x32xf32> to vector<8x32xf32>
    %680 = arith.addf %678, %679 : vector<8x32xf32>
    %681 = vector.extract_strided_slice %543 {offsets = [0, 96], sizes = [32, 64], strides = [1, 1]} : vector<32x160xf32> to vector<32x64xf32>
    %cst_256 = arith.constant dense<0.000000e+00> : vector<8x64xf32>
    %682 = tpu.matmul %680, %681, %cst_256 {dimension_numbers = #tpu.dot_dimension_numbers<[1], [0], [0], [1], [0, 0, 1, 1], [], []>} : vector<8x32xf32>, vector<32x64xf32>, vector<8x64xf32> -> vector<8x64xf32>
    %683 = vector.extract_strided_slice %547 {offsets = [0, 96], sizes = [1, 64], strides = [1, 1]} : vector<1x160xf32> to vector<1x64xf32>
    %684 = vector.broadcast %683 : vector<1x64xf32> to vector<8x64xf32>
    %685 = arith.addf %682, %684 : vector<8x64xf32>
    %cst_257 = arith.constant 0.000000e+00 : f32
    %686 = vector.broadcast %cst_257 : f32 to vector<8x64xf32>
    %687 = arith.maximumf %685, %686 : vector<8x64xf32>
    %688 = vector.extract_strided_slice %545 {offsets = [32, 0], sizes = [64, 32], strides = [1, 1]} : vector<96x32xf32> to vector<64x32xf32>
    %cst_258 = arith.constant dense<0.000000e+00> : vector<8x32xf32>
    %689 = tpu.matmul %687, %688, %cst_258 {dimension_numbers = #tpu.dot_dimension_numbers<[1], [0], [0], [1], [0, 0, 1, 1], [], []>} : vector<8x64xf32>, vector<64x32xf32>, vector<8x32xf32> -> vector<8x32xf32>
    %690 = arith.addf %658, %689 : vector<8x32xf32>
    %691 = vector.broadcast %541 : vector<1x32xf32> to vector<8x32xf32>
    %692 = arith.addf %690, %691 : vector<8x32xf32>
    %c12_259 = arith.constant 12 : index
    %c0_260 = arith.constant 0 : index
    %c0_261 = arith.constant 0 : index
    %693 = vector.load %arg5[%c12_259, %c0_260, %c0_261] : memref<14x1x32xf32, #tpu.memory_space<vmem>>, vector<1x1x32xf32>
    %694 = vector.shape_cast %693 : vector<1x1x32xf32> to vector<1x32xf32>
    %c13_262 = arith.constant 13 : index
    %c0_263 = arith.constant 0 : index
    %c0_264 = arith.constant 0 : index
    %695 = vector.load %arg5[%c13_262, %c0_263, %c0_264] : memref<14x1x32xf32, #tpu.memory_space<vmem>>, vector<1x1x32xf32>
    %696 = vector.shape_cast %695 : vector<1x1x32xf32> to vector<1x32xf32>
    %cst_265 = arith.constant dense<0.000000e+00> : vector<8xf32>
    %697 = vector.multi_reduction <add>, %692, %cst_265 [1] : vector<8x32xf32> to vector<8xf32>
    %698 = vector.shape_cast %697 : vector<8xf32> to vector<8x1xf32>
    %cst_266 = arith.constant 3.200000e+01 : f32
    %699 = vector.broadcast %cst_266 : f32 to vector<8x1xf32>
    %700 = arith.divf %698, %699 : vector<8x1xf32>
    %701 = vector.broadcast %700 : vector<8x1xf32> to vector<8x32xf32>
    %702 = arith.subf %692, %701 : vector<8x32xf32>
    %703 = arith.mulf %702, %702 : vector<8x32xf32>
    %cst_267 = arith.constant dense<0.000000e+00> : vector<8xf32>
    %704 = vector.multi_reduction <add>, %703, %cst_267 [1] : vector<8x32xf32> to vector<8xf32>
    %705 = vector.shape_cast %704 : vector<8xf32> to vector<8x1xf32>
    %cst_268 = arith.constant 3.100000e+01 : f32
    %706 = vector.broadcast %cst_268 : f32 to vector<8x1xf32>
    %707 = arith.divf %705, %706 : vector<8x1xf32>
    %708 = vector.broadcast %700 : vector<8x1xf32> to vector<8x32xf32>
    %709 = arith.subf %692, %708 : vector<8x32xf32>
    %710 = vector.broadcast %694 : vector<1x32xf32> to vector<8x32xf32>
    %711 = arith.mulf %710, %709 : vector<8x32xf32>
    %712 = math.sqrt %707 : vector<8x1xf32>
    %cst_269 = arith.constant 9.99999997E-7 : f32
    %713 = vector.broadcast %cst_269 : f32 to vector<8x1xf32>
    %714 = arith.addf %712, %713 : vector<8x1xf32>
    %715 = vector.broadcast %714 : vector<8x1xf32> to vector<8x32xf32>
    %716 = arith.divf %711, %715 : vector<8x32xf32>
    %717 = vector.broadcast %696 : vector<1x32xf32> to vector<8x32xf32>
    %718 = arith.addf %716, %717 : vector<8x32xf32>
    %c1_270 = arith.constant 1 : index
    %c0_271 = arith.constant 0 : index
    %c0_272 = arith.constant 0 : index
    %719 = vector.load %arg6[%c1_270, %c0_271, %c0_272] : memref<2x8x32xf32, #tpu.memory_space<vmem>>, vector<1x8x32xf32>
    %720 = vector.shape_cast %719 : vector<1x8x32xf32> to vector<8x32xf32>
    %721 = vector.shape_cast %718 : vector<8x32xf32> to vector<1x8x32xf32>
    tpu.vector_store %arg6[%c1_270, %c0_271, %c0_272], %721 {strides = array<i32>} : memref<2x8x32xf32, #tpu.memory_space<vmem>>, vector<1x8x32xf32>,
    return
  }
}

</mosaic_0001>

<bundles_post_ra>
// kernel: encoder_forward.1
= control target key start
LH: loop header
LB: loop body
LE: loop exit
PB: predicated region body
PF: predicated region fallthrough
CT: control target
= control target key end

     0   :  { %vm61_vm0 = vcmask 261120   ;;  %s3858_s0 = inlined_call_operand.vmem [shape: f32[2,8,32], index: 0, kind: input, shape index: {}]   ;;  %s3859_s1 = inlined_call_operand.vmem [shape: f32[2,1,8], index: 1, kind: input, shape index: {}]   ;;  %s3860_s2 = inlined_call_operand.vmem [shape: f32[2,32,160], index: 2, kind: input, shape index: {}]   ;;  %s3861_s3 = inlined_call_operand.vmem [shape: f32[2,96,32], index: 3, kind: input, shape index: {}]   ;;  %s3862_s4 = inlined_call_operand.vmem [shape: f32[2,1,160], index: 4, kind: input, shape index: {}]   ;;  %s3863_s5 = inlined_call_operand.vmem [shape: f32[14,1,32], index: 5, kind: input, shape index: {}]   ;;  %s3864_s6 = inlined_call_operand.hbm [shape: f32[2,8,32], index: 6, kind: output, shape index: {}]  }
   0x1   :  { %v3026_v0 = vld [vmem:[%s3858_s0] sm:$0xff] }
   0x2   :  { %v62_v1 = vsel %vm61_vm0, %v3026_v0, 0.0 }
   0x3   :  { %63 = vadd.xlane.f32.xlu0 %v62_v1 }
   0x4   :  { %11 = vsyncpa [#allocation3], 0  ;;  %v2971_v2 = vmov 32.0   ;;  %v2972_v14 = vmov 31.0   ;;  %v3038_v18 = vld [vmem:[%s3860_s2 + $0x30] sm:$0xff]  ;;  %v3043_v19 = vld [vmem:[%s3860_s2 + $0x20] sm:$0xff] }
   0x5   :  { %2835 = vrcp.f32 %v2971_v2  ;;  %140 = vmatpush.msra.mxu0 %v3038_v18  ;;  %v3049_v21 = vld [vmem:[%s3860_s2 + $0x10] sm:$0xff]  ;;  %v3055_v22 = vld [vmem:[%s3860_s2] sm:$0xff]  ;;  %s2973_s13 = smov 88   ;;  %s2974_s14 = smov 96   ;;  %vm151_vm9 = vcmask 64512  }
   0x6   :  { %2837 = vrcp.f32 %v2972_v14  ;;  %v2805_v42 = vld [vmem:[%s3863_s5] ss:$0 sm:$0xff]  ;;  %v2806_v49 = vld [vmem:[%s3863_s5 + $0x1] ss:$0 sm:$0xff]  ;;  %s2975_s15 = smov 72   ;;  %s2976_s16 = smov 80  }
   0x7   :  { %141 = vmatpush.msra.mxu0 %v3043_v19  ;;  %v3072_v53 = vld [vmem:[%s3862_s4] sm:$0x3]  ;;  %s2977_s21 = smov 64   ;;  %s2978_s22 = smov 120  }
   0x8   :  { %v123_v54 = vperm.slane %v3072_v53, 0  ;;  %v48_v57 = vld [vmem:[%s3861_s3] sm:$0xff]  ;;  %s2979_s23 = smov 104   ;;  %s2980_s24 = smov 112  }
   0x9   :  { %142 = vmatpush.msra.mxu0 %v3049_v21  ;;  %319 = vmatpush.msra.mxu3 %v48_v57  ;;  %v3099_v62 = vld [vmem:[%s3859_s1] ss:$0 sm:$0xff]  ;;  %s2981_s25 = smov 48   ;;  %s2982_s26 = smov 56  }
   0xa   :  { %s2983_s27 = smov 40   ;;  %s2984_s18 = smov 32  }
   0xb   :  { %v2836_v3 = vpop.eup %2835  ;;  %143 = vmatpush.msra.mxu0 %v3055_v22 }
   0xc   :  { %v66_v4 = vmul.f32 32.0, %v2836_v3  ;;  %vm70_vm1 = vweird.f32 %v2836_v3  ;;  %v2838_v15 = vpop.eup %2837 }
   0xd   :  { %v79_v16 = vmul.f32 31.0, %v2838_v15  ;;  %vm83_vm2 = vweird.f32 %v2838_v15 }
   0xe   :  { %v67_v5 = vsub.f32 1.0, %v66_v4 }
   0xf   :  { %v80_v17 = vsub.f32 1.0, %v79_v16 }
  0x10   :  { %v68_v6 = vmul.f32 %v2836_v3, %v67_v5 }
  0x11   :  { %v81_v20 = vmul.f32 %v2838_v15, %v80_v17 }
  0x12   :  { %v69_v7 = vadd.f32 %v2836_v3, %v68_v6 }
  0x13   :  { %v82_v23 = vadd.f32 %v2838_v15, %v81_v20 }
  0x14   :  { %v3030_v8 = vsel %vm70_vm1, %v2836_v3, %v69_v7  ;;  %vm616_vm1 = vcmask 523264  }
  0x15   :  { %v3059_v24 = vsel %vm83_vm2, %v2838_v15, %v82_v23 }
  0x76   :  { %v64_v9 = vpop.xlane.xlu0 %63 }
  0x77   :  { %v72_v10 = vmul.f32 %v3030_v8, %v64_v9 }
  0x79   :  { %v73_v11 = vsub.f32 %v3026_v0, %v72_v10 }
  0x7b   :  { %v74_v12 = vmul.f32 %v73_v11, %v73_v11  ;;  %v89_v47 = vmul.f32 %v2805_v42, %v73_v11 }
  0x7d   :  { %v75_v13 = vsel %vm61_vm0, %v74_v12, 0.0 }
  0x7e   :  { %76 = vadd.xlane.f32.xlu0 %v75_v13 }
  0xf1   :  { %v77_v25 = vpop.xlane.xlu0 %76 }
  0xf2   :  { %v85_v26 = vmul.f32 %v3059_v24, %v77_v25 }
  0xf4   :  { %2839 = vrsqrt.f32 %v85_v26  ;;  %vm97_vm3 = vcmp.eq.f32.partialorder %v85_v26, inf  ;;  %v100_v34 = vand.u32 2147483648, %v85_v26  ;;  %vm99_vm4 = vcmp.eq.f32.partialorder %v85_v26, 0.0 }
  0xfa   :  { %v2840_v27 = vpop.eup %2839 }
  0xfb   :  { %v91_v28 = vmul.f32 %v2840_v27, %v85_v26 }
  0xfd   :  { %v92_v29 = vmul.f32 %v2840_v27, %v91_v28 }
  0xff   :  { %v93_v30 = vmul.f32 0.5, %v92_v29 }
 0x101   :  { %v94_v31 = vsub.f32 1.5, %v93_v30 }
 0x103   :  { %v95_v32 = vmul.f32 %v2840_v27, %v94_v31 }
 0x105   :  { %v96_v33 = vmul.f32 %v95_v32, %v85_v26 }
 0x107   :  { %v98_v35 = vsel %vm97_vm3, %v85_v26, %v96_v33 }
 0x108   :  { %v101_v36 = vsel %vm99_vm4, %v100_v34, %v98_v35 }
 0x109   :  { %v102_v37 = vadd.f32 1e-06, %v101_v36 }
 0x10b   :  { %2841 = vrcp.f32 %v102_v37  ;;  %v114_v41 = vand.u32 2147483648, %v102_v37  ;;  %v112_v44 = vand.u32 2147483647, %v102_v37  ;;  %vm108_vm6 = vweird.f32 %v102_v37 }
 0x10d   :  { %v115_v46 = vor.u32 1.1754944e-38, %v114_v41  ;;  %vm113_vm8 = vcmp.eq.f32.partialorder %v112_v44, 8.507059e+37 }
 0x111   :  { %v2842_v38 = vpop.eup %2841 }
 0x112   :  { %v104_v39 = vmul.f32 %v2842_v38, %v102_v37  ;;  %vm109_vm5 = vweird.f32 %v2842_v38 }
 0x113   :  { %vm110_vm7 = vmor %vm108_vm6, %vm109_vm5 }
 0x114   :  { %v105_v40 = vsub.f32 1.0, %v104_v39 }
 0x116   :  { %v106_v43 = vmul.f32 %v2842_v38, %v105_v40 }
 0x118   :  { %v107_v45 = vadd.f32 %v2842_v38, %v106_v43 }
 0x11a   :  { %v111_v48 = vsel %vm110_vm7, %v2842_v38, %v107_v45 }
 0x11b   :  { %v116_v50 = vsel %vm113_vm8, %v115_v46, %v111_v48 }
 0x11c   :  { %v117_v51 = vmul.f32 %v116_v50, %v89_v47 }
 0x11e   :  { %v121_v52 = vadd.f32 %v2806_v49, %v117_v51 }
 0x120   :  { %2567 = vmatmul.msk.f32.vlgmr.msra.gmra.mxu0 %vm61_vm0, %v121_v52 }
 0x19d   :  { %v145_v55 = vpop.f32.mrf.mxu0 }
 0x19e   :  { %v3077_v56 = vadd.f32 %v145_v55, %v123_v54 }
 0x1a0   :  { %215 = vrot.lane.b32.xlu0 %v3077_v56, %s2973_s13  ;;  %149 = vrot.lane.b32.xlu1 %v3077_v56, %s2974_s14 }
 0x1a8   :  { %415 = vrot.lane.b32.xlu0 %v3077_v56, %s2975_s15 }
 0x1b0   :  { %326 = vrot.lane.b32.xlu0 %v3077_v56, %s2976_s16 }
 0x212   :  { %v216_v58 = vpop.permute.xlu0 %215  ;;  %v150_v59 = vpop.permute.xlu1 %149 }
 0x213   :  { %2568 = vmatpush.xpose.msk.msra.mxu1 %vm151_vm9, %v150_v59  ;;  %2571 = vmatpush.xpose.msk.msrb.mxu0 %vm151_vm9, %v216_v58  ;;  %v49_v59 = vld [vmem:[%s3861_s3 + $0x8] sm:$0xff] }
 0x216   :  { %2569 = vmatmul.msk.f32.vlgmr.msra.gmra.mxu1 %vm151_vm9, %v3077_v56 }
 0x217   :  { %296 = vmatpush.msrb.mxu1 %v49_v59 }
 0x21a   :  { %v416_v60 = vpop.permute.xlu0 %415 }
 0x21b   :  { %2580 = vmatpush.xpose.msk.msrb.mxu3 %vm151_vm9, %v416_v60 }
 0x222   :  { %v327_v61 = vpop.permute.xlu0 %326 }
 0x223   :  { %2576 = vmatpush.xpose.msk.msra.mxu0 %vm151_vm9, %v327_v61 }
 0x293   :  { %v173_v63 = vpop.f32.mrf.mxu1 }
 0x294   :  { %v174_v1 = vadd.f32 %v3099_v62, %v173_v63  ;;  %v50_v63 = vld [vmem:[%s3861_s3 + $0x10] sm:$0xff] }
 0x295   :  { %407 = vmatpush.msra.mxu1 %v50_v63 }
 0x296   :  { %v176_v2 = vsel %vm151_vm9, %v174_v1, -inf }
 0x297   :  { %177 = vmax.xlane.f32.xlu1 %v176_v2 }
 0x30a   :  { %v178_v3 = vpop.xlane.xlu1 %177 }
 0x30b   :  { %v179_v4 = vsub.f32 %v174_v1, %v178_v3  ;;  %v51_v3 = vld [vmem:[%s3861_s3 + $0x18] sm:$0xff] }
 0x30d   :  { %v180_v5 = vmul.f32 1.442695, %v179_v4 }
 0x30f   :  { %2843 = vpow2.f32 %v180_v5 }
 0x315   :  { %v2844_v6 = vpop.eup %2843 }
 0x316   :  { %v182_v7 = vsel %vm151_vm9, %v2844_v6, 0.0 }
 0x317   :  { %183 = vadd.xlane.f32.xlu2 %v182_v7  ;;  %v45_v7 = vld [vmem:[%s3860_s2 + $0x28] sm:$0xff] }
 0x32f   :  { %187 = vrot.lane.b32.xlu2 %v3077_v56, %s2977_s21 }
 0x337   :  { %213 = vrot.lane.b32.xlu2 %v3077_v56, %s2978_s22 }
 0x33f   :  { %413 = vrot.lane.b32.xlu2 %v3077_v56, %s2979_s23 }
 0x347   :  { %324 = vrot.lane.b32.xlu2 %v3077_v56, %s2980_s24 }
 0x38a   :  { %v184_v9 = vpop.xlane.xlu2 %183 }
 0x38b   :  { %2845 = vrcp.f32 %v184_v9 }
 0x391   :  { %v2846_v10 = vpop.eup %2845 }
 0x392   :  { %v188_v11 = vpop.permute.xlu2 %187  ;;  %v186_v12 = vmul.f32 %v2846_v10, %v2844_v6 }
 0x393   :  { %208 = vmatpush.msra.mxu2 %v188_v11  ;;  %v3154_v11 = vpack.i.bf16 %v45_v7, %v3043_v19 }
 0x394   :  { %2570 = vmatmul.msk.f32.vlgmr.msra.gmra.mxu2 %vm151_vm9, %v186_v12 }
 0x39a   :  { %v214_v13 = vpop.permute.xlu2 %213 }
 0x39b   :  { %2572 = vmatmul.msk.f32.vlgmr.msrb.gmra.mxu0 %vm151_vm9, %v214_v13 }
 0x3a2   :  { %v414_v14 = vpop.permute.xlu2 %413 }
 0x3aa   :  { %v325_v15 = vpop.permute.xlu2 %324 }
 0x3ab   :  { %2577 = vmatmul.msk.f32.vlgmr.msra.gmra.mxu0 %vm151_vm9, %v325_v15 }
 0x417   :  { %v210_v16 = vpop.f32.mrf.mxu2 }
 0x418   :  { %v238_v17 = vpop.f32.mrf.mxu0  ;;  %2575 = vmatmul.msk.f32.vlgmr.msra.gmra.mxu3 %vm151_vm9, %v210_v16  ;;  %v43_v16 = vld [vmem:[%s3860_s2 + $0x18] sm:$0xff] }
 0x419   :  { %v239_v20 = vadd.f32 %v3099_v62, %v238_v17 }
 0x41b   :  { %v241_v23 = vsel %vm151_vm9, %v239_v20, -inf }
 0x41c   :  { %242 = vmax.xlane.f32.xlu1 %v241_v23  ;;  %v3170_v23 = vpack.i.bf16 %v43_v16, %v3049_v21 }
 0x420   :  { %2581 = vmatmul.msk.f32.vlgmr.msrb.gmra.mxu3 %vm151_vm9, %v414_v14  ;;  %v2808_v14 = vld [vmem:[%s3863_s5 + $0x2] ss:$0 sm:$0xff] }
 0x428   :  { %v349_v25 = vpop.f32.mrf.mxu0 }
 0x429   :  { %v350_v26 = vadd.f32 %v3099_v62, %v349_v25 }
 0x42b   :  { %v352_v27 = vsel %vm151_vm9, %v350_v26, -inf }
 0x42c   :  { %353 = vmax.xlane.f32.xlu0 %v352_v27 }
 0x48f   :  { %v243_v28 = vpop.xlane.xlu1 %242 }
 0x490   :  { %v244_v29 = vsub.f32 %v239_v20, %v243_v28 }
 0x492   :  { %v245_v30 = vmul.f32 1.442695, %v244_v29 }
 0x494   :  { %2847 = vpow2.f32 %v245_v30 }
 0x49a   :  { %v2848_v31 = vpop.eup %2847 }
 0x49b   :  { %v3121_v32 = vpop.f32.mrf.mxu3  ;;  %v247_v33 = vsel %vm151_vm9, %v2848_v31, 0.0 }
 0x49c   :  { %248 = vadd.xlane.f32.xlu1 %v247_v33 }
 0x49f   :  { %v354_v34 = vpop.xlane.xlu0 %353 }
 0x4a0   :  { %v355_v35 = vsub.f32 %v350_v26, %v354_v34  ;;  %v41_v26 = vld [vmem:[%s3860_s2 + $0x8] sm:$0xff] }
 0x4a1   :  { %v3186_v27 = vpack.i.bf16 %v41_v26, %v3055_v22 }
 0x4a2   :  { %v356_v36 = vmul.f32 1.442695, %v355_v35 }
 0x4a3   :  { %v438_v37 = vpop.f32.mrf.mxu3 }
 0x4a4   :  { %2849 = vpow2.f32 %v356_v36  ;;  %v439_v38 = vadd.f32 %v3099_v62, %v438_v37 }
 0x4a6   :  { %v441_v39 = vsel %vm151_vm9, %v439_v38, -inf }
 0x4a7   :  { %442 = vmax.xlane.f32.xlu2 %v441_v39 }
 0x4aa   :  { %v2850_v40 = vpop.eup %2849 }
 0x4ab   :  { %v358_v41 = vsel %vm151_vm9, %v2850_v40, 0.0 }
 0x4ac   :  { %359 = vadd.xlane.f32.xlu1 %v358_v41 }
 0x4bf   :  { %363 = vrot.lane.b32.xlu2 %v3077_v56, %s2981_s25 }
 0x4c5   :  { %252 = vrot.lane.b32.xlu1 %v3077_v56, %s2982_s26 }
 0x4c7   :  { %2731 = vrot.lane.b32.xlu2 %v3154_v11, %s2984_s18 }
 0x4cd   :  { %452 = vrot.lane.b32.xlu1 %v3077_v56, %s2983_s27 }
 0x4cf   :  { %2736 = vrot.lane.b32.xlu2 %v3170_v23, %s2984_s18 }
 0x4d7   :  { %586 = vrot.lane.b32.xlu2 %v123_v54, %s2984_s18 }
 0x50f   :  { %v249_v47 = vpop.xlane.xlu1 %248 }
 0x51a   :  { %v443_v42 = vpop.xlane.xlu2 %442 }
 0x51b   :  { %v444_v43 = vsub.f32 %v439_v38, %v443_v42 }
 0x51d   :  { %v445_v44 = vmul.f32 1.442695, %v444_v43 }
 0x51f   :  { %2851 = vpow2.f32 %v445_v44  ;;  %v360_v48 = vpop.xlane.xlu1 %359 }
 0x520   :  { %2853 = vrcp.f32 %v249_v47 }
 0x521   :  { %2855 = vrcp.f32 %v360_v48 }
 0x522   :  { %v364_v52 = vpop.permute.xlu2 %363 }
 0x525   :  { %v2852_v45 = vpop.eup %2851 }
 0x526   :  { %v447_v46 = vsel %vm151_vm9, %v2852_v45, 0.0  ;;  %v2854_v49 = vpop.eup %2853 }
 0x527   :  { %448 = vadd.xlane.f32.xlu0 %v447_v46  ;;  %v251_v51 = vmul.f32 %v2854_v49, %v2848_v31  ;;  %v2856_v55 = vpop.eup %2855 }
 0x528   :  { %v362_v56 = vmul.f32 %v2856_v55, %v2850_v40 }
 0x52a   :  { %v2732_v33 = vpop.permute.xlu2 %2731 }
 0x52b   :  { %v2734_v36 = vunpack.i.h.bf16 %v2732_v33  ;;  %v2733_v37 = vunpack.i.l.bf16 %v2732_v33 }
 0x52d   :  { %v580_v39 = vsel %vm61_vm0, %v2733_v37, %v2734_v36 }
 0x532   :  { %v2737_v42 = vpop.permute.xlu2 %2736 }
 0x533   :  { %v2739_v44 = vunpack.i.h.bf16 %v2737_v42 }
 0x537   :  { %v253_v50 = vpop.permute.xlu1 %252 }
 0x538   :  { %273 = vmatpush.msrb.mxu2 %v253_v50 }
 0x539   :  { %2573 = vmatmul.msk.f32.vlgmr.msrb.gmra.mxu2 %vm151_vm9, %v251_v51 }
 0x53a   :  { %384 = vmatpush.msra.mxu2 %v364_v52  ;;  %v587_v33 = vpop.permute.xlu2 %586 }
 0x53c   :  { %496 = vmatpush.msrb.mxu2 %v51_v3 }
 0x53f   :  { %v453_v57 = vpop.permute.xlu1 %452 }
 0x540   :  { %473 = vmatpush.msrb.mxu0 %v453_v57  ;;  %v59_v57 = vld [vmem:[%s3861_s3 + $0x58] sm:$0xff] }
 0x541   :  { %2578 = vmatmul.msk.f32.vlgmr.msra.gmra.mxu2 %vm151_vm9, %v362_v56  ;;  %v553_v56 = vperm.slane %v3072_v53, 1  ;;  %628 = vmatpush.msra.mxu3 %v59_v57  ;;  %v56_v53 = vld [vmem:[%s3861_s3 + $0x40] sm:$0xff] }
 0x59a   :  { %v449_v58 = vpop.xlane.xlu0 %448 }
 0x59b   :  { %2857 = vrcp.f32 %v449_v58  ;;  %v58_v58 = vld [vmem:[%s3861_s3 + $0x50] sm:$0xff] }
 0x59c   :  { %629 = vmatpush.msra.mxu3 %v58_v58 }
 0x5a1   :  { %v2858_v60 = vpop.eup %2857 }
 0x5a2   :  { %v451_v61 = vmul.f32 %v2858_v60, %v2852_v45  ;;  %v2738_v45 = vunpack.i.l.bf16 %v2737_v42  ;;  %v57_v60 = vld [vmem:[%s3861_s3 + $0x48] sm:$0xff] }
 0x5a3   :  { %630 = vmatpush.msra.mxu3 %v57_v60 }
 0x5a4   :  { %2582 = vmatmul.msk.f32.vlgmr.msrb.gmra.mxu0 %vm151_vm9, %v451_v61  ;;  %v579_v48 = vsel %vm61_vm0, %v2738_v45, %v2739_v44 }
 0x5a5   :  { %631 = vmatpush.msra.mxu3 %v56_v53 }
 0x5bc   :  { %v275_v1 = vpop.f32.mrf.mxu2 }
 0x5bd   :  { %2574 = vmatmul.msk.f32.vlgmr.msrb.gmra.mxu1 %vm151_vm9, %v275_v1 }
 0x5c4   :  { %v386_v2 = vpop.f32.mrf.mxu2 }
 0x5c5   :  { %2579 = vmatmul.msk.f32.vlgmr.msra.gmra.mxu1 %vm151_vm9, %v386_v2  ;;  %v55_v2 = vld [vmem:[%s3861_s3 + $0x38] sm:$0xff] }
 0x5c6   :  { %632 = vmatpush.msra.mxu3 %v55_v2 }
 0x621   :  { %v475_v4 = vpop.f32.mrf.mxu0 }
 0x622   :  { %2583 = vmatmul.msk.f32.vlgmr.msrb.gmra.mxu2 %vm151_vm9, %v475_v4 }
 0x63a   :  { %v298_v5 = vpop.f32.mrf.mxu1 }
 0x63b   :  { %v322_v9 = vadd.f32 %v3121_v32, %v298_v5 }
 0x642   :  { %v409_v6 = vpop.f32.mrf.mxu1 }
 0x643   :  { %v412_v10 = vadd.f32 %v409_v6, %v322_v9 }
 0x6a5   :  { %v498_v12 = vpop.f32.mrf.mxu2 }
 0x6a6   :  { %v501_v13 = vadd.f32 %v498_v12, %v412_v10  ;;  %v2809_v12 = vld [vmem:[%s3863_s5 + $0x3] ss:$0 sm:$0xff] }
 0x6a8   :  { %v502_v15 = vadd.f32 %v501_v13, %v3026_v0  ;;  %v47_v0 = vld [vmem:[%s3860_s2 + $0x38] sm:$0xff] }
 0x6a9   :  { %v2725_v25 = vpack.i.bf16 %v47_v0, %v3038_v18 }
 0x6aa   :  { %v3165_v17 = vadd.f32 %v2808_v14, %v502_v15 }
 0x6ac   :  { %v507_v20 = vsel %vm61_vm0, %v3165_v17, 0.0 }
 0x6ad   :  { %508 = vadd.xlane.f32.xlu0 %v507_v20 }
 0x6c1   :  { %2726 = vrot.lane.b32.xlu0 %v2725_v25, %s2984_s18  ;;  %v2810_v25 = vld [vmem:[%s3863_s5 + $0x4] ss:$0 sm:$0xff] }
 0x6c9   :  { %2741 = vrot.lane.b32.xlu0 %v3186_v27, %s2984_s18 }
 0x6d1   :  { %588 = vrot.lane.b32.xlu0 %v553_v56, %s2984_s18 }
 0x720   :  { %v509_v28 = vpop.xlane.xlu0 %508 }
 0x721   :  { %v510_v54 = vmul.f32 %v509_v28, %v3030_v8 }
 0x723   :  { %v3192_v29 = vsub.f32 %v3165_v17, %v510_v54 }
 0x725   :  { %v512_v30 = vmul.f32 %v3192_v29, %v3192_v29  ;;  %v520_v20 = vmul.f32 %v2809_v12, %v3192_v29  ;;  %v53_v29 = vld [vmem:[%s3861_s3 + $0x28] sm:$0xff] }
 0x727   :  { %v513_v31 = vsel %vm61_vm0, %v512_v30, 0.0  ;;  %v54_v30 = vld [vmem:[%s3861_s3 + $0x30] sm:$0xff] }
 0x728   :  { %514 = vadd.xlane.f32.xlu1 %v513_v31  ;;  %633 = vmatpush.msra.mxu3 %v54_v30  ;;  %v52_v31 = vld [vmem:[%s3861_s3 + $0x20] sm:$0xff] }
 0x72a   :  { %634 = vmatpush.msra.mxu3 %v53_v29  ;;  %v2600_v29 = vld [vmem:[%s3861_s3 + $0x60] sm:$0xff] }
 0x72c   :  { %635 = vmatpush.msra.mxu3 %v52_v31 }
 0x72e   :  { %923 = vmatpush.msrb.mxu3 %v2600_v29 }
 0x733   :  { %v2727_v32 = vpop.permute.xlu0 %2726 }
 0x734   :  { %v2729_v34 = vunpack.i.h.bf16 %v2727_v32  ;;  %v2728_v35 = vunpack.i.l.bf16 %v2727_v32 }
 0x736   :  { %v581_v38 = vsel %vm61_vm0, %v2728_v35, %v2729_v34 }
 0x737   :  { %607 = vmatpush.msrb.mxu1 %v581_v38  ;;  %v2811_v38 = vld [vmem:[%s3863_s5 + $0x5] ss:$0 sm:$0xff] }
 0x739   :  { %608 = vmatpush.msrb.mxu1 %v580_v39 }
 0x73b   :  { %v2742_v43 = vpop.permute.xlu0 %2741  ;;  %609 = vmatpush.msrb.mxu1 %v579_v48  ;;  %v3252_v48 = vld [vmem:[%s3860_s2 + $0x70] sm:$0xff] }
 0x73c   :  { %v2744_v46 = vunpack.i.h.bf16 %v2742_v43  ;;  %v2743_v47 = vunpack.i.l.bf16 %v2742_v43  ;;  %745 = vmatpush.msra.mxu0 %v3252_v48 }
 0x73e   :  { %v578_v49 = vsel %vm61_vm0, %v2743_v47, %v2744_v46 }
 0x73f   :  { %610 = vmatpush.msrb.mxu1 %v578_v49  ;;  %v3263_v49 = vld [vmem:[%s3860_s2 + $0x50] sm:$0xff] }
 0x743   :  { %v589_v32 = vpop.permute.xlu0 %588 }
 0x744   :  { %v590_v34 = vsel %vm61_vm0, %v587_v33, %v589_v32 }
 0x79b   :  { %v515_v40 = vpop.xlane.xlu1 %514 }
 0x79c   :  { %v516_v41 = vmul.f32 %v515_v40, %v3059_v24 }
 0x79e   :  { %2859 = vrsqrt.f32 %v516_v41  ;;  %vm528_vm10 = vcmp.eq.f32.partialorder %v516_v41, inf  ;;  %v531_v1 = vand.u32 2147483648, %v516_v41  ;;  %vm530_vm11 = vcmp.eq.f32.partialorder %v516_v41, 0.0 }
 0x7a4   :  { %v2860_v50 = vpop.eup %2859 }
 0x7a5   :  { %v522_v51 = vmul.f32 %v2860_v50, %v516_v41 }
 0x7a7   :  { %v523_v52 = vmul.f32 %v2860_v50, %v522_v51 }
 0x7a9   :  { %v524_v55 = vmul.f32 0.5, %v523_v52 }
 0x7ab   :  { %v525_v59 = vsub.f32 1.5, %v524_v55 }
 0x7ad   :  { %v526_v61 = vmul.f32 %v2860_v50, %v525_v59  ;;  %v3269_v50 = vld [vmem:[%s3860_s2 + $0x40] sm:$0xff] }
 0x7af   :  { %v527_v63 = vmul.f32 %v526_v61, %v516_v41 }
 0x7b1   :  { %v529_v3 = vsel %vm528_vm10, %v516_v41, %v527_v63 }
 0x7b2   :  { %v532_v4 = vsel %vm530_vm11, %v531_v1, %v529_v3 }
 0x7b3   :  { %v533_v5 = vadd.f32 1e-06, %v532_v4 }
 0x7b5   :  { %2861 = vrcp.f32 %v533_v5  ;;  %v545_v10 = vand.u32 2147483648, %v533_v5  ;;  %v543_v14 = vand.u32 2147483647, %v533_v5  ;;  %vm539_vm13 = vweird.f32 %v533_v5 }
 0x7b7   :  { %v546_v16 = vor.u32 1.1754944e-38, %v545_v10  ;;  %vm544_vm15 = vcmp.eq.f32.partialorder %v543_v14, 8.507059e+37 }
 0x7bb   :  { %v2862_v6 = vpop.eup %2861 }
 0x7bc   :  { %v535_v7 = vmul.f32 %v2862_v6, %v533_v5  ;;  %vm540_vm12 = vweird.f32 %v2862_v6 }
 0x7bd   :  { %vm541_vm14 = vmor %vm539_vm13, %vm540_vm12 }
 0x7be   :  { %v536_v9 = vsub.f32 1.0, %v535_v7  ;;  %v2812_v7 = vld [vmem:[%s3863_s5 + $0x6] ss:$0 sm:$0xff] }
 0x7c0   :  { %v537_v13 = vmul.f32 %v2862_v6, %v536_v9 }
 0x7c2   :  { %v538_v15 = vadd.f32 %v2862_v6, %v537_v13 }
 0x7c4   :  { %v542_v0 = vsel %vm541_vm14, %v2862_v6, %v538_v15 }
 0x7c5   :  { %v547_v26 = vsel %vm544_vm15, %v546_v16, %v542_v0  ;;  %v2813_v16 = vld [vmem:[%s3863_s5 + $0x7] ss:$0 sm:$0xff] }
 0x7c6   :  { %v548_v28 = vmul.f32 %v547_v26, %v520_v20  ;;  %v3284_v26 = vld [vmem:[%s3862_s4 + $0x2] sm:$0x3] }
 0x7c8   :  { %v552_v54 = vadd.f32 %v2810_v25, %v548_v28  ;;  %v728_v28 = vperm.slane %v3284_v26, 0 }
 0x7ca   :  { %2584 = vmatmul.msk.f32.vlgmr.msrb.gmra.mxu1 %vm61_vm0, %v552_v54 }
 0x847   :  { %v612_v35 = vpop.f32.mrf.mxu1 }
 0x848   :  { %v613_v36 = vadd.f32 %v612_v35, %v590_v34 }
 0x84a   :  { %v615_v37 = vmax.f32 %v613_v36, 0.0 }
 0x84c   :  { %2585 = vmatmul.msk.f32.vlgmr.msra.gmra.mxu3 %vm616_vm1, %v615_v37 }
 0x8cf   :  { %v637_v39 = vpop.f32.mrf.mxu3 }
 0x8d0   :  { %v640_v40 = vadd.f32 %v637_v39, %v3165_v17  ;;  %v3257_v17 = vld [vmem:[%s3860_s2 + $0x60] sm:$0xff] }
 0x8d1   :  { %746 = vmatpush.msra.mxu0 %v3257_v17 }
 0x8d2   :  { %v3242_v41 = vadd.f32 %v2811_v38, %v640_v40 }
 0x8d3   :  { %747 = vmatpush.msra.mxu0 %v3263_v49 }
 0x8d4   :  { %v681_v42 = vsel %vm61_vm0, %v3242_v41, 0.0 }
 0x8d5   :  { %682 = vadd.xlane.f32.xlu2 %v681_v42  ;;  %748 = vmatpush.msra.mxu0 %v3269_v50 }
 0x948   :  { %v683_v43 = vpop.xlane.xlu2 %682 }
 0x949   :  { %v684_v44 = vmul.f32 %v683_v43, %v3030_v8  ;;  %v3320_v43 = vld [vmem:[%s3858_s0 + $0x8] sm:$0xff] }
 0x94b   :  { %v685_v45 = vsub.f32 %v3242_v41, %v684_v44  ;;  %v1333_v44 = vsel %vm61_vm0, %v3320_v43, 0.0 }
 0x94d   :  { %v686_v46 = vmul.f32 %v685_v45, %v685_v45  ;;  %v694_v14 = vmul.f32 %v2812_v7, %v685_v45 }
 0x94f   :  { %v687_v47 = vsel %vm61_vm0, %v686_v46, 0.0 }
 0x950   :  { %688 = vadd.xlane.f32.xlu0 %v687_v47 }
 0x9c3   :  { %v689_v51 = vpop.xlane.xlu0 %688 }
 0x9c4   :  { %v690_v52 = vmul.f32 %v689_v51, %v3059_v24 }
 0x9c6   :  { %2863 = vrsqrt.f32 %v690_v52  ;;  %vm702_vm2 = vcmp.eq.f32.partialorder %v690_v52, inf  ;;  %v705_v53 = vand.u32 2147483648, %v690_v52  ;;  %vm704_vm3 = vcmp.eq.f32.partialorder %v690_v52, 0.0 }
 0x9cc   :  { %v2864_v55 = vpop.eup %2863 }
 0x9cd   :  { %v696_v56 = vmul.f32 %v2864_v55, %v690_v52 }
 0x9cf   :  { %v697_v57 = vmul.f32 %v2864_v55, %v696_v56 }
 0x9d1   :  { %v698_v58 = vmul.f32 0.5, %v697_v57 }
 0x9d3   :  { %v699_v59 = vsub.f32 1.5, %v698_v58 }
 0x9d5   :  { %v700_v60 = vmul.f32 %v2864_v55, %v699_v59 }
 0x9d7   :  { %v701_v61 = vmul.f32 %v700_v60, %v690_v52 }
 0x9d9   :  { %v703_v63 = vsel %vm702_vm2, %v690_v52, %v701_v61 }
 0x9da   :  { %v706_v1 = vsel %vm704_vm3, %v705_v53, %v703_v63 }
 0x9db   :  { %v707_v2 = vadd.f32 1e-06, %v706_v1 }
 0x9dd   :  { %2865 = vrcp.f32 %v707_v2  ;;  %v719_v6 = vand.u32 2147483648, %v707_v2  ;;  %v717_v10 = vand.u32 2147483647, %v707_v2  ;;  %vm713_vm5 = vweird.f32 %v707_v2 }
 0x9df   :  { %v720_v13 = vor.u32 1.1754944e-38, %v719_v6  ;;  %vm718_vm7 = vcmp.eq.f32.partialorder %v717_v10, 8.507059e+37 }
 0x9e3   :  { %v2866_v3 = vpop.eup %2865 }
 0x9e4   :  { %v709_v4 = vmul.f32 %v2866_v3, %v707_v2  ;;  %vm714_vm4 = vweird.f32 %v2866_v3 }
 0x9e5   :  { %vm715_vm6 = vmor %vm713_vm5, %vm714_vm4 }
 0x9e6   :  { %v710_v5 = vsub.f32 1.0, %v709_v4 }
 0x9e8   :  { %v711_v9 = vmul.f32 %v2866_v3, %v710_v5 }
 0x9ea   :  { %v712_v12 = vadd.f32 %v2866_v3, %v711_v9 }
 0x9ec   :  { %v716_v15 = vsel %vm715_vm6, %v2866_v3, %v712_v12 }
 0x9ed   :  { %v721_v20 = vsel %vm718_vm7, %v720_v13, %v716_v15 }
 0x9ee   :  { %v722_v0 = vmul.f32 %v721_v20, %v694_v14 }
 0x9f0   :  { %v726_v25 = vadd.f32 %v2813_v16, %v722_v0 }
 0x9f2   :  { %2613 = vmatmul.msk.f32.vlgmr.msra.gmra.mxu0 %vm61_vm0, %v726_v25 }
 0xa6f   :  { %v750_v54 = vpop.f32.mrf.mxu0 }
 0xa70   :  { %v3289_v30 = vadd.f32 %v750_v54, %v728_v28 }
 0xa72   :  { %791 = vrot.lane.b32.xlu0 %v3289_v30, %s2977_s21  ;;  %754 = vrot.lane.b32.xlu1 %v3289_v30, %s2974_s14 }
 0xa7a   :  { %1019 = vrot.lane.b32.xlu0 %v3289_v30, %s2975_s15 }
 0xa82   :  { %817 = vrot.lane.b32.xlu0 %v3289_v30, %s2978_s22 }
 0xa8a   :  { %928 = vrot.lane.b32.xlu0 %v3289_v30, %s2980_s24 }
 0xae4   :  { %v792_v31 = vpop.permute.xlu0 %791  ;;  %v755_v32 = vpop.permute.xlu1 %754 }
 0xae5   :  { %2614 = vmatpush.xpose.msk.msra.mxu2 %vm151_vm9, %v755_v32  ;;  %812 = vmatpush.msra.mxu1 %v792_v31 }
 0xae8   :  { %2615 = vmatmul.msk.f32.vlgmr.msra.gmra.mxu2 %vm151_vm9, %v3289_v30 }
 0xaec   :  { %v1020_v33 = vpop.permute.xlu0 %1019 }
 0xaed   :  { %2626 = vmatpush.xpose.msk.msra.mxu3 %vm151_vm9, %v1020_v33 }
 0xaf4   :  { %v818_v52 = vpop.permute.xlu0 %817 }
 0xafc   :  { %v929_v56 = vpop.permute.xlu0 %928 }
 0xb6b   :  { %v777_v34 = vpop.f32.mrf.mxu2 }
 0xb6c   :  { %v778_v35 = vadd.f32 %v3099_v62, %v777_v34 }
 0xb6e   :  { %v780_v36 = vsel %vm151_vm9, %v778_v35, -inf }
 0xb6f   :  { %781 = vmax.xlane.f32.xlu1 %v780_v36 }
 0xb88   :  { %1017 = vrot.lane.b32.xlu1 %v3289_v30, %s2979_s23 }
 0xbe2   :  { %v782_v37 = vpop.xlane.xlu1 %781 }
 0xbe3   :  { %v783_v38 = vsub.f32 %v778_v35, %v782_v37 }
 0xbe5   :  { %v784_v39 = vmul.f32 1.442695, %v783_v38 }
 0xbe7   :  { %2867 = vpow2.f32 %v784_v39 }
 0xbed   :  { %v2868_v40 = vpop.eup %2867 }
 0xbee   :  { %v786_v42 = vsel %vm151_vm9, %v2868_v40, 0.0 }
 0xbef   :  { %787 = vadd.xlane.f32.xlu2 %v786_v42 }
 0xbfa   :  { %v1018_v2 = vpop.permute.xlu1 %1017 }
 0xc07   :  { %819 = vrot.lane.b32.xlu2 %v3289_v30, %s2973_s13 }
 0xc0f   :  { %930 = vrot.lane.b32.xlu2 %v3289_v30, %s2976_s16 }
 0xc38   :  { %1334 = vadd.xlane.f32.xlu2 %v1333_v44 }
 0xc62   :  { %v788_v45 = vpop.xlane.xlu2 %787 }
 0xc63   :  { %2869 = vrcp.f32 %v788_v45 }
 0xc69   :  { %v2870_v46 = vpop.eup %2869 }
 0xc6a   :  { %v790_v47 = vmul.f32 %v2870_v46, %v2868_v40  ;;  %v820_v51 = vpop.permute.xlu2 %819 }
 0xc6b   :  { %2617 = vmatpush.xpose.msk.msrb.mxu0 %vm151_vm9, %v820_v51 }
 0xc6c   :  { %2616 = vmatmul.msk.f32.vlgmr.msra.gmra.mxu1 %vm151_vm9, %v790_v47 }
 0xc6e   :  { %2618 = vmatmul.msk.f32.vlgmr.msrb.gmra.mxu0 %vm151_vm9, %v818_v52 }
 0xc72   :  { %v931_v55 = vpop.permute.xlu2 %930 }
 0xc73   :  { %2622 = vmatpush.xpose.msk.msra.mxu0 %vm151_vm9, %v931_v55 }
 0xc76   :  { %2623 = vmatmul.msk.f32.vlgmr.msra.gmra.mxu0 %vm151_vm9, %v929_v56 }
 0xcab   :  { %v1335_v57 = vpop.xlane.xlu2 %1334 }
 0xcac   :  { %v1336_v58 = vmul.f32 %v1335_v57, %v3030_v8 }
 0xcae   :  { %v3333_v53 = vsub.f32 %v3320_v43, %v1336_v58  ;;  %v2601_v58 = vld [vmem:[%s3861_s3 + $0x68] sm:$0xff] }
 0xcaf   :  { %900 = vmatpush.msrb.mxu1 %v2601_v58  ;;  %v2593_v58 = vld [vmem:[%s3860_s2 + $0x48] sm:$0xff] }
 0xcb0   :  { %v1338_v1 = vmul.f32 %v3333_v53, %v3333_v53 }
 0xcb2   :  { %v1339_v5 = vsel %vm61_vm0, %v1338_v1, 0.0 }
 0xce9   :  { %v814_v59 = vpop.f32.mrf.mxu1 }
 0xcea   :  { %2621 = vmatmul.msk.f32.vlgmr.msrb.gmra.mxu3 %vm151_vm9, %v814_v59 }
 0xceb   :  { %v842_v60 = vpop.f32.mrf.mxu0 }
 0xcec   :  { %v843_v61 = vadd.f32 %v3099_v62, %v842_v60 }
 0xcee   :  { %v845_v63 = vsel %vm151_vm9, %v843_v61, -inf }
 0xcef   :  { %846 = vmax.xlane.f32.xlu0 %v845_v63 }
 0xcf2   :  { %2627 = vmatmul.msk.f32.vlgmr.msra.gmra.mxu3 %vm151_vm9, %v1018_v2 }
 0xcf3   :  { %v953_v3 = vpop.f32.mrf.mxu0 }
 0xcf4   :  { %v954_v4 = vadd.f32 %v3099_v62, %v953_v3 }
 0xcf6   :  { %v956_v6 = vsel %vm151_vm9, %v954_v4, -inf }
 0xcf7   :  { %957 = vmax.xlane.f32.xlu2 %v956_v6  ;;  %1340 = vadd.xlane.f32.xlu0 %v1339_v5  ;;  %v2602_v6 = vld [vmem:[%s3861_s3 + $0x70] sm:$0xff] }
 0xcf8   :  { %1011 = vmatpush.msra.mxu1 %v2602_v6 }
 0xd62   :  { %v847_v7 = vpop.xlane.xlu0 %846 }
 0xd63   :  { %v848_v9 = vsub.f32 %v843_v61, %v847_v7 }
 0xd65   :  { %v849_v10 = vmul.f32 1.442695, %v848_v9 }
 0xd67   :  { %2871 = vpow2.f32 %v849_v10 }
 0xd6a   :  { %v958_v12 = vpop.xlane.xlu2 %957  ;;  %v1341_v46 = vpop.xlane.xlu0 %1340 }
 0xd6b   :  { %v959_v16 = vsub.f32 %v954_v4, %v958_v12  ;;  %v1342_v47 = vmul.f32 %v1341_v46, %v3059_v24 }
 0xd6d   :  { %v2872_v13 = vpop.eup %2871  ;;  %v3342_v14 = vpop.f32.mrf.mxu3  ;;  %v960_v20 = vmul.f32 1.442695, %v959_v16  ;;  %vm1354_vm8 = vcmp.eq.f32.partialorder %v1342_v47, inf  ;;  %vm1356_vm10 = vcmp.eq.f32.partialorder %v1342_v47, 0.0 }
 0xd6e   :  { %v851_v15 = vsel %vm151_vm9, %v2872_v13, 0.0 }
 0xd6f   :  { %852 = vadd.xlane.f32.xlu2 %v851_v15  ;;  %2873 = vpow2.f32 %v960_v20  ;;  %v2814_v15 = vld [vmem:[%s3863_s5] ss:$0 sm:$0xff] }
 0xd75   :  { %v1042_v0 = vpop.f32.mrf.mxu3  ;;  %v2874_v29 = vpop.eup %2873 }
 0xd76   :  { %v1043_v25 = vadd.f32 %v3099_v62, %v1042_v0  ;;  %v962_v31 = vsel %vm151_vm9, %v2874_v29, 0.0 }
 0xd78   :  { %v1045_v54 = vsel %vm151_vm9, %v1043_v25, -inf }
 0xd79   :  { %1046 = vmax.xlane.f32.xlu1 %v1045_v54 }
 0xd81   :  { %963 = vadd.xlane.f32.xlu1 %v962_v31 }
 0xd87   :  { %856 = vrot.lane.b32.xlu2 %v3289_v30, %s2982_s26 }
 0xd9a   :  { %967 = vrot.lane.b32.xlu1 %v3289_v30, %s2981_s25 }
 0xde2   :  { %v853_v32 = vpop.xlane.xlu2 %852 }
 0xde3   :  { %2875 = vrcp.f32 %v853_v32 }
 0xde9   :  { %v2876_v33 = vpop.eup %2875 }
 0xdea   :  { %v855_v34 = vmul.f32 %v2876_v33, %v2872_v13  ;;  %v857_v35 = vpop.permute.xlu2 %856  ;;  %v2815_v33 = vld [vmem:[%s3863_s5 + $0x1] ss:$0 sm:$0xff] }
 0xdeb   :  { %877 = vmatpush.msrb.mxu2 %v857_v35 }
 0xdec   :  { %2619 = vmatmul.msk.f32.vlgmr.msrb.gmra.mxu2 %vm151_vm9, %v855_v34  ;;  %v1047_v62 = vpop.xlane.xlu1 %1046 }
 0xded   :  { %v1048_v36 = vsub.f32 %v1043_v25, %v1047_v62  ;;  %v1346_v25 = vmul.f32 %v2814_v15, %v3333_v53 }
 0xdef   :  { %v1049_v37 = vmul.f32 1.442695, %v1048_v36 }
 0xdf1   :  { %2877 = vpow2.f32 %v1049_v37 }
 0xdf4   :  { %v964_v40 = vpop.xlane.xlu1 %963 }
 0xdf5   :  { %2879 = vrcp.f32 %v964_v40 }
 0xdf6   :  { %2881 = vrsqrt.f32 %v1342_v47 }
 0xdf7   :  { %v2878_v38 = vpop.eup %2877 }
 0xdf8   :  { %v1051_v39 = vsel %vm151_vm9, %v2878_v38, 0.0 }
 0xdf9   :  { %1052 = vadd.xlane.f32.xlu0 %v1051_v39 }
 0xdfb   :  { %v2880_v42 = vpop.eup %2879 }
 0xdfc   :  { %v966_v44 = vmul.f32 %v2880_v42, %v2874_v29  ;;  %v2882_v51 = vpop.eup %2881 }
 0xdfd   :  { %v1348_v52 = vmul.f32 %v2882_v51, %v1342_v47 }
 0xdff   :  { %v1349_v55 = vmul.f32 %v2882_v51, %v1348_v52  ;;  %v3413_v52 = vld [vmem:[%s3859_s1 + $0x1] ss:$0 sm:$0xff] }
 0xe01   :  { %v1350_v56 = vmul.f32 0.5, %v1349_v55 }
 0xe03   :  { %v1351_v57 = vsub.f32 1.5, %v1350_v56 }
 0xe05   :  { %v1352_v59 = vmul.f32 %v2882_v51, %v1351_v57 }
 0xe07   :  { %v1353_v60 = vmul.f32 %v1352_v59, %v1342_v47  ;;  %v2760_v59 = vpack.i.bf16 %v2593_v58, %v3269_v50  ;;  %v1157_v50 = vperm.slane %v3284_v26, 1 }
 0xe09   :  { %v1355_v61 = vsel %vm1354_vm8, %v1342_v47, %v1353_v60 }
 0xe0c   :  { %v968_v45 = vpop.permute.xlu1 %967 }
 0xe0d   :  { %1056 = vrot.lane.b32.xlu0 %v3289_v30, %s2983_s27  ;;  %988 = vmatpush.msra.mxu2 %v968_v45  ;;  %v1357_v30 = vand.u32 2147483648, %v1342_v47  ;;  %v2816_v45 = vld [vmem:[%s3863_s5 + $0x8] ss:$0 sm:$0xff] }
 0xe0e   :  { %2624 = vmatmul.msk.f32.vlgmr.msra.gmra.mxu2 %vm151_vm9, %v966_v44 }
 0xe0f   :  { %v1358_v63 = vsel %vm1356_vm10, %v1357_v30, %v1355_v61  ;;  %v2597_v61 = vld [vmem:[%s3860_s2 + $0x68] sm:$0xff] }
 0xe10   :  { %v1359_v1 = vadd.f32 1e-06, %v1358_v63 }
 0xe12   :  { %2883 = vrcp.f32 %v1359_v1  ;;  %vm1365_vm11 = vweird.f32 %v1359_v1  ;;  %v1371_v10 = vand.u32 2147483648, %v1359_v1  ;;  %v1369_v13 = vand.u32 2147483647, %v1359_v1 }
 0xe14   :  { %v1372_v20 = vor.u32 1.1754944e-38, %v1371_v10  ;;  %vm1370_vm14 = vcmp.eq.f32.partialorder %v1369_v13, 8.507059e+37 }
 0xe18   :  { %v2884_v2 = vpop.eup %2883 }
 0xe19   :  { %v1361_v3 = vmul.f32 %v2884_v2, %v1359_v1  ;;  %vm1366_vm12 = vweird.f32 %v2884_v2 }
 0xe1a   :  { %vm1367_vm13 = vmor %vm1365_vm11, %vm1366_vm12 }
 0xe1b   :  { %v1362_v5 = vsub.f32 1.0, %v1361_v3  ;;  %v2595_v3 = vld [vmem:[%s3860_s2 + $0x58] sm:$0xff] }
 0xe1d   :  { %v1363_v9 = vmul.f32 %v2884_v2, %v1362_v5 }
 0xe1f   :  { %v1364_v12 = vadd.f32 %v2884_v2, %v1363_v9 }
 0xe21   :  { %v1368_v0 = vsel %vm1367_vm13, %v2884_v2, %v1364_v12 }
 0xe22   :  { %v1373_v31 = vsel %vm1370_vm14, %v1372_v20, %v1368_v0 }
 0xe23   :  { %v1374_v32 = vmul.f32 %v1373_v31, %v1346_v25 }
 0xe25   :  { %v1378_v34 = vadd.f32 %v2815_v33, %v1374_v32 }
 0xe6c   :  { %v1053_v7 = vpop.xlane.xlu0 %1052 }
 0xe6d   :  { %2885 = vrcp.f32 %v1053_v7 }
 0xe6f   :  { %v879_v4 = vpop.f32.mrf.mxu2 }
 0xe70   :  { %2620 = vmatmul.msk.f32.vlgmr.msrb.gmra.mxu1 %vm151_vm9, %v879_v4 }
 0xe73   :  { %v2886_v16 = vpop.eup %2885 }
 0xe74   :  { %v1055_v54 = vmul.f32 %v2886_v16, %v2878_v38 }
 0xe7f   :  { %v1057_v29 = vpop.permute.xlu0 %1056 }
 0xe80   :  { %1077 = vmatpush.msrb.mxu0 %v1057_v29 }
 0xe81   :  { %2628 = vmatmul.msk.f32.vlgmr.msrb.gmra.mxu0 %vm151_vm9, %v1055_v54 }
 0xe82   :  { %1397 = vmatpush.msra.mxu0 %v3038_v18  ;;  %v3382_v18 = vld [vmem:[%s3861_s3 + $0x78] sm:$0xff] }
 0xe83   :  { %1100 = vmatpush.msrb.mxu2 %v3382_v18 }
 0xe84   :  { %1398 = vmatpush.msra.mxu0 %v3043_v19  ;;  %v3389_v19 = vld [vmem:[%s3862_s4] sm:$0x3] }
 0xe86   :  { %1399 = vmatpush.msra.mxu0 %v3049_v21  ;;  %v1380_v21 = vperm.slane %v3389_v19, 0 }
 0xe88   :  { %1400 = vmatpush.msra.mxu0 %v3055_v22 }
 0xe89   :  { %2641 = vmatmul.msk.f32.vlgmr.msra.gmra.mxu0 %vm61_vm0, %v1378_v34 }
 0xe91   :  { %v990_v53 = vpop.f32.mrf.mxu2 }
 0xe92   :  { %2625 = vmatmul.msk.f32.vlgmr.msra.gmra.mxu1 %vm151_vm9, %v990_v53 }
 0xeed   :  { %v902_v37 = vpop.f32.mrf.mxu1 }
 0xeee   :  { %v926_v39 = vadd.f32 %v3342_v14, %v902_v37 }
 0xefe   :  { %v1079_v35 = vpop.f32.mrf.mxu0 }
 0xeff   :  { %2629 = vmatmul.msk.f32.vlgmr.msrb.gmra.mxu2 %vm151_vm9, %v1079_v35 }
 0xf06   :  { %v1402_v22 = vpop.f32.mrf.mxu0 }
 0xf07   :  { %v3394_v62 = vadd.f32 %v1402_v22, %v1380_v21 }
 0xf09   :  { %1406 = vrot.lane.b32.xlu2 %v3394_v62, %s2974_s14 }
 0xf0f   :  { %v1013_v38 = vpop.f32.mrf.mxu1 }
 0xf10   :  { %v1016_v40 = vadd.f32 %v1013_v38, %v926_v39 }
 0xf63   :  { %v1407_v36 = vpop.permute.xlu2 %1406 }
 0xf64   :  { %2642 = vmatpush.xpose.msk.msra.mxu2 %vm151_vm9, %v1407_v36 }
 0xf67   :  { %2643 = vmatmul.msk.f32.vlgmr.msra.gmra.mxu2 %vm151_vm9, %v3394_v62 }
 0xf82   :  { %v1102_v42 = vpop.f32.mrf.mxu2 }
 0xf83   :  { %v1105_v44 = vadd.f32 %v1102_v42, %v1016_v40 }
 0xf85   :  { %v1106_v46 = vadd.f32 %v1105_v44, %v3242_v41  ;;  %v3420_v41 = vld [vmem:[%s3860_s2 + $0x78] sm:$0xff] }
 0xf86   :  { %v2745_v57 = vpack.i.bf16 %v3420_v41, %v3252_v48  ;;  %v2750_v48 = vpack.i.bf16 %v2597_v61, %v3257_v17  ;;  %v2755_v17 = vpack.i.bf16 %v2595_v3, %v3263_v49 }
 0xf87   :  { %v3406_v47 = vadd.f32 %v2816_v45, %v1106_v46 }
 0xf89   :  { %v1111_v51 = vsel %vm61_vm0, %v3406_v47, 0.0 }
 0xf8a   :  { %1112 = vadd.xlane.f32.xlu0 %v1111_v51 }
 0xf9e   :  { %2746 = vrot.lane.b32.xlu0 %v2745_v57, %s2984_s18 }
 0xfa6   :  { %2761 = vrot.lane.b32.xlu0 %v2760_v59, %s2984_s18 }
 0xfea   :  { %v1429_v14 = vpop.f32.mrf.mxu2 }
 0xfeb   :  { %v1430_v55 = vadd.f32 %v3413_v52, %v1429_v14 }
 0xfed   :  { %v1432_v56 = vsel %vm151_vm9, %v1430_v55, -inf }
 0xfee   :  { %1433 = vmax.xlane.f32.xlu2 %v1432_v56 }
 0xffd   :  { %v1113_v60 = vpop.xlane.xlu0 %1112 }
 0xffe   :  { %v1114_v30 = vmul.f32 %v1113_v60, %v3030_v8  ;;  %v2818_v60 = vld [vmem:[%s3863_s5 + $0x9] ss:$0 sm:$0xff] }
0x1000   :  { %v3434_v63 = vsub.f32 %v3406_v47, %v1114_v30 }
0x1002   :  { %v1116_v1 = vmul.f32 %v3434_v63, %v3434_v63  ;;  %v1124_v3 = vmul.f32 %v2818_v60, %v3434_v63 }
0x1004   :  { %v1117_v2 = vsel %vm61_vm0, %v1116_v1, 0.0 }
0x1005   :  { %1118 = vadd.xlane.f32.xlu1 %v1117_v2 }
0x1006   :  { %2751 = vrot.lane.b32.xlu2 %v2750_v48, %s2984_s18 }
0x100e   :  { %1443 = vrot.lane.b32.xlu2 %v3394_v62, %s2977_s21 }
0x1010   :  { %v2747_v7 = vpop.permute.xlu0 %2746 }
0x1011   :  { %v2749_v12 = vunpack.i.h.bf16 %v2747_v7  ;;  %v2748_v13 = vunpack.i.l.bf16 %v2747_v7 }
0x1013   :  { %v1185_v15 = vsel %vm61_vm0, %v2748_v13, %v2749_v12  ;;  %v3495_v12 = vld [vmem:[%s3861_s3 + $0xb0] sm:$0xff]  ;;  %v3501_v13 = vld [vmem:[%s3861_s3 + $0xa8] sm:$0xff] }
0x1014   :  { %1211 = vmatpush.msrb.mxu1 %v1185_v15  ;;  %v3507_v15 = vld [vmem:[%s3861_s3 + $0xa0] sm:$0xff] }
0x1016   :  { %1192 = vrot.lane.b32.xlu2 %v1157_v50, %s2984_s18 }
0x1018   :  { %v2762_v35 = vpop.permute.xlu0 %2761 }
0x1019   :  { %v2764_v38 = vunpack.i.h.bf16 %v2762_v35  ;;  %v2763_v39 = vunpack.i.l.bf16 %v2762_v35 }
0x101b   :  { %v1182_v51 = vsel %vm61_vm0, %v2763_v39, %v2764_v38 }
0x101e   :  { %1469 = vrot.lane.b32.xlu2 %v3394_v62, %s2978_s22  ;;  %2756 = vrot.lane.b32.xlu1 %v2755_v17, %s2984_s18 }
0x1026   :  { %1669 = vrot.lane.b32.xlu2 %v3394_v62, %s2979_s23  ;;  %1190 = vrot.lane.b32.xlu1 %v728_v28, %s2984_s18 }
0x102e   :  { %1580 = vrot.lane.b32.xlu2 %v3394_v62, %s2980_s24  ;;  %1471 = vrot.lane.b32.xlu1 %v3394_v62, %s2973_s13 }
0x1036   :  { %1671 = vrot.lane.b32.xlu1 %v3394_v62, %s2975_s15 }
0x103e   :  { %1582 = vrot.lane.b32.xlu1 %v3394_v62, %s2976_s16 }
0x1061   :  { %v1434_v49 = vpop.xlane.xlu2 %1433 }
0x1062   :  { %v1435_v4 = vsub.f32 %v1430_v55, %v1434_v49  ;;  %v2819_v49 = vld [vmem:[%s3863_s5 + $0xa] ss:$0 sm:$0xff] }
0x1064   :  { %v1436_v5 = vmul.f32 1.442695, %v1435_v4 }
0x1066   :  { %2887 = vpow2.f32 %v1436_v5 }
0x1069   :  { %v2752_v26 = vpop.permute.xlu2 %2751 }
0x106a   :  { %v2754_v9 = vunpack.i.h.bf16 %v2752_v26  ;;  %v2753_v10 = vunpack.i.l.bf16 %v2752_v26 }
0x106c   :  { %v3466_v6 = vpop.eup %2887  ;;  %v1184_v16 = vsel %vm61_vm0, %v2753_v10, %v2754_v9  ;;  %v3490_v10 = vld [vmem:[%s3861_s3 + $0xb8] sm:$0xff] }
0x106d   :  { %v1438_v28 = vsel %vm151_vm9, %v3466_v6, 0.0  ;;  %1212 = vmatpush.msrb.mxu1 %v1184_v16  ;;  %1231 = vmatpush.msrb.mxu3 %v3490_v10  ;;  %v3513_v16 = vld [vmem:[%s3861_s3 + $0x98] sm:$0xff] }
0x106e   :  { %1439 = vadd.xlane.f32.xlu0 %v1438_v28 }
0x106f   :  { %1232 = vmatpush.msrb.mxu3 %v3495_v12 }
0x1071   :  { %v1444_v34 = vpop.permute.xlu2 %1443  ;;  %1233 = vmatpush.msrb.mxu3 %v3501_v13 }
0x1073   :  { %1234 = vmatpush.msrb.mxu3 %v3507_v15 }
0x1075   :  { %1235 = vmatpush.msrb.mxu3 %v3513_v16 }
0x1078   :  { %v1119_v20 = vpop.xlane.xlu1 %1118 }
0x1079   :  { %v1120_v0 = vmul.f32 %v1119_v20, %v3059_v24  ;;  %v1193_v14 = vpop.permute.xlu2 %1192 }
0x107b   :  { %2889 = vrsqrt.f32 %v1120_v0  ;;  %vm1132_vm15 = vcmp.eq.f32.partialorder %v1120_v0, inf  ;;  %v1135_v22 = vand.u32 2147483648, %v1120_v0  ;;  %vm1134_vm2 = vcmp.eq.f32.partialorder %v1120_v0, 0.0 }
0x1081   :  { %v2890_v25 = vpop.eup %2889  ;;  %v1470_v48 = vpop.permute.xlu2 %1469 }
0x1082   :  { %v1126_v54 = vmul.f32 %v2890_v25, %v1120_v0 }
0x1084   :  { %v1127_v29 = vmul.f32 %v2890_v25, %v1126_v54  ;;  %v3522_v54 = vld [vmem:[%s3861_s3 + $0x90] sm:$0xff] }
0x1085   :  { %1236 = vmatpush.msrb.mxu3 %v3522_v54 }
0x1086   :  { %v1128_v31 = vmul.f32 0.5, %v1127_v29  ;;  %v3528_v29 = vld [vmem:[%s3861_s3 + $0x88] sm:$0xff] }
0x1087   :  { %1237 = vmatpush.msrb.mxu3 %v3528_v29 }
0x1088   :  { %v1129_v32 = vsub.f32 1.5, %v1128_v31  ;;  %v1320_v31 = vld [vmem:[%s3861_s3] sm:$0xff] }
0x1089   :  { %v1670_v7 = vpop.permute.xlu2 %1669 }
0x108a   :  { %v1130_v33 = vmul.f32 %v2890_v25, %v1129_v32 }
0x108c   :  { %v1131_v53 = vmul.f32 %v1130_v33, %v1120_v0 }
0x108e   :  { %v1133_v36 = vsel %vm1132_vm15, %v1120_v0, %v1131_v53 }
0x108f   :  { %v1136_v37 = vsel %vm1134_vm2, %v1135_v22, %v1133_v36 }
0x1090   :  { %v1137_v40 = vadd.f32 1e-06, %v1136_v37  ;;  %v2757_v42 = vpop.permute.xlu1 %2756 }
0x1091   :  { %v2759_v44 = vunpack.i.h.bf16 %v2757_v42  ;;  %v2758_v45 = vunpack.i.l.bf16 %v2757_v42  ;;  %v1581_v63 = vpop.permute.xlu2 %1580 }
0x1092   :  { %2891 = vrcp.f32 %v1137_v40  ;;  %v1149_v59 = vand.u32 2147483648, %v1137_v40  ;;  %v1147_v61 = vand.u32 2147483647, %v1137_v40  ;;  %vm1143_vm4 = vweird.f32 %v1137_v40 }
0x1093   :  { %v1183_v46 = vsel %vm61_vm0, %v2758_v45, %v2759_v44 }
0x1094   :  { %1213 = vmatpush.msrb.mxu1 %v1183_v46  ;;  %v1150_v50 = vor.u32 1.1754944e-38, %v1149_v59  ;;  %vm1148_vm6 = vcmp.eq.f32.partialorder %v1147_v61, 8.507059e+37 }
0x1096   :  { %1214 = vmatpush.msrb.mxu1 %v1182_v51 }
0x1098   :  { %1464 = vmatpush.msra.mxu1 %v1444_v34  ;;  %v2892_v55 = vpop.eup %2891  ;;  %v1191_v56 = vpop.permute.xlu1 %1190 }
0x1099   :  { %v1139_v57 = vmul.f32 %v2892_v55, %v1137_v40  ;;  %vm1144_vm3 = vweird.f32 %v2892_v55  ;;  %v1194_v34 = vsel %vm61_vm0, %v1191_v56, %v1193_v14 }
0x109a   :  { %vm1145_vm5 = vmor %vm1143_vm4, %vm1144_vm3 }
0x109b   :  { %v1140_v58 = vsub.f32 1.0, %v1139_v57 }
0x109d   :  { %v1141_v30 = vmul.f32 %v2892_v55, %v1140_v58 }
0x109f   :  { %v1142_v1 = vadd.f32 %v2892_v55, %v1141_v30 }
0x10a0   :  { %v1472_v2 = vpop.permute.xlu1 %1471 }
0x10a1   :  { %2645 = vmatpush.xpose.msk.msrb.mxu0 %vm151_vm9, %v1472_v2  ;;  %v1146_v17 = vsel %vm1145_vm5, %v2892_v55, %v1142_v1 }
0x10a2   :  { %v1151_v4 = vsel %vm1148_vm6, %v1150_v50, %v1146_v17 }
0x10a3   :  { %v1152_v5 = vmul.f32 %v1151_v4, %v1124_v3 }
0x10a4   :  { %2646 = vmatmul.msk.f32.vlgmr.msrb.gmra.mxu0 %vm151_vm9, %v1470_v48 }
0x10a5   :  { %v1156_v26 = vadd.f32 %v2819_v49, %v1152_v5 }
0x10a7   :  { %2630 = vmatmul.msk.f32.vlgmr.msrb.gmra.mxu1 %vm61_vm0, %v1156_v26 }
0x10a8   :  { %v1672_v28 = vpop.permute.xlu1 %1671 }
0x10b0   :  { %v1583_v9 = vpop.permute.xlu1 %1582 }
0x10b1   :  { %2650 = vmatpush.xpose.msk.msra.mxu0 %vm151_vm9, %v1583_v9 }
0x10b4   :  { %2651 = vmatmul.msk.f32.vlgmr.msra.gmra.mxu0 %vm151_vm9, %v1581_v63 }
0x10e1   :  { %v1440_v20 = vpop.xlane.xlu0 %1439 }
0x10e2   :  { %2893 = vrcp.f32 %v1440_v20  ;;  %v1321_v20 = vld [vmem:[%s3861_s3 + $0x8] sm:$0xff] }
0x10e3   :  { %1552 = vmatpush.msrb.mxu1 %v1321_v20 }
0x10e8   :  { %v2894_v0 = vpop.eup %2893 }
0x10e9   :  { %v1442_v25 = vmul.f32 %v2894_v0, %v3466_v6  ;;  %v3534_v6 = vld [vmem:[%s3861_s3 + $0x80] sm:$0xff] }
0x10ea   :  { %1238 = vmatpush.msrb.mxu3 %v3534_v6 }
0x10eb   :  { %2644 = vmatmul.msk.f32.vlgmr.msra.gmra.mxu1 %vm151_vm9, %v1442_v25  ;;  %v1322_v25 = vld [vmem:[%s3861_s3 + $0x10] sm:$0xff] }
0x10ec   :  { %1575 = vmatpush.msra.mxu3 %v1320_v31  ;;  %1663 = vmatpush.msra.mxu1 %v1322_v25  ;;  %v1809_v25 = vperm.slane %v3389_v19, 1 }
0x1121   :  { %v1494_v32 = vpop.f32.mrf.mxu0 }
0x1122   :  { %v1495_v33 = vadd.f32 %v3413_v52, %v1494_v32 }
0x1124   :  { %v1216_v53 = vpop.f32.mrf.mxu1  ;;  %v1497_v35 = vsel %vm151_vm9, %v1495_v33, -inf }
0x1125   :  { %v1217_v22 = vadd.f32 %v1216_v53, %v1194_v34  ;;  %1498 = vmax.xlane.f32.xlu1 %v1497_v35  ;;  %v1323_v53 = vld [vmem:[%s3861_s3 + $0x18] sm:$0xff] }
0x1127   :  { %v1219_v36 = vmax.f32 %v1217_v22, 0.0 }
0x1129   :  { %2631 = vmatmul.msk.f32.vlgmr.msrb.gmra.mxu3 %vm616_vm1, %v1219_v36 }
0x112a   :  { %2654 = vmatpush.xpose.msk.msrb.mxu3 %vm151_vm9, %v1672_v28 }
0x1131   :  { %v1605_v37 = vpop.f32.mrf.mxu0 }
0x1132   :  { %v1606_v38 = vadd.f32 %v3413_v52, %v1605_v37 }
0x1134   :  { %v1608_v39 = vsel %vm151_vm9, %v1606_v38, -inf }
0x1135   :  { %1609 = vmax.xlane.f32.xlu2 %v1608_v39 }
0x114d   :  { %1619 = vrot.lane.b32.xlu2 %v3394_v62, %s2981_s25 }
0x1168   :  { %v1466_v40 = vpop.f32.mrf.mxu1 }
0x1169   :  { %2649 = vmatmul.msk.f32.vlgmr.msra.gmra.mxu3 %vm151_vm9, %v1466_v40 }
0x1171   :  { %2655 = vmatmul.msk.f32.vlgmr.msrb.gmra.mxu3 %vm151_vm9, %v1670_v7 }
0x1198   :  { %v1499_v44 = vpop.xlane.xlu1 %1498 }
0x1199   :  { %v1500_v46 = vsub.f32 %v1495_v33, %v1499_v44  ;;  %v2820_v44 = vld [vmem:[%s3863_s5 + $0x2] ss:$0 sm:$0xff] }
0x119b   :  { %v1501_v51 = vmul.f32 1.442695, %v1500_v46 }
0x119d   :  { %2895 = vpow2.f32 %v1501_v51 }
0x11a3   :  { %v2896_v60 = vpop.eup %2895 }
0x11a4   :  { %v1503_v30 = vsel %vm151_vm9, %v2896_v60, 0.0 }
0x11a8   :  { %v1610_v14 = vpop.xlane.xlu2 %1609 }
0x11a9   :  { %v1611_v57 = vsub.f32 %v1606_v38, %v1610_v14 }
0x11ab   :  { %v1612_v59 = vmul.f32 1.442695, %v1611_v57 }
0x11ac   :  { %v3551_v42 = vpop.f32.mrf.mxu3 }
0x11ad   :  { %2897 = vpow2.f32 %v1612_v59 }
0x11b0   :  { %v1620_v7 = vpop.permute.xlu2 %1619 }
0x11b3   :  { %v2898_v61 = vpop.eup %2897 }
0x11b4   :  { %v1614_v48 = vsel %vm151_vm9, %v2898_v61, 0.0 }
0x11ec   :  { %v1577_v45 = vpop.f32.mrf.mxu3 }
0x11f4   :  { %v1694_v55 = vpop.f32.mrf.mxu3 }
0x11f5   :  { %v1695_v56 = vadd.f32 %v3413_v52, %v1694_v55  ;;  %v2943_v55 = vld [vmem:[%s3860_s2 + $0x30] sm:$0xff] }
0x11f7   :  { %v1697_v58 = vsel %vm151_vm9, %v1695_v56, -inf }
0x11f8   :  { %1698 = vmax.xlane.f32.xlu0 %v1697_v58 }
0x1200   :  { %1504 = vadd.xlane.f32.xlu0 %v1503_v30 }
0x1208   :  { %1615 = vadd.xlane.f32.xlu0 %v1614_v48 }
0x121c   :  { %1508 = vrot.lane.b32.xlu0 %v3394_v62, %s2982_s26 }
0x126b   :  { %v1699_v1 = vpop.xlane.xlu0 %1698 }
0x126c   :  { %v1700_v2 = vsub.f32 %v1695_v56, %v1699_v1 }
0x126e   :  { %v1701_v50 = vmul.f32 1.442695, %v1700_v2 }
0x1270   :  { %2899 = vpow2.f32 %v1701_v50 }
0x1273   :  { %v1505_v49 = vpop.xlane.xlu0 %1504 }
0x1274   :  { %2901 = vrcp.f32 %v1505_v49 }
0x1276   :  { %v2900_v3 = vpop.eup %2899 }
0x1277   :  { %v1703_v17 = vsel %vm151_vm9, %v2900_v3, 0.0 }
0x1278   :  { %1704 = vadd.xlane.f32.xlu1 %v1703_v17 }
0x127a   :  { %v2902_v5 = vpop.eup %2901 }
0x127b   :  { %v1616_v4 = vpop.xlane.xlu0 %1615  ;;  %v1507_v26 = vmul.f32 %v2902_v5, %v2896_v60 }
0x127c   :  { %2903 = vrcp.f32 %v1616_v4 }
0x1282   :  { %v2904_v9 = vpop.eup %2903 }
0x1283   :  { %v1618_v63 = vmul.f32 %v2904_v9, %v2898_v61 }
0x128e   :  { %v1509_v28 = vpop.permute.xlu0 %1508 }
0x128f   :  { %1529 = vmatpush.msrb.mxu2 %v1509_v28 }
0x1290   :  { %2647 = vmatmul.msk.f32.vlgmr.msrb.gmra.mxu2 %vm151_vm9, %v1507_v26 }
0x1291   :  { %1640 = vmatpush.msra.mxu2 %v1620_v7  ;;  %1708 = vrot.lane.b32.xlu1 %v3394_v62, %s2983_s27 }
0x1293   :  { %1752 = vmatpush.msrb.mxu2 %v1323_v53 }
0x1298   :  { %2652 = vmatmul.msk.f32.vlgmr.msra.gmra.mxu2 %vm151_vm9, %v1618_v63 }
0x12eb   :  { %v1705_v0 = vpop.xlane.xlu1 %1704 }
0x12ec   :  { %2905 = vrcp.f32 %v1705_v0 }
0x12f2   :  { %v2906_v31 = vpop.eup %2905 }
0x12f3   :  { %v1707_v32 = vmul.f32 %v2906_v31, %v2900_v3  ;;  %v1331_v31 = vld [vmem:[%s3861_s3 + $0x58] sm:$0xff] }
0x12f4   :  { %1883 = vmatpush.msra.mxu3 %v1331_v31  ;;  %v3675_v31 = vld [vmem:[%s3860_s2 + $0x40] sm:$0xff] }
0x1303   :  { %v1709_v33 = vpop.permute.xlu1 %1708 }
0x1304   :  { %1729 = vmatpush.msrb.mxu0 %v1709_v33 }
0x1305   :  { %2656 = vmatmul.msk.f32.vlgmr.msrb.gmra.mxu0 %vm151_vm9, %v1707_v32 }
0x1313   :  { %v1531_v62 = vpop.f32.mrf.mxu2 }
0x1314   :  { %2648 = vmatmul.msk.f32.vlgmr.msrb.gmra.mxu1 %vm151_vm9, %v1531_v62 }
0x131b   :  { %v1642_v34 = vpop.f32.mrf.mxu2 }
0x131c   :  { %2653 = vmatmul.msk.f32.vlgmr.msra.gmra.mxu1 %vm151_vm9, %v1642_v34 }
0x1382   :  { %v1731_v35 = vpop.f32.mrf.mxu0 }
0x1383   :  { %2657 = vmatmul.msk.f32.vlgmr.msrb.gmra.mxu2 %vm151_vm9, %v1731_v35 }
0x1391   :  { %v1554_v22 = vpop.f32.mrf.mxu1 }
0x1392   :  { %v1578_v37 = vadd.f32 %v1577_v45, %v1554_v22  ;;  %v1319_v45 = vld [vmem:[%s3860_s2 + $0x38] sm:$0xff] }
0x1393   :  { %v2765_v56 = vpack.i.bf16 %v1319_v45, %v2943_v55 }
0x1395   :  { %2766 = vrot.lane.b32.xlu1 %v2765_v56, %s2984_s18  ;;  %v2822_v56 = vld [vmem:[%s3863_s5 + $0x4] ss:$0 sm:$0xff] }
0x1399   :  { %v1665_v36 = vpop.f32.mrf.mxu1 }
0x139a   :  { %v1668_v38 = vadd.f32 %v1665_v36, %v1578_v37 }
0x139d   :  { %2771 = vrot.lane.b32.xlu1 %v3154_v11, %s2984_s18 }
0x13a5   :  { %2776 = vrot.lane.b32.xlu1 %v3170_v23, %s2984_s18 }
0x13ad   :  { %1842 = vrot.lane.b32.xlu1 %v1380_v21, %s2984_s18 }
0x13b5   :  { %1844 = vrot.lane.b32.xlu1 %v1809_v25, %s2984_s18  ;;  %v3669_v25 = vld [vmem:[%s3860_s2 + $0x50] sm:$0xff] }
0x1406   :  { %v1754_v39 = vpop.f32.mrf.mxu2 }
0x1407   :  { %v1757_v40 = vadd.f32 %v1754_v39, %v1668_v38  ;;  %v2767_v60 = vpop.permute.xlu1 %2766  ;;  %v2821_v39 = vld [vmem:[%s3863_s5 + $0x3] ss:$0 sm:$0xff] }
0x1408   :  { %v2769_v30 = vunpack.i.h.bf16 %v2767_v60  ;;  %v2768_v61 = vunpack.i.l.bf16 %v2767_v60  ;;  %v1329_v60 = vld [vmem:[%s3861_s3 + $0x48] sm:$0xff] }
0x1409   :  { %v1758_v46 = vadd.f32 %v3320_v43, %v1757_v40 }
0x140a   :  { %v1837_v11 = vsel %vm61_vm0, %v2768_v61, %v2769_v30  ;;  %v1327_v30 = vld [vmem:[%s3861_s3 + $0x38] sm:$0xff]  ;;  %v1326_v61 = vld [vmem:[%s3861_s3 + $0x30] sm:$0xff] }
0x140b   :  { %v3581_v51 = vadd.f32 %v2820_v44, %v1758_v46  ;;  %1863 = vmatpush.msrb.mxu1 %v1837_v11  ;;  %v1325_v11 = vld [vmem:[%s3861_s3 + $0x28] sm:$0xff] }
0x140d   :  { %v1763_v14 = vsel %vm61_vm0, %v3581_v51, 0.0 }
0x140e   :  { %1764 = vadd.xlane.f32.xlu0 %v1763_v14 }
0x140f   :  { %v2772_v1 = vpop.permute.xlu1 %2771 }
0x1410   :  { %v2774_v2 = vunpack.i.h.bf16 %v2772_v1  ;;  %v2773_v50 = vunpack.i.l.bf16 %v2772_v1 }
0x1412   :  { %v1836_v3 = vsel %vm61_vm0, %v2773_v50, %v2774_v2 }
0x1413   :  { %1864 = vmatpush.msrb.mxu1 %v1836_v3 }
0x1417   :  { %v2777_v5 = vpop.permute.xlu1 %2776 }
0x1418   :  { %v2779_v28 = vunpack.i.h.bf16 %v2777_v5  ;;  %v2778_v7 = vunpack.i.l.bf16 %v2777_v5 }
0x141a   :  { %v1835_v63 = vsel %vm61_vm0, %v2778_v7, %v2779_v28 }
0x141b   :  { %1865 = vmatpush.msrb.mxu1 %v1835_v63 }
0x1422   :  { %2781 = vrot.lane.b32.xlu0 %v3186_v27, %s2984_s18 }
0x1481   :  { %v1765_v43 = vpop.xlane.xlu0 %1764 }
0x1482   :  { %v1766_v27 = vmul.f32 %v1765_v43, %v3030_v8 }
0x1484   :  { %v1767_v57 = vsub.f32 %v3581_v51, %v1766_v27 }
0x1486   :  { %v1768_v58 = vmul.f32 %v1767_v57, %v1767_v57  ;;  %v1776_v45 = vmul.f32 %v2821_v39, %v1767_v57  ;;  %v1328_v57 = vld [vmem:[%s3861_s3 + $0x40] sm:$0xff] }
0x1488   :  { %v1769_v59 = vsel %vm61_vm0, %v1768_v58, 0.0 }
0x1489   :  { %1770 = vadd.xlane.f32.xlu2 %v1769_v59  ;;  %v1330_v59 = vld [vmem:[%s3861_s3 + $0x50] sm:$0xff] }
0x148a   :  { %1884 = vmatpush.msra.mxu3 %v1330_v59 }
0x148c   :  { %1885 = vmatpush.msra.mxu3 %v1329_v60 }
0x148e   :  { %1886 = vmatpush.msra.mxu3 %v1328_v57  ;;  %v2825_v57 = vld [vmem:[%s3863_s5 + $0x7] ss:$0 sm:$0xff] }
0x1490   :  { %1887 = vmatpush.msra.mxu3 %v1327_v30 }
0x1492   :  { %1888 = vmatpush.msra.mxu3 %v1326_v61 }
0x1494   :  { %v2782_v21 = vpop.permute.xlu0 %2781  ;;  %1889 = vmatpush.msra.mxu3 %v1325_v11 }
0x1495   :  { %v2784_v17 = vunpack.i.h.bf16 %v2782_v21  ;;  %v2783_v49 = vunpack.i.l.bf16 %v2782_v21 }
0x1497   :  { %v1834_v20 = vsel %vm61_vm0, %v2783_v49, %v2784_v17  ;;  %v2823_v17 = vld [vmem:[%s3863_s5 + $0x5] ss:$0 sm:$0xff] }
0x1498   :  { %1866 = vmatpush.msrb.mxu1 %v1834_v20 }
0x14fc   :  { %v1771_v23 = vpop.xlane.xlu2 %1770 }
0x14fd   :  { %v1772_v48 = vmul.f32 %v1771_v23, %v3059_v24  ;;  %v1324_v23 = vld [vmem:[%s3861_s3 + $0x20] sm:$0xff] }
0x14fe   :  { %1890 = vmatpush.msra.mxu3 %v1324_v23  ;;  %v3690_v23 = vld [vmem:[%s3862_s4 + $0x2] sm:$0x3] }
0x14ff   :  { %2907 = vrsqrt.f32 %v1772_v48  ;;  %vm1784_vm7 = vcmp.eq.f32.partialorder %v1772_v48, inf  ;;  %v1787_v34 = vand.u32 2147483648, %v1772_v48  ;;  %vm1786_vm8 = vcmp.eq.f32.partialorder %v1772_v48, 0.0 }
0x1505   :  { %v2908_v4 = vpop.eup %2907 }
0x1506   :  { %v1778_v26 = vmul.f32 %v2908_v4, %v1772_v48 }
0x1508   :  { %v1779_v9 = vmul.f32 %v2908_v4, %v1778_v26 }
0x150a   :  { %v1780_v0 = vmul.f32 0.5, %v1779_v9 }
0x150c   :  { %v1781_v32 = vsub.f32 1.5, %v1780_v0  ;;  %v3658_v0 = vld [vmem:[%s3860_s2 + $0x70] sm:$0xff] }
0x150d   :  { %1991 = vmatpush.msra.mxu0 %v3658_v0 }
0x150e   :  { %v1782_v33 = vmul.f32 %v2908_v4, %v1781_v32 }
0x1510   :  { %v1783_v62 = vmul.f32 %v1782_v33, %v1772_v48 }
0x1512   :  { %v1785_v53 = vsel %vm1784_vm7, %v1772_v48, %v1783_v62  ;;  %v1843_v48 = vpop.permute.xlu1 %1842 }
0x1513   :  { %v1788_v35 = vsel %vm1786_vm8, %v1787_v34, %v1785_v53 }
0x1514   :  { %v1789_v22 = vadd.f32 1e-06, %v1788_v35 }
0x1516   :  { %2909 = vrcp.f32 %v1789_v22  ;;  %v1801_v38 = vand.u32 2147483648, %v1789_v22  ;;  %v1799_v44 = vand.u32 2147483647, %v1789_v22  ;;  %vm1795_vm11 = vweird.f32 %v1789_v22 }
0x1518   :  { %v1802_v14 = vor.u32 1.1754944e-38, %v1801_v38  ;;  %vm1800_vm13 = vcmp.eq.f32.partialorder %v1799_v44, 8.507059e+37 }
0x151a   :  { %v1845_v1 = vpop.permute.xlu1 %1844 }
0x151b   :  { %v1846_v2 = vsel %vm61_vm0, %v1843_v48, %v1845_v1  ;;  %v1974_v48 = vperm.slane %v3690_v23, 0 }
0x151c   :  { %v2910_v36 = vpop.eup %2909 }
0x151d   :  { %v1791_v37 = vmul.f32 %v2910_v36, %v1789_v22  ;;  %vm1796_vm10 = vweird.f32 %v2910_v36 }
0x151e   :  { %vm1797_vm12 = vmor %vm1795_vm11, %vm1796_vm10 }
0x151f   :  { %v1792_v19 = vsub.f32 1.0, %v1791_v37 }
0x1521   :  { %v1793_v40 = vmul.f32 %v2910_v36, %v1792_v19 }
0x1523   :  { %v1794_v46 = vadd.f32 %v2910_v36, %v1793_v40 }
0x1525   :  { %v1798_v55 = vsel %vm1797_vm12, %v2910_v36, %v1794_v46 }
0x1526   :  { %v1803_v43 = vsel %vm1800_vm13, %v1802_v14, %v1798_v55  ;;  %v2824_v55 = vld [vmem:[%s3863_s5 + $0x6] ss:$0 sm:$0xff] }
0x1527   :  { %v1804_v27 = vmul.f32 %v1803_v43, %v1776_v45 }
0x1529   :  { %v1808_v58 = vadd.f32 %v2822_v56, %v1804_v27 }
0x152b   :  { %2658 = vmatmul.msk.f32.vlgmr.msrb.gmra.mxu1 %vm61_vm0, %v1808_v58 }
0x15a8   :  { %v1868_v50 = vpop.f32.mrf.mxu1 }
0x15a9   :  { %v1869_v3 = vadd.f32 %v1868_v50, %v1846_v2 }
0x15ab   :  { %v1871_v21 = vmax.f32 %v1869_v3, 0.0 }
0x15ad   :  { %2659 = vmatmul.msk.f32.vlgmr.msra.gmra.mxu3 %vm616_vm1, %v1871_v21 }
0x1630   :  { %v1892_v49 = vpop.f32.mrf.mxu3 }
0x1631   :  { %v1895_v4 = vadd.f32 %v1892_v49, %v3581_v51  ;;  %v3663_v51 = vld [vmem:[%s3860_s2 + $0x60] sm:$0xff] }
0x1632   :  { %1992 = vmatpush.msra.mxu0 %v3663_v51  ;;  %v2674_v49 = vld [vmem:[%s3861_s3 + $0x60] sm:$0xff] }
0x1633   :  { %v3648_v5 = vadd.f32 %v2823_v17, %v1895_v4  ;;  %2169 = vmatpush.msrb.mxu3 %v2674_v49 }
0x1634   :  { %1993 = vmatpush.msra.mxu0 %v3669_v25 }
0x1635   :  { %v1927_v26 = vsel %vm61_vm0, %v3648_v5, 0.0 }
0x1636   :  { %1928 = vadd.xlane.f32.xlu2 %v1927_v26  ;;  %1994 = vmatpush.msra.mxu0 %v3675_v31 }
0x16a9   :  { %v1929_v28 = vpop.xlane.xlu2 %1928 }
0x16aa   :  { %v1930_v7 = vmul.f32 %v1929_v28, %v3030_v8 }
0x16ac   :  { %v1931_v9 = vsub.f32 %v3648_v5, %v1930_v7 }
0x16ae   :  { %v1932_v63 = vmul.f32 %v1931_v9, %v1931_v9  ;;  %v1940_v59 = vmul.f32 %v2824_v55, %v1931_v9 }
0x16b0   :  { %v1933_v20 = vsel %vm61_vm0, %v1932_v63, 0.0 }
0x16b1   :  { %1934 = vadd.xlane.f32.xlu0 %v1933_v20 }
0x1724   :  { %v1935_v32 = vpop.xlane.xlu0 %1934 }
0x1725   :  { %v1936_v33 = vmul.f32 %v1935_v32, %v3059_v24 }
0x1727   :  { %2911 = vrsqrt.f32 %v1936_v33  ;;  %vm1948_vm14 = vcmp.eq.f32.partialorder %v1936_v33, inf  ;;  %v1951_v19 = vand.u32 2147483648, %v1936_v33  ;;  %vm1950_vm15 = vcmp.eq.f32.partialorder %v1936_v33, 0.0 }
0x172d   :  { %v2912_v62 = vpop.eup %2911 }
0x172e   :  { %v1942_v34 = vmul.f32 %v2912_v62, %v1936_v33 }
0x1730   :  { %v1943_v53 = vmul.f32 %v2912_v62, %v1942_v34 }
0x1732   :  { %v1944_v35 = vmul.f32 0.5, %v1943_v53 }
0x1734   :  { %v1945_v22 = vsub.f32 1.5, %v1944_v35 }
0x1736   :  { %v1946_v36 = vmul.f32 %v2912_v62, %v1945_v22 }
0x1738   :  { %v1947_v37 = vmul.f32 %v1946_v36, %v1936_v33 }
0x173a   :  { %v1949_v38 = vsel %vm1948_vm14, %v1936_v33, %v1947_v37 }
0x173b   :  { %v1952_v39 = vsel %vm1950_vm15, %v1951_v19, %v1949_v38 }
0x173c   :  { %v1953_v40 = vadd.f32 1e-06, %v1952_v39 }
0x173e   :  { %2913 = vrcp.f32 %v1953_v40  ;;  %v1965_v45 = vand.u32 2147483648, %v1953_v40  ;;  %v1963_v43 = vand.u32 2147483647, %v1953_v40  ;;  %vm1959_vm3 = vweird.f32 %v1953_v40 }
0x1740   :  { %v1966_v58 = vor.u32 1.1754944e-38, %v1965_v45  ;;  %vm1964_vm5 = vcmp.eq.f32.partialorder %v1963_v43, 8.507059e+37 }
0x1744   :  { %v2914_v44 = vpop.eup %2913 }
0x1745   :  { %v1955_v46 = vmul.f32 %v2914_v44, %v1953_v40  ;;  %vm1960_vm2 = vweird.f32 %v2914_v44 }
0x1746   :  { %vm1961_vm4 = vmor %vm1959_vm3, %vm1960_vm2 }
0x1747   :  { %v1956_v14 = vsub.f32 1.0, %v1955_v46 }
0x1749   :  { %v1957_v56 = vmul.f32 %v2914_v44, %v1956_v14 }
0x174b   :  { %v1958_v27 = vadd.f32 %v2914_v44, %v1957_v56 }
0x174d   :  { %v1962_v60 = vsel %vm1961_vm4, %v2914_v44, %v1958_v27 }
0x174e   :  { %v1967_v30 = vsel %vm1964_vm5, %v1966_v58, %v1962_v60 }
0x174f   :  { %v1968_v61 = vmul.f32 %v1967_v30, %v1940_v59 }
0x1751   :  { %v1972_v11 = vadd.f32 %v2825_v57, %v1968_v61 }
0x1753   :  { %2687 = vmatmul.msk.f32.vlgmr.msra.gmra.mxu0 %vm61_vm0, %v1972_v11 }
0x17d0   :  { %v1996_v1 = vpop.f32.mrf.mxu0 }
0x17d1   :  { %v3695_v2 = vadd.f32 %v1996_v1, %v1974_v48 }
0x17d3   :  { %2063 = vrot.lane.b32.xlu0 %v3695_v2, %s2978_s22  ;;  %2000 = vrot.lane.b32.xlu1 %v3695_v2, %s2974_s14  ;;  %s2985_s14 = smov [#allocation2]   ;;  %s2987_s22 = smov 8  }
0x17db   :  { %2174 = vrot.lane.b32.xlu0 %v3695_v2, %s2980_s24 }
0x1845   :  { %v2001_v50 = vpop.permute.xlu1 %2000  ;;  %v2064_v32 = vpop.permute.xlu0 %2063 }
0x1846   :  { %2688 = vmatpush.xpose.msk.msra.mxu2 %vm151_vm9, %v2001_v50  ;;  %v2675_v50 = vld [vmem:[%s3861_s3 + $0x68] sm:$0xff] }
0x1849   :  { %2689 = vmatmul.msk.f32.vlgmr.msra.gmra.mxu2 %vm151_vm9, %v3695_v2 }
0x184d   :  { %v2175_v34 = vpop.permute.xlu0 %2174 }
0x18cc   :  { %v2023_v3 = vpop.f32.mrf.mxu2 }
0x18cd   :  { %v2024_v21 = vadd.f32 %v3413_v52, %v2023_v3 }
0x18cf   :  { %v2026_v17 = vsel %vm151_vm9, %v2024_v21, -inf }
0x18d0   :  { %2027 = vmax.xlane.f32.xlu2 %v2026_v17 }
0x18e8   :  { %2037 = vrot.lane.b32.xlu2 %v3695_v2, %s2977_s21  ;;  %s2550_s21 = sshll.u32 %s3864_s6, 4  ;;  %s2551_s21 = int_to_ptr.hbm [resolvable:$true] %s2550_s21 }
0x18f0   :  { %2065 = vrot.lane.b32.xlu2 %v3695_v2, %s2973_s13  ;;  %s2548_s13 = sshll.u32 %s2985_s14, 4  ;;  %s2549_s13 = int_to_ptr.vmem [resolvable:$true] %s2548_s13 }
0x18f8   :  { %2265 = vrot.lane.b32.xlu2 %v3695_v2, %s2975_s15 }
0x1900   :  { %2176 = vrot.lane.b32.xlu2 %v3695_v2, %s2976_s16 }
0x1943   :  { %v2028_v4 = vpop.xlane.xlu2 %2027 }
0x1944   :  { %v2029_v26 = vsub.f32 %v2024_v21, %v2028_v4 }
0x1946   :  { %v2030_v28 = vmul.f32 1.442695, %v2029_v26 }
0x1948   :  { %2915 = vpow2.f32 %v2030_v28 }
0x194b   :  { %v2038_v7 = vpop.permute.xlu2 %2037 }
0x194c   :  { %2058 = vmatpush.msra.mxu1 %v2038_v7 }
0x194e   :  { %v2916_v9 = vpop.eup %2915  ;;  %2146 = vmatpush.msrb.mxu1 %v2675_v50 }
0x194f   :  { %v2032_v63 = vsel %vm151_vm9, %v2916_v9, 0.0 }
0x1950   :  { %2033 = vadd.xlane.f32.xlu1 %v2032_v63 }
0x1953   :  { %v2066_v20 = vpop.permute.xlu2 %2065 }
0x1954   :  { %2691 = vmatpush.xpose.msk.msrb.mxu0 %vm151_vm9, %v2066_v20 }
0x1957   :  { %2692 = vmatmul.msk.f32.vlgmr.msrb.gmra.mxu0 %vm151_vm9, %v2064_v32 }
0x195b   :  { %v2266_v33 = vpop.permute.xlu2 %2265 }
0x195c   :  { %2700 = vmatpush.xpose.msk.msra.mxu3 %vm151_vm9, %v2266_v33 }
0x1963   :  { %v2177_v62 = vpop.permute.xlu2 %2176 }
0x1964   :  { %2696 = vmatpush.xpose.msk.msra.mxu0 %vm151_vm9, %v2177_v62 }
0x1967   :  { %2697 = vmatmul.msk.f32.vlgmr.msra.gmra.mxu0 %vm151_vm9, %v2175_v34 }
0x1969   :  { %2263 = vrot.lane.b32.xlu1 %v3695_v2, %s2979_s23 }
0x19c3   :  { %v2034_v53 = vpop.xlane.xlu1 %2033 }
0x19c4   :  { %2917 = vrcp.f32 %v2034_v53 }
0x19ca   :  { %v2918_v35 = vpop.eup %2917 }
0x19cb   :  { %v2036_v22 = vmul.f32 %v2918_v35, %v2916_v9 }
0x19cd   :  { %2690 = vmatmul.msk.f32.vlgmr.msra.gmra.mxu1 %vm151_vm9, %v2036_v22 }
0x19d4   :  { %v2088_v36 = vpop.f32.mrf.mxu0 }
0x19d5   :  { %v2089_v37 = vadd.f32 %v3413_v52, %v2088_v36 }
0x19d7   :  { %v2091_v19 = vsel %vm151_vm9, %v2089_v37, -inf }
0x19d8   :  { %2092 = vmax.xlane.f32.xlu2 %v2091_v19  ;;  %v2667_v19 = vld [vmem:[%s3860_s2 + $0x48] sm:$0xff] }
0x19db   :  { %v2264_v55 = vpop.permute.xlu1 %2263 }
0x19e4   :  { %v2199_v38 = vpop.f32.mrf.mxu0 }
0x19e5   :  { %v2200_v39 = vadd.f32 %v3413_v52, %v2199_v38  ;;  %v2800_v38 = vpack.i.bf16 %v2667_v19, %v3675_v31 }
0x19e7   :  { %v2202_v40 = vsel %vm151_vm9, %v2200_v39, -inf }
0x19e8   :  { %2203 = vmax.xlane.f32.xlu0 %v2202_v40 }
0x19fc   :  { %2102 = vrot.lane.b32.xlu0 %v3695_v2, %s2982_s26 }
0x1a4a   :  { %v2060_v44 = vpop.f32.mrf.mxu1 }
0x1a4b   :  { %2695 = vmatmul.msk.f32.vlgmr.msrb.gmra.mxu3 %vm151_vm9, %v2060_v44  ;;  %v2093_v46 = vpop.xlane.xlu2 %2092  ;;  %v2669_v44 = vld [vmem:[%s3860_s2 + $0x58] sm:$0xff] }
0x1a4c   :  { %v2094_v14 = vsub.f32 %v2089_v37, %v2093_v46  ;;  %2477 = vmatpush.msrb.mxu3 %v3490_v10  ;;  %v2795_v31 = vpack.i.bf16 %v2669_v44, %v3669_v25  ;;  %v2828_v25 = vld [vmem:[%s3863_s5 + $0xb] ss:$0 sm:$0xff] }
0x1a4e   :  { %v2095_v45 = vmul.f32 1.442695, %v2094_v14  ;;  %2478 = vmatpush.msrb.mxu3 %v3495_v12 }
0x1a50   :  { %2919 = vpow2.f32 %v2095_v45  ;;  %2479 = vmatpush.msrb.mxu3 %v3501_v13 }
0x1a52   :  { %2480 = vmatpush.msrb.mxu3 %v3507_v15 }
0x1a53   :  { %2701 = vmatmul.msk.f32.vlgmr.msra.gmra.mxu3 %vm151_vm9, %v2264_v55 }
0x1a54   :  { %2481 = vmatpush.msrb.mxu3 %v3513_v16 }
0x1a56   :  { %v2920_v56 = vpop.eup %2919  ;;  %2482 = vmatpush.msrb.mxu3 %v3522_v54 }
0x1a57   :  { %v2097_v43 = vsel %vm151_vm9, %v2920_v56, 0.0 }
0x1a58   :  { %2098 = vadd.xlane.f32.xlu2 %v2097_v43  ;;  %2483 = vmatpush.msrb.mxu3 %v3528_v29 }
0x1a5a   :  { %2484 = vmatpush.msrb.mxu3 %v3534_v6 }
0x1a5b   :  { %v2204_v10 = vpop.xlane.xlu0 %2203 }
0x1a5c   :  { %v2205_v12 = vsub.f32 %v2200_v39, %v2204_v10  ;;  %v2785_v39 = vpack.i.bf16 %v3420_v41, %v3658_v0 }
0x1a5e   :  { %v2206_v13 = vmul.f32 1.442695, %v2205_v12 }
0x1a60   :  { %2921 = vpow2.f32 %v2206_v13 }
0x1a66   :  { %v2922_v27 = vpop.eup %2921 }
0x1a67   :  { %v2208_v15 = vsel %vm151_vm9, %v2922_v27, 0.0 }
0x1a68   :  { %2209 = vadd.xlane.f32.xlu2 %v2208_v15 }
0x1a6e   :  { %v2103_v58 = vpop.permute.xlu0 %2102 }
0x1a6f   :  { %2123 = vmatpush.msrb.mxu2 %v2103_v58 }
0x1a80   :  { %2213 = vrot.lane.b32.xlu2 %v3695_v2, %s2981_s25 }
0x1acb   :  { %v2099_v16 = vpop.xlane.xlu2 %2098 }
0x1acc   :  { %2923 = vrcp.f32 %v2099_v16 }
0x1ace   :  { %v2171_v54 = vpop.f32.mrf.mxu3 }
0x1ad2   :  { %v2924_v59 = vpop.eup %2923 }
0x1ad3   :  { %v2101_v29 = vmul.f32 %v2924_v59, %v2920_v56 }
0x1ad5   :  { %2693 = vmatmul.msk.f32.vlgmr.msrb.gmra.mxu2 %vm151_vm9, %v2101_v29 }
0x1ad6   :  { %v2288_v6 = vpop.f32.mrf.mxu3 }
0x1ad7   :  { %v2289_v60 = vadd.f32 %v3413_v52, %v2288_v6  ;;  %v2944_v52 = vld [vmem:[%s3861_s3 + $0x70] sm:$0xff]  ;;  %s2986_s3 = smov 128  }
0x1ad8   :  { %2257 = vmatpush.msra.mxu1 %v2944_v52 }
0x1ad9   :  { %v2291_v57 = vsel %vm151_vm9, %v2289_v60, -inf }
0x1ada   :  { %2292 = vmax.xlane.f32.xlu1 %v2291_v57 }
0x1adb   :  { %v2210_v30 = vpop.xlane.xlu2 %2209 }
0x1adc   :  { %2925 = vrcp.f32 %v2210_v30 }
0x1ae2   :  { %v2926_v61 = vpop.eup %2925 }
0x1ae3   :  { %v2212_v11 = vmul.f32 %v2926_v61, %v2922_v27  ;;  %v2214_v1 = vpop.permute.xlu2 %2213 }
0x1ae4   :  { %2234 = vmatpush.msra.mxu2 %v2214_v1 }
0x1ae5   :  { %2698 = vmatmul.msk.f32.vlgmr.msra.gmra.mxu2 %vm151_vm9, %v2212_v11 }
0x1ae6   :  { %2346 = vmatpush.msrb.mxu2 %v3382_v18 }
0x1b4d   :  { %v2293_v3 = vpop.xlane.xlu1 %2292 }
0x1b4e   :  { %v2294_v21 = vsub.f32 %v2289_v60, %v2293_v3 }
0x1b50   :  { %v2295_v17 = vmul.f32 1.442695, %v2294_v21 }
0x1b52   :  { %2927 = vpow2.f32 %v2295_v17 }
0x1b58   :  { %v2928_v49 = vpop.eup %2927  ;;  %v2125_v4 = vpop.f32.mrf.mxu2 }
0x1b59   :  { %2694 = vmatmul.msk.f32.vlgmr.msrb.gmra.mxu1 %vm151_vm9, %v2125_v4  ;;  %v2297_v18 = vsel %vm151_vm9, %v2928_v49, 0.0  ;;  %v2403_v4 = vperm.slane %v3690_v23, 1  ;;  %v2827_v23 = vld [vmem:[%s3863_s5 + $0x9] ss:$0 sm:$0xff] }
0x1b5a   :  { %2298 = vadd.xlane.f32.xlu1 %v2297_v18 }
0x1b68   :  { %v2236_v26 = vpop.f32.mrf.mxu2 }
0x1b69   :  { %2699 = vmatmul.msk.f32.vlgmr.msra.gmra.mxu1 %vm151_vm9, %v2236_v26 }
0x1b73   :  { %2302 = vrot.lane.b32.xlu1 %v3695_v2, %s2983_s27  ;;  %v2826_v2 = vld [vmem:[%s3863_s5 + $0x8] ss:$0 sm:$0xff] }
0x1b7b   :  { %2786 = vrot.lane.b32.xlu1 %v2785_v39, %s2984_s18 }
0x1bcd   :  { %v2299_v28 = vpop.xlane.xlu1 %2298 }
0x1bce   :  { %2929 = vrcp.f32 %v2299_v28 }
0x1bd4   :  { %v2930_v7 = vpop.eup %2929 }
0x1bd5   :  { %v2301_v9 = vmul.f32 %v2930_v7, %v2928_v49 }
0x1bd6   :  { %v2148_v32 = vpop.f32.mrf.mxu1 }
0x1bd7   :  { %v2172_v62 = vadd.f32 %v2171_v54, %v2148_v32 }
0x1be5   :  { %v2303_v63 = vpop.permute.xlu1 %2302 }
0x1be6   :  { %2323 = vmatpush.msrb.mxu0 %v2303_v63  ;;  %v2259_v33 = vpop.f32.mrf.mxu1 }
0x1be7   :  { %2702 = vmatmul.msk.f32.vlgmr.msrb.gmra.mxu0 %vm151_vm9, %v2301_v9  ;;  %v2262_v34 = vadd.f32 %v2259_v33, %v2172_v62 }
0x1bed   :  { %v2787_v43 = vpop.permute.xlu1 %2786 }
0x1bee   :  { %v2789_v10 = vunpack.i.h.bf16 %v2787_v43  ;;  %v2788_v12 = vunpack.i.l.bf16 %v2787_v43 }
0x1c64   :  { %v2325_v20 = vpop.f32.mrf.mxu0 }
0x1c65   :  { %2703 = vmatmul.msk.f32.vlgmr.msrb.gmra.mxu2 %vm151_vm9, %v2325_v20 }
0x1ce8   :  { %v2348_v53 = vpop.f32.mrf.mxu2 }
0x1ce9   :  { %v2351_v35 = vadd.f32 %v2348_v53, %v2262_v34 }
0x1ceb   :  { %v2352_v22 = vadd.f32 %v2351_v35, %v3648_v5  ;;  %v2671_v5 = vld [vmem:[%s3860_s2 + $0x68] sm:$0xff] }
0x1cec   :  { %v2790_v40 = vpack.i.bf16 %v2671_v5, %v3663_v51  ;;  %v1243_v51 = vadd.f32 %v3551_v42, %v3406_v47  ;;  %v2431_v47 = vsel %vm61_vm0, %v2788_v12, %v2789_v10 }
0x1ced   :  { %v3770_v36 = vadd.f32 %v2826_v2, %v2352_v22  ;;  %2457 = vmatpush.msrb.mxu1 %v2431_v47 }
0x1cee   :  { %2791 = vrot.lane.b32.xlu1 %v2790_v40, %s2984_s18  ;;  %v1247_v55 = vadd.f32 %v2828_v25, %v1243_v51 }
0x1cef   :  { %v2357_v37 = vsel %vm61_vm0, %v3770_v36, 0.0 }
0x1cf0   :  { %2358 = vadd.xlane.f32.xlu0 %v2357_v37  ;;  %v1252_v56 = vsel %vm61_vm0, %v1247_v55, 0.0 }
0x1cf6   :  { %2796 = vrot.lane.b32.xlu1 %v2795_v31, %s2984_s18 }
0x1cfe   :  { %2436 = vrot.lane.b32.xlu1 %v1974_v48, %s2984_s18 }
0x1d04   :  { %2801 = vrot.lane.b32.xlu0 %v2800_v38, %s2984_s18  ;;  %v2830_v38 = vld [vmem:[%s3863_s5 + $0xa] ss:$0 sm:$0xff] }
0x1d06   :  { %2438 = vrot.lane.b32.xlu1 %v2403_v4, %s2984_s18 }
0x1d60   :  { %v2792_v27 = vpop.permute.xlu1 %2791 }
0x1d61   :  { %v2794_v15 = vunpack.i.h.bf16 %v2792_v27  ;;  %v2793_v58 = vunpack.i.l.bf16 %v2792_v27 }
0x1d63   :  { %v2359_v46 = vpop.xlane.xlu0 %2358  ;;  %v2430_v16 = vsel %vm61_vm0, %v2793_v58, %v2794_v15  ;;  %v2829_v15 = vld [vmem:[%s3863_s5 + $0xc] ss:$0 sm:$0xff] }
0x1d64   :  { %v2360_v14 = vmul.f32 %v2359_v46, %v3030_v8  ;;  %2458 = vmatpush.msrb.mxu1 %v2430_v16 }
0x1d66   :  { %v3794_v41 = vsub.f32 %v3770_v36, %v2360_v14 }
0x1d68   :  { %v2362_v0 = vmul.f32 %v3794_v41, %v3794_v41  ;;  %v2797_v57 = vpop.permute.xlu1 %2796  ;;  %v2370_v37 = vmul.f32 %v2827_v23, %v3794_v41 }
0x1d69   :  { %v2799_v61 = vunpack.i.h.bf16 %v2797_v57  ;;  %v2798_v11 = vunpack.i.l.bf16 %v2797_v57 }
0x1d6a   :  { %v2363_v45 = vsel %vm61_vm0, %v2362_v0, 0.0 }
0x1d6b   :  { %2364 = vadd.xlane.f32.xlu2 %v2363_v45  ;;  %v2429_v52 = vsel %vm61_vm0, %v2798_v11, %v2799_v61 }
0x1d6c   :  { %2459 = vmatpush.msrb.mxu1 %v2429_v52 }
0x1d70   :  { %v2437_v12 = vpop.permute.xlu1 %2436 }
0x1d73   :  { %1253 = vadd.xlane.f32.xlu2 %v1252_v56 }
0x1d76   :  { %v2802_v48 = vpop.permute.xlu0 %2801 }
0x1d77   :  { %v2804_v59 = vunpack.i.h.bf16 %v2802_v48  ;;  %v2803_v29 = vunpack.i.l.bf16 %v2802_v48 }
0x1d78   :  { %v2439_v48 = vpop.permute.xlu1 %2438 }
0x1d79   :  { %v2428_v3 = vsel %vm61_vm0, %v2803_v29, %v2804_v59 }
0x1d7a   :  { %2460 = vmatpush.msrb.mxu1 %v2428_v3 }
0x1dde   :  { %v2365_v42 = vpop.xlane.xlu2 %2364 }
0x1ddf   :  { %v2366_v13 = vmul.f32 %v2365_v42, %v3059_v24 }
0x1de1   :  { %2931 = vrsqrt.f32 %v2366_v13  ;;  %vm2378_vm9 = vcmp.eq.f32.partialorder %v2366_v13, inf  ;;  %v2381_v7 = vand.u32 2147483648, %v2366_v13  ;;  %vm2380_vm6 = vcmp.eq.f32.partialorder %v2366_v13, 0.0 }
0x1de6   :  { %v1254_v54 = vpop.xlane.xlu2 %1253 }
0x1de7   :  { %v2932_v6 = vpop.eup %2931  ;;  %v1255_v60 = vmul.f32 %v1254_v54, %v3030_v8 }
0x1de8   :  { %v2372_v30 = vmul.f32 %v2932_v6, %v2366_v13 }
0x1de9   :  { %v3812_v1 = vsub.f32 %v1247_v55, %v1255_v60 }
0x1dea   :  { %v2373_v50 = vmul.f32 %v2932_v6, %v2372_v30  ;;  %v2833_v30 = vld [vmem:[%s3863_s5 + $0xd] ss:$0 sm:$0xff] }
0x1deb   :  { %v1257_v21 = vmul.f32 %v3812_v1, %v3812_v1  ;;  %v1265_v29 = vmul.f32 %v2829_v15, %v3812_v1  ;;  %v2831_v1 = vld [vmem:[%s3863_s5 + $0xb] ss:$0 sm:$0xff] }
0x1dec   :  { %v2374_v17 = vmul.f32 0.5, %v2373_v50 }
0x1ded   :  { %v1258_v49 = vsel %vm61_vm0, %v1257_v21, 0.0 }
0x1dee   :  { %v2375_v18 = vsub.f32 1.5, %v2374_v17  ;;  %1259 = vadd.xlane.f32.xlu2 %v1258_v49 }
0x1df0   :  { %v2376_v26 = vmul.f32 %v2932_v6, %v2375_v18  ;;  %v2440_v6 = vsel %vm61_vm0, %v2437_v12, %v2439_v48 }
0x1df2   :  { %v2377_v28 = vmul.f32 %v2376_v26, %v2366_v13 }
0x1df4   :  { %v2379_v9 = vsel %vm2378_vm9, %v2366_v13, %v2377_v28 }
0x1df5   :  { %v2382_v63 = vsel %vm2380_vm6, %v2381_v7, %v2379_v9 }
0x1df6   :  { %v2383_v20 = vadd.f32 1e-06, %v2382_v63 }
0x1df8   :  { %2933 = vrcp.f32 %v2383_v20  ;;  %v2395_v34 = vand.u32 2147483648, %v2383_v20  ;;  %v2393_v35 = vand.u32 2147483647, %v2383_v20  ;;  %vm2389_vm8 = vweird.f32 %v2383_v20 }
0x1dfa   :  { %v2396_v22 = vor.u32 1.1754944e-38, %v2395_v34  ;;  %vm2394_vm11 = vcmp.eq.f32.partialorder %v2393_v35, 8.507059e+37 }
0x1dfe   :  { %v2934_v32 = vpop.eup %2933 }
0x1dff   :  { %v2385_v33 = vmul.f32 %v2934_v32, %v2383_v20  ;;  %vm2390_vm7 = vweird.f32 %v2934_v32 }
0x1e00   :  { %vm2391_vm10 = vmor %vm2389_vm8, %vm2390_vm7 }
0x1e01   :  { %v2386_v62 = vsub.f32 1.0, %v2385_v33 }
0x1e03   :  { %v2387_v53 = vmul.f32 %v2934_v32, %v2386_v62 }
0x1e05   :  { %v2388_v2 = vadd.f32 %v2934_v32, %v2387_v53 }
0x1e07   :  { %v2392_v19 = vsel %vm2391_vm10, %v2934_v32, %v2388_v2 }
0x1e08   :  { %v2397_v39 = vsel %vm2394_vm11, %v2396_v22, %v2392_v19 }
0x1e09   :  { %v2398_v5 = vmul.f32 %v2397_v39, %v2370_v37 }
0x1e0b   :  { %v2402_v40 = vadd.f32 %v2830_v38, %v2398_v5 }
0x1e0d   :  { %2704 = vmatmul.msk.f32.vlgmr.msrb.gmra.mxu1 %vm61_vm0, %v2402_v40 }
0x1e61   :  { %v1260_v44 = vpop.xlane.xlu2 %1259 }
0x1e62   :  { %v1261_v31 = vmul.f32 %v1260_v44, %v3059_v24 }
0x1e64   :  { %2935 = vrsqrt.f32 %v1261_v31  ;;  %vm1273_vm12 = vcmp.eq.f32.partialorder %v1261_v31, inf  ;;  %v1276_v55 = vand.u32 2147483648, %v1261_v31  ;;  %vm1275_vm13 = vcmp.eq.f32.partialorder %v1261_v31, 0.0 }
0x1e6a   :  { %v2936_v46 = vpop.eup %2935 }
0x1e6b   :  { %v1267_v14 = vmul.f32 %v2936_v46, %v1261_v31 }
0x1e6d   :  { %v1268_v0 = vmul.f32 %v2936_v46, %v1267_v14 }
0x1e6f   :  { %v1269_v51 = vmul.f32 0.5, %v1268_v0  ;;  %v2834_v0 = vld [vmem:[%s3863_s5 + $0xd] ss:$0 sm:$0xff] }
0x1e71   :  { %v1270_v41 = vsub.f32 1.5, %v1269_v51 }
0x1e73   :  { %v1271_v45 = vmul.f32 %v2936_v46, %v1270_v41 }
0x1e75   :  { %v1272_v25 = vmul.f32 %v1271_v45, %v1261_v31 }
0x1e77   :  { %v1274_v56 = vsel %vm1273_vm12, %v1261_v31, %v1272_v25 }
0x1e78   :  { %v1277_v43 = vsel %vm1275_vm13, %v1276_v55, %v1274_v56 }
0x1e79   :  { %v1278_v10 = vadd.f32 1e-06, %v1277_v43 }
0x1e7b   :  { %2937 = vrcp.f32 %v1278_v10  ;;  %v1290_v27 = vand.u32 2147483648, %v1278_v10  ;;  %v1288_v16 = vand.u32 2147483647, %v1278_v10  ;;  %vm1284_vm15 = vweird.f32 %v1278_v10 }
0x1e7d   :  { %v1291_v59 = vor.u32 1.1754944e-38, %v1290_v27  ;;  %vm1289_vm3 = vcmp.eq.f32.partialorder %v1288_v16, 8.507059e+37 }
0x1e81   :  { %v2938_v47 = vpop.eup %2937 }
0x1e82   :  { %v1280_v42 = vmul.f32 %v2938_v47, %v1278_v10  ;;  %vm1285_vm14 = vweird.f32 %v2938_v47 }
0x1e83   :  { %vm1286_vm2 = vmor %vm1284_vm15, %vm1285_vm14 }
0x1e84   :  { %v1281_v13 = vsub.f32 1.0, %v1280_v42 }
0x1e86   :  { %v1282_v58 = vmul.f32 %v2938_v47, %v1281_v13 }
0x1e88   :  { %v1283_v54 = vadd.f32 %v2938_v47, %v1282_v58 }
0x1e8a   :  { %v2462_v60 = vpop.f32.mrf.mxu1  ;;  %v1287_v57 = vsel %vm1286_vm2, %v2938_v47, %v1283_v54 }
0x1e8b   :  { %v2463_v61 = vadd.f32 %v2462_v60, %v2440_v6  ;;  %v1292_v11 = vsel %vm1289_vm3, %v1291_v59, %v1287_v57 }
0x1e8c   :  { %v1293_v50 = vmul.f32 %v1292_v11, %v1265_v29 }
0x1e8d   :  { %v2465_v52 = vmax.f32 %v2463_v61, 0.0 }
0x1e8e   :  { %v1297_v3 = vadd.f32 %v2833_v30, %v1293_v50 }
0x1e8f   :  { %2705 = vmatmul.msk.f32.vlgmr.msrb.gmra.mxu3 %vm616_vm1, %v2465_v52 }
0x1e90   :  { %1298 = vst.msk [vmem:[#allocation2] sm:$0xff] %vm61_vm0, %v1297_v3 }
0x1f12   :  { %v2486_v21 = vpop.f32.mrf.mxu3 }
0x1f13   :  { %v2489_v17 = vadd.f32 %v2486_v21, %v3770_v36 }
0x1f15   :  { %v2493_v49 = vadd.f32 %v2831_v1, %v2489_v17 }
0x1f17   :  { %v2496_v4 = vsel %vm61_vm0, %v2493_v49, 0.0 }
0x1f18   :  { %2497 = vadd.xlane.f32.xlu1 %v2496_v4 }
0x1f8b   :  { %v2498_v18 = vpop.xlane.xlu1 %2497 }
0x1f8c   :  { %v2499_v26 = vmul.f32 %v2498_v18, %v3030_v8 }
0x1f8e   :  { %v2500_v28 = vsub.f32 %v2493_v49, %v2499_v26 }
0x1f90   :  { %v2501_v7 = vmul.f32 %v2500_v28, %v2500_v28 }
0x1f92   :  { %v2502_v9 = vsel %vm61_vm0, %v2501_v7, 0.0 }
0x1f93   :  { %2503 = vadd.xlane.f32.xlu0 %v2502_v9 }
0x2006   :  { %v2504_v63 = vpop.xlane.xlu0 %2503 }
0x2007   :  { %v2505_v20 = vmul.f32 %v2504_v63, %v3059_v24  ;;  %v2832_v24 = vld [vmem:[%s3863_s5 + $0xc] ss:$0 sm:$0xff] }
0x2008   :  { %v2509_v46 = vmul.f32 %v2832_v24, %v2500_v28 }
0x2009   :  { %2939 = vrsqrt.f32 %v2505_v20  ;;  %vm2517_vm1 = vcmp.eq.f32.partialorder %v2505_v20, inf  ;;  %v2520_v35 = vand.u32 2147483648, %v2505_v20  ;;  %vm2519_vm4 = vcmp.eq.f32.partialorder %v2505_v20, 0.0 }
0x200f   :  { %v2940_v32 = vpop.eup %2939 }
0x2010   :  { %v2511_v33 = vmul.f32 %v2940_v32, %v2505_v20 }
0x2012   :  { %v2512_v62 = vmul.f32 %v2940_v32, %v2511_v33 }
0x2014   :  { %v2513_v36 = vmul.f32 0.5, %v2512_v62 }
0x2016   :  { %v2514_v34 = vsub.f32 1.5, %v2513_v36 }
0x2018   :  { %v2515_v23 = vmul.f32 %v2940_v32, %v2514_v34 }
0x201a   :  { %v2516_v53 = vmul.f32 %v2515_v23, %v2505_v20 }
0x201c   :  { %v2518_v2 = vsel %vm2517_vm1, %v2505_v20, %v2516_v53 }
0x201d   :  { %v2521_v8 = vsel %vm2519_vm4, %v2520_v35, %v2518_v2 }
0x201e   :  { %v2522_v22 = vadd.f32 1e-06, %v2521_v8 }
0x2020   :  { %2941 = vrcp.f32 %v2522_v22  ;;  %v2534_v39 = vand.u32 2147483648, %v2522_v22  ;;  %v2532_v40 = vand.u32 2147483647, %v2522_v22  ;;  %vm2528_vm9 = vweird.f32 %v2522_v22 }
0x2022   :  { %v2535_v31 = vor.u32 1.1754944e-38, %v2534_v39  ;;  %vm2533_vm7 = vcmp.eq.f32.partialorder %v2532_v40, 8.507059e+37 }
0x2026   :  { %v2942_v37 = vpop.eup %2941 }
0x2027   :  { %v2524_v19 = vmul.f32 %v2942_v37, %v2522_v22  ;;  %vm2529_vm5 = vweird.f32 %v2942_v37 }
0x2028   :  { %vm2530_vm6 = vmor %vm2528_vm9, %vm2529_vm5 }
0x2029   :  { %v2525_v38 = vsub.f32 1.0, %v2524_v19 }
0x202b   :  { %v2526_v5 = vmul.f32 %v2942_v37, %v2525_v38 }
0x202d   :  { %v2527_v44 = vadd.f32 %v2942_v37, %v2526_v5 }
0x202f   :  { %v2531_v14 = vsel %vm2530_vm6, %v2942_v37, %v2527_v44 }
0x2030   :  { %v2536_v51 = vsel %vm2533_vm7, %v2535_v31, %v2531_v14 }
0x2031   :  { %v2537_v41 = vmul.f32 %v2536_v51, %v2509_v46 }
0x2033   :  { %v2541_v45 = vadd.f32 %v2834_v0, %v2537_v41 }
0x2035   :  { %2543 = vst.msk [vmem:[#allocation2 + $0x8] sm:$0xff] %vm61_vm0, %v2541_v45 }
0x2036   :  { %2556 = dma.vmem_to_hbm [thread:$0]  %s2549_s13, 256, %s2551_s21, [#allocation3], %s2986_s3, %s2986_s3, %s2987_s22  }
0x2037   :  { %2969 = dma.done.wait [#allocation3], 256  }
0x2038   :  { %2970 = vsyncadd [#allocation3], 4294967040 }
0x2039   :  { %2561 = vsyncpa [#allocation3], 1 }

</bundles_post_ra>
